<compile_context>
chip_gen: v5e
topology: v5e:2x2
jax: 0.10.0
libtpu: 0.0.40
codegen_flags: <defaults>
</compile_context>

<pallas_src>
import math
import functools

import numpy as np
import jax
import jax.numpy as jnp
from jax.experimental import pallas as pl
from jax.experimental.pallas import tpu as pltpu

EPS = 1e-5  # torch.nn.LayerNorm default eps


def _row_tile(n, max_tile=256):
    """Largest tile (<=max_tile, multiple of 8) dividing n; else the full extent."""
    for cand in (1024, 512, 256, 128, 64, 32, 16, 8):
        if cand <= max_tile and n % cand == 0:
            return cand
    return n


def _ff_tile(dff):
    """Tile of the d_ff reduction axis (multiple of 128) or full extent."""
    for cand in (2048, 1024, 512):
        if dff % cand == 0:
            return cand
    return dff


def _compiler_params(dim_sems, blocks):
    """blocks: (shape, dtype) of every pipelined block / scratch.  VMEM limit is
    estimated assuming double-buffering + 4 MiB headroom, clamped to [16, 48] MiB
    so it is safe across v5e/v6e (128 MiB physical) and v7x (64 MiB physical)."""
    need = sum(2 * math.prod(shp) * np.dtype(dt).itemsize for shp, dt in blocks)
    limit = int(min(max(need + (4 << 20), 16 << 20), 48 << 20))
    return pltpu.CompilerParams(dimension_semantics=dim_sems,
                                vmem_limit_bytes=limit)


# ------------------------------ kernel bodies -------------------------------
def _ln(x_ref, g_ref, b_ref):
    x = x_ref[...].astype(jnp.float32)
    mean = jnp.mean(x, axis=-1, keepdims=True)
    var = jnp.mean(jnp.square(x - mean), axis=-1, keepdims=True)
    return (x - mean) * jax.lax.rsqrt(var + EPS) * g_ref[...] + b_ref[...]


def _layernorm_kernel(x_ref, g_ref, b_ref, o_ref):
    o_ref[...] = _ln(x_ref, g_ref, b_ref).astype(o_ref.dtype)


def _ln_qkv_kernel(x_ref, g_ref, b_ref, w_ref, bias_ref, q_ref, kv_ref):
    # LayerNorm + single concatenated [D, 3D] projection; split into q / kv outputs.
    y = _ln(x_ref, g_ref, b_ref).astype(jnp.bfloat16)
    y3 = jnp.dot(y, w_ref[...], preferred_element_type=jnp.float32) + bias_ref[...]
    d = q_ref.shape[-1]
    q_ref[...] = y3[:, :d].astype(q_ref.dtype)
    kv_ref[...] = y3[:, d:].astype(kv_ref.dtype)


def _ln_linear_kernel(x_ref, g_ref, b_ref, w_ref, bias_ref, o_ref):
    y = _ln(x_ref, g_ref, b_ref).astype(jnp.bfloat16)
    o_ref[...] = (jnp.dot(y, w_ref[...], preferred_element_type=jnp.float32)
                  + bias_ref[...]).astype(o_ref.dtype)


def _linear_kernel(x_ref, w_ref, bias_ref, o_ref):
    y = x_ref[...].astype(jnp.bfloat16)
    o_ref[...] = (jnp.dot(y, w_ref[...], preferred_element_type=jnp.float32)
                  + bias_ref[...]).astype(o_ref.dtype)


def _ln_ffn_kernel(x_ref, g_ref, b_ref, w1_ref, b1_ref, w2_ref, b2_ref, o_ref,
                   ln_sc, acc_sc):
    # x + W2 @ relu(W1 @ LN(x) + b1) + b2, with d_ff as the (innermost) reduction
    # grid axis.  LN(x) is computed once (k==0) and cached; the second matmul
    # accumulates into an f32 VMEM scratch; residual + b2 added at the last step.
    k = pl.program_id(1)

    @pl.when(k == 0)
    def _():
        ln_sc[...] = _ln(x_ref, g_ref, b_ref).astype(jnp.bfloat16)
        acc_sc[...] = jnp.zeros_like(acc_sc)

    h = (jnp.dot(ln_sc[...], w1_ref[...], preferred_element_type=jnp.float32)
         + b1_ref[...])
    h = jnp.maximum(h, 0.0).astype(jnp.bfloat16)
    acc_sc[...] += jnp.dot(h, w2_ref[...], preferred_element_type=jnp.float32)

    @pl.when(k == pl.num_programs(1) - 1)
    def _():
        o_ref[...] = (x_ref[...].astype(jnp.float32) + acc_sc[...]
                      + b2_ref[...]).astype(o_ref.dtype)


def _attention_kernel(q_ref, kv_ref, m_ref, wo_ref, bo_ref, res_ref, o_ref,
                      ctx_sc, *, num_heads, scale):
    # One grid step = one (batch, query-tile).  Per-head contexts are written into
    # a [tq, D] bf16 scratch; the output projection is a single D-deep matmul.
    d = q_ref.shape[-1]
    dk = d // num_heads
    # Fold 1/sqrt(dk) into Q once ([tq, D]) instead of scaling [tq, S] per head.
    q = (q_ref[0].astype(jnp.float32) * scale).astype(jnp.bfloat16)   # [tq, D]
    kv = kv_ref[0]                       # bf16 [S, 2D]  (K | V concatenated)
    mask = m_ref[0]                      # [1, S] or [tq, S]; VPU-broadcast below
    # TODO(synk): for H >= 8 make heads a reduction grid axis (or fori_loop) and lay
    # Q/K|V out head-major so dk<128 head slices become tile-aligned DMA blocks.
    for h in range(num_heads):
        qh = q[:, h * dk:(h + 1) * dk]
        kh = kv[:, h * dk:(h + 1) * dk]
        vh = kv[:, d + h * dk:d + (h + 1) * dk]
        s = jax.lax.dot_general(qh, kh, (((1,), (1,)), ((), ())),
                                preferred_element_type=jnp.float32)     # [tq, S]
        s = jnp.where(mask > 0, s, -1e9)            # masked_fill(mask == 0, -1e9)
        s = s - jnp.max(s, axis=-1, keepdims=True)  # f32 softmax; fully-masked rows
        p = jnp.exp(s)                              # degrade to uniform (== torch ref)
        p = p * pl.reciprocal(jnp.sum(p, axis=-1, keepdims=True), approx=True)
        ctx_sc[:, h * dk:(h + 1) * dk] = jnp.dot(
            p.astype(jnp.bfloat16), vh,
            preferred_element_type=jnp.float32).astype(jnp.bfloat16)
    out = jnp.dot(ctx_sc[...], wo_ref[...], preferred_element_type=jnp.float32)
    o_ref[0] = (out + bo_ref[...] + res_ref[0].astype(jnp.float32)).astype(o_ref.dtype)


# ------------------------------ kernel wrappers ------------------------------
def layernorm(x2d, g, b):
    n, d = x2d.shape
    bn = _row_tile(n, max_tile=1024)     # mem-bound: prefer big row tiles
    blocks = [((bn, d), x2d.dtype), ((1, d), g.dtype), ((1, d), b.dtype),
              ((bn, d), x2d.dtype)]
    return pl.pallas_call(
        _layernorm_kernel,
        out_shape=jax.ShapeDtypeStruct((n, d), x2d.dtype),
        grid=(n // bn,),
        in_specs=[pl.BlockSpec((bn, d), lambda i: (i, 0)),
                  pl.BlockSpec((1, d), lambda i: (0, 0)),
                  pl.BlockSpec((1, d), lambda i: (0, 0))],
        out_specs=pl.BlockSpec((bn, d), lambda i: (i, 0)),
        compiler_params=_compiler_params(("parallel",), blocks),
    )(x2d, g, b)


def ln_qkv(x2d, g, b, wqkv, bqkv):
    n, d = x2d.shape
    bn = _row_tile(n, max_tile=256)
    blocks = [((bn, d), x2d.dtype), ((1, d), g.dtype), ((1, d), b.dtype),
              ((d, 3 * d), wqkv.dtype), ((1, 3 * d), bqkv.dtype),
              ((bn, d), jnp.bfloat16), ((bn, 2 * d), jnp.bfloat16)]
    return pl.pallas_call(
        _ln_qkv_kernel,
        out_shape=(jax.ShapeDtypeStruct((n, d), jnp.bfloat16),       # bf16 activations
                   jax.ShapeDtypeStruct((n, 2 * d), jnp.bfloat16)),  # halve HBM traffic
        grid=(n // bn,),
        in_specs=[pl.BlockSpec((bn, d), lambda i: (i, 0)),
                  pl.BlockSpec((1, d), lambda i: (0, 0)),
                  pl.BlockSpec((1, d), lambda i: (0, 0)),
                  pl.BlockSpec((d, 3 * d), lambda i: (0, 0)),
                  pl.BlockSpec((1, 3 * d), lambda i: (0, 0))],
        out_specs=(pl.BlockSpec((bn, d), lambda i: (i, 0)),
                   pl.BlockSpec((bn, 2 * d), lambda i: (i, 0))),
        compiler_params=_compiler_params(("parallel",), blocks),
    )(x2d, g, b, wqkv, bqkv)


def ln_linear(x2d, g, b, w, bias):
    n, d = x2d.shape
    dout = w.shape[1]
    bn = _row_tile(n, max_tile=256)
    blocks = [((bn, d), x2d.dtype), ((1, d), g.dtype), ((1, d), b.dtype),
              ((d, dout), w.dtype), ((1, dout), bias.dtype), ((bn, dout), jnp.bfloat16)]
    return pl.pallas_call(
        _ln_linear_kernel,
        out_shape=jax.ShapeDtypeStruct((n, dout), jnp.bfloat16),
        grid=(n // bn,),
        in_specs=[pl.BlockSpec((bn, d), lambda i: (i, 0)),
                  pl.BlockSpec((1, d), lambda i: (0, 0)),
                  pl.BlockSpec((1, d), lambda i: (0, 0)),
                  pl.BlockSpec((d, dout), lambda i: (0, 0)),
                  pl.BlockSpec((1, dout), lambda i: (0, 0))],
        out_specs=pl.BlockSpec((bn, dout), lambda i: (i, 0)),
        compiler_params=_compiler_params(("parallel",), blocks),
    )(x2d, g, b, w, bias)


def linear(x2d, w, bias):
    n, d = x2d.shape
    dout = w.shape[1]
    bn = _row_tile(n, max_tile=1024)     # mem-bound KV projection of encoder memory
    blocks = [((bn, d), x2d.dtype), ((d, dout), w.dtype), ((1, dout), bias.dtype),
              ((bn, dout), jnp.bfloat16)]
    return pl.pallas_call(
        _linear_kernel,
        out_shape=jax.ShapeDtypeStruct((n, dout), jnp.bfloat16),
        grid=(n // bn,),
        in_specs=[pl.BlockSpec((bn, d), lambda i: (i, 0)),
                  pl.BlockSpec((d, dout), lambda i: (0, 0)),
                  pl.BlockSpec((1, dout), lambda i: (0, 0))],
        out_specs=pl.BlockSpec((bn, dout), lambda i: (i, 0)),
        compiler_params=_compiler_params(("parallel",), blocks),
    )(x2d, w, bias)


def ln_ffn(x2d, g, b, w1, b1, w2, b2):
    n, d = x2d.shape
    dff = w1.shape[1]
    bn = _row_tile(n, max_tile=256)
    tff = _ff_tile(dff)
    blocks = [((bn, d), x2d.dtype), ((1, d), g.dtype), ((1, d), b.dtype),
              ((d, tff), w1.dtype), ((1, tff), b1.dtype),
              ((tff, d), w2.dtype), ((1, d), b2.dtype),
              ((bn, d), x2d.dtype), ((bn, d), jnp.bfloat16), ((bn, d), jnp.float32)]
    return pl.pallas_call(
        _ln_ffn_kernel,
        out_shape=jax.ShapeDtypeStruct((n, d), x2d.dtype),
        grid=(n // bn, dff // tff),
        in_specs=[pl.BlockSpec((bn, d), lambda i, k: (i, 0)),
                  pl.BlockSpec((1, d), lambda i, k: (0, 0)),
                  pl.BlockSpec((1, d), lambda i, k: (0, 0)),
                  pl.BlockSpec((d, tff), lambda i, k: (0, k)),
                  pl.BlockSpec((1, tff), lambda i, k: (0, k)),
                  pl.BlockSpec((tff, d), lambda i, k: (k, 0)),
                  pl.BlockSpec((1, d), lambda i, k: (0, 0))],
        out_specs=pl.BlockSpec((bn, d), lambda i, k: (i, 0)),
        scratch_shapes=[pltpu.VMEM((bn, d), jnp.bfloat16),   # cached LN(x) tile
                        pltpu.VMEM((bn, d), jnp.float32)],   # f32 accumulator
        compiler_params=_compiler_params(("parallel", "arbitrary"), blocks),
    )(x2d, g, b, w1, b1, w2, b2)


def attention_block(q, kv, mask, wo, bo, resid, num_heads):
    bsz, t, d = q.shape
    s = kv.shape[1]
    tq = _row_tile(t, max_tile=256)
    # Never materialize a broadcast [B,T,S] f32 mask; DMA the mask as-given in bf16
    # and let the kernel broadcast missing batch / query dims on the VPU.
    mask = mask.astype(jnp.bfloat16)
    mb, mt = mask.shape[0], mask.shape[1]
    if mt == 1:        # e.g. src_mask [B, 1, S]: one row, broadcast over queries
        m_block = (1, 1, s)
        m_spec = pl.BlockSpec(
            m_block,
            (lambda b, qi: (b, 0, 0)) if mb > 1 else (lambda b, qi: (0, 0, 0)))
    else:              # e.g. causal tgt_mask [1, T, T]: batch-invariant query tile
        m_block = (1, tq, s)
        m_spec = pl.BlockSpec(
            m_block,
            (lambda b, qi: (b, qi, 0)) if mb > 1 else (lambda b, qi: (0, qi, 0)))
    kern = functools.partial(_attention_kernel, num_heads=num_heads,
                             scale=1.0 / math.sqrt(d // num_heads))
    blocks = [((1, tq, d), q.dtype), ((1, s, 2 * d), kv.dtype),
              (m_block, jnp.bfloat16), ((d, d), wo.dtype), ((1, d), bo.dtype),
              ((1, tq, d), resid.dtype), ((1, tq, d), resid.dtype),
              ((tq, d), jnp.bfloat16)]
    return pl.pallas_call(
        kern,
        out_shape=jax.ShapeDtypeStruct((bsz, t, d), resid.dtype),
        grid=(bsz, t // tq),
        in_specs=[pl.BlockSpec((1, tq, d), lambda b, qi: (b, qi, 0)),
                  pl.BlockSpec((1, s, 2 * d), lambda b, qi: (b, 0, 0)),
                  m_spec,
                  pl.BlockSpec((d, d), lambda b, qi: (0, 0)),
                  pl.BlockSpec((1, d), lambda b, qi: (0, 0)),
                  pl.BlockSpec((1, tq, d), lambda b, qi: (b, qi, 0))],
        out_specs=pl.BlockSpec((1, tq, d), lambda b, qi: (b, qi, 0)),
        scratch_shapes=[pltpu.VMEM((tq, d), jnp.bfloat16)],   # per-head ctx columns
        compiler_params=_compiler_params(("parallel", "parallel"), blocks),
    )(q, kv, mask, wo, bo, resid)


# ------------------------------ decoder forward ------------------------------
def decoder_layer_forward(x, memory, src_mask, tgt_mask, lp, num_heads):
    B, T, D = x.shape
    S = memory.shape[1]

    # Sublayer 0: x + SelfAttn(LN(x), tgt_mask)
    sa = lp["self_attn"]
    q2d, kv2d = ln_qkv(x.reshape(B * T, D), lp["ln0_g"], lp["ln0_b"],
                       sa["wqkv"], sa["bqkv"])
    x = attention_block(q2d.reshape(B, T, D), kv2d.reshape(B, T, 2 * D),
                        tgt_mask, sa["wo"], sa["bo"], x, num_heads)

    # Sublayer 1: x + CrossAttn(LN(x), memory, src_mask)
    ca = lp["src_attn"]
    q2d = ln_linear(x.reshape(B * T, D), lp["ln1_g"], lp["ln1_b"], ca["wq"], ca["bq"])
    kv2d = linear(memory.reshape(B * S, D), ca["wkv"], ca["bkv"])
    x = attention_block(q2d.reshape(B, T, D), kv2d.reshape(B, S, 2 * D),
                        src_mask, ca["wo"], ca["bo"], x, num_heads)

    # Sublayer 2: x + FFN(LN(x))
    y2d = ln_ffn(x.reshape(B * T, D), lp["ln2_g"], lp["ln2_b"],
                 lp["w1"], lp["b1"], lp["w2"], lp["b2"])
    return y2d.reshape(B, T, D)


def decoder_forward(x, memory, src_mask, tgt_mask, params, num_heads):
    for lp in params["layers"]:
        x = decoder_layer_forward(x, memory, src_mask, tgt_mask, lp, num_heads)
    B, T, D = x.shape
    return layernorm(x.reshape(B * T, D),
                     params["norm_g"], params["norm_b"]).reshape(B, T, D)


# ------------------------------ parameter init -------------------------------
def _init_attn_params(key, d_model, fused_qkv):
    ks = jax.random.split(key, 4)
    s = 1.0 / math.sqrt(d_model)
    wq = jax.random.uniform(ks[0], (d_model, d_model), jnp.float32, -s, s)
    wk = jax.random.uniform(ks[1], (d_model, d_model), jnp.float32, -s, s)
    wv = jax.random.uniform(ks[2], (d_model, d_model), jnp.float32, -s, s)
    wo = jax.random.uniform(ks[3], (d_model, d_model), jnp.float32, -s, s)
    p = {"wo": wo.astype(jnp.bfloat16),
         "bo": jnp.zeros((1, d_model), jnp.float32)}
    if fused_qkv:   # self-attention: q, k, v all from the same input -> one [D,3D] matmul
        p["wqkv"] = jnp.concatenate([wq, wk, wv], axis=1).astype(jnp.bfloat16)
        p["bqkv"] = jnp.zeros((1, 3 * d_model), jnp.float32)
    else:           # cross-attention: q from x, k|v from memory -> [D,D] + [D,2D]
        p["wq"] = wq.astype(jnp.bfloat16)
        p["bq"] = jnp.zeros((1, d_model), jnp.float32)
        p["wkv"] = jnp.concatenate([wk, wv], axis=1).astype(jnp.bfloat16)
        p["bkv"] = jnp.zeros((1, 2 * d_model), jnp.float32)
    return p


def init_decoder_params(key, n_layers, d_model, d_ff):
    layers = []
    for _ in range(n_layers):
        key, k_self, k_src, k_w1, k_w2 = jax.random.split(key, 5)
        s1 = 1.0 / math.sqrt(d_model)
        s2 = 1.0 / math.sqrt(d_ff)
        layers.append({
            "self_attn": _init_attn_params(k_self, d_model, fused_qkv=True),
            "src_attn": _init_attn_params(k_src, d_model, fused_qkv=False),
            "w1": jax.random.uniform(k_w1, (d_model, d_ff), jnp.float32,
                                     -s1, s1).astype(jnp.bfloat16),
            "b1": jnp.zeros((1, d_ff), jnp.float32),
            "w2": jax.random.uniform(k_w2, (d_ff, d_model), jnp.float32,
                                     -s2, s2).astype(jnp.bfloat16),
            "b2": jnp.zeros((1, d_model), jnp.float32),
            "ln0_g": jnp.ones((1, d_model), jnp.float32),
            "ln0_b": jnp.zeros((1, d_model), jnp.float32),
            "ln1_g": jnp.ones((1, d_model), jnp.float32),
            "ln1_b": jnp.zeros((1, d_model), jnp.float32),
            "ln2_g": jnp.ones((1, d_model), jnp.float32),
            "ln2_b": jnp.zeros((1, d_model), jnp.float32),
        })
    return {"layers": layers,
            "norm_g": jnp.ones((1, d_model), jnp.float32),
            "norm_b": jnp.zeros((1, d_model), jnp.float32)}


# ----------------------------------- main ------------------------------------
if __name__ == "__main__":
    B, T, S, D, H, DFF, NLAYERS = 2, 8, 8, 32, 4, 64, 2

    root = jax.random.PRNGKey(0)
    kx, km, kp = jax.random.split(root, 3)
    x = jax.random.normal(kx, (B, T, D), jnp.float32)        # decoder input
    memory = jax.random.normal(km, (B, S, D), jnp.float32)   # encoder output

    # tgt_mask: causal [1, T, T]; src_mask: all-visible [B, 1, S] (1 = keep)
    tgt_mask = jnp.tril(jnp.ones((T, T), jnp.float32))[None, :, :]
    src_mask = jnp.ones((B, 1, S), jnp.float32)

    params = init_decoder_params(kp, NLAYERS, D, DFF)

    fwd = jax.jit(functools.partial(decoder_forward, num_heads=H))
    out = jax.block_until_ready(fwd(x, memory, src_mask, tgt_mask, params))
    assert out.shape == (B, T, D)
    assert bool(jnp.all(jnp.isfinite(out)))
    print("KERNEL_OK")
</pallas_src>

<mosaic_0001>
module attributes {stable_mosaic.version = 11 : i64} {
  func.func @_ln_linear_kernel(%arg0: i32, %arg1: memref<16x32xf32, #tpu.memory_space<vmem>>, %arg2: memref<1x32xf32, #tpu.memory_space<vmem>>, %arg3: memref<1x32xf32, #tpu.memory_space<vmem>>, %arg4: memref<32x32xbf16, #tpu.memory_space<vmem>>, %arg5: memref<1x32xf32, #tpu.memory_space<vmem>>, %arg6: memref<16x32xbf16, #tpu.memory_space<vmem>>) attributes {dimension_semantics = [#tpu.dimension_semantics<parallel>], iteration_bounds = array<i64: 1>, scalar_prefetch = 0 : i64, scratch_operands = 0 : i64, tpu.core_type = #tpu.core_type<tc>, window_params = [{transform_indices = @transform_0, window_bounds = array<i64: 16, 32>}, {pipeline_mode = #tpu.pipeline_mode<synchronous>, transform_indices = @transform_1, window_bounds = array<i64: 1, 32>}, {pipeline_mode = #tpu.pipeline_mode<synchronous>, transform_indices = @transform_2, window_bounds = array<i64: 1, 32>}, {pipeline_mode = #tpu.pipeline_mode<synchronous>, transform_indices = @transform_3, window_bounds = array<i64: 32, 32>}, {pipeline_mode = #tpu.pipeline_mode<synchronous>, transform_indices = @transform_4, window_bounds = array<i64: 1, 32>}, {transform_indices = @transform_5, window_bounds = array<i64: 16, 32>}]} {
    %c0 = arith.constant 0 : index
    %c0_0 = arith.constant 0 : index
    %0 = vector.load %arg1[%c0, %c0_0] : memref<16x32xf32, #tpu.memory_space<vmem>>, vector<16x32xf32>
    %cst = arith.constant dense<0.000000e+00> : vector<16xf32>
    %1 = vector.multi_reduction <add>, %0, %cst [1] : vector<16x32xf32> to vector<16xf32>
    %2 = vector.shape_cast %1 : vector<16xf32> to vector<16x1xf32>
    %cst_1 = arith.constant 3.200000e+01 : f32
    %3 = vector.broadcast %cst_1 : f32 to vector<16x1xf32>
    %4 = arith.divf %2, %3 : vector<16x1xf32>
    %5 = vector.broadcast %4 : vector<16x1xf32> to vector<16x32xf32>
    %6 = arith.subf %0, %5 : vector<16x32xf32>
    %7 = arith.mulf %6, %6 : vector<16x32xf32>
    %cst_2 = arith.constant dense<0.000000e+00> : vector<16xf32>
    %8 = vector.multi_reduction <add>, %7, %cst_2 [1] : vector<16x32xf32> to vector<16xf32>
    %9 = vector.shape_cast %8 : vector<16xf32> to vector<16x1xf32>
    %cst_3 = arith.constant 3.200000e+01 : f32
    %10 = vector.broadcast %cst_3 : f32 to vector<16x1xf32>
    %11 = arith.divf %9, %10 : vector<16x1xf32>
    %12 = vector.broadcast %4 : vector<16x1xf32> to vector<16x32xf32>
    %13 = arith.subf %0, %12 : vector<16x32xf32>
    %cst_4 = arith.constant 9.99999974E-6 : f32
    %14 = vector.broadcast %cst_4 : f32 to vector<16x1xf32>
    %15 = arith.addf %11, %14 : vector<16x1xf32>
    %16 = math.rsqrt %15 : vector<16x1xf32>
    %17 = vector.broadcast %16 : vector<16x1xf32> to vector<16x32xf32>
    %18 = arith.mulf %13, %17 : vector<16x32xf32>
    %c0_5 = arith.constant 0 : index
    %c0_6 = arith.constant 0 : index
    %19 = vector.load %arg2[%c0_5, %c0_6] : memref<1x32xf32, #tpu.memory_space<vmem>>, vector<1x32xf32>
    %20 = vector.broadcast %19 : vector<1x32xf32> to vector<16x32xf32>
    %21 = arith.mulf %18, %20 : vector<16x32xf32>
    %c0_7 = arith.constant 0 : index
    %c0_8 = arith.constant 0 : index
    %22 = vector.load %arg3[%c0_7, %c0_8] : memref<1x32xf32, #tpu.memory_space<vmem>>, vector<1x32xf32>
    %23 = vector.broadcast %22 : vector<1x32xf32> to vector<16x32xf32>
    %24 = arith.addf %21, %23 : vector<16x32xf32>
    %25 = arith.truncf %24 : vector<16x32xf32> to vector<16x32xbf16>
    %c0_9 = arith.constant 0 : index
    %c0_10 = arith.constant 0 : index
    %26 = vector.load %arg4[%c0_9, %c0_10] : memref<32x32xbf16, #tpu.memory_space<vmem>>, vector<32x32xbf16>
    %cst_11 = arith.constant dense<0.000000e+00> : vector<16x32xf32>
    %27 = tpu.matmul %25, %26, %cst_11 {dimension_numbers = #tpu.dot_dimension_numbers<[1], [0], [0], [1], [0, 0, 1, 1], [], []>} : vector<16x32xbf16>, vector<32x32xbf16>, vector<16x32xf32> -> vector<16x32xf32>
    %c0_12 = arith.constant 0 : index
    %c0_13 = arith.constant 0 : index
    %28 = vector.load %arg5[%c0_12, %c0_13] : memref<1x32xf32, #tpu.memory_space<vmem>>, vector<1x32xf32>
    %29 = vector.broadcast %28 : vector<1x32xf32> to vector<16x32xf32>
    %30 = arith.addf %27, %29 : vector<16x32xf32>
    %31 = arith.truncf %30 : vector<16x32xf32> to vector<16x32xbf16>
    %c0_14 = arith.constant 0 : index
    %c0_15 = arith.constant 0 : index
    %32 = vector.load %arg6[%c0_14, %c0_15] : memref<16x32xbf16, #tpu.memory_space<vmem>>, vector<16x32xbf16>
    tpu.vector_store %arg6[%c0_14, %c0_15], %31 {strides = array<i32>} : memref<16x32xbf16, #tpu.memory_space<vmem>>, vector<16x32xbf16>,
    return
  }
  func.func @transform_0(%arg0: i32) -> (i32, i32) {
    %c0_i32 = arith.constant 0 : i32
    %c0_i32_0 = arith.constant 0 : i32
    return %arg0, %c0_i32 : i32, i32
  }
  func.func @transform_1(%arg0: i32) -> (i32, i32) {
    %c0_i32 = arith.constant 0 : i32
    %c0_i32_0 = arith.constant 0 : i32
    %c0_i32_1 = arith.constant 0 : i32
    return %c0_i32, %c0_i32_0 : i32, i32
  }
  func.func @transform_2(%arg0: i32) -> (i32, i32) {
    %c0_i32 = arith.constant 0 : i32
    %c0_i32_0 = arith.constant 0 : i32
    %c0_i32_1 = arith.constant 0 : i32
    return %c0_i32, %c0_i32_0 : i32, i32
  }
  func.func @transform_3(%arg0: i32) -> (i32, i32) {
    %c0_i32 = arith.constant 0 : i32
    %c0_i32_0 = arith.constant 0 : i32
    %c0_i32_1 = arith.constant 0 : i32
    return %c0_i32, %c0_i32_0 : i32, i32
  }
  func.func @transform_4(%arg0: i32) -> (i32, i32) {
    %c0_i32 = arith.constant 0 : i32
    %c0_i32_0 = arith.constant 0 : i32
    %c0_i32_1 = arith.constant 0 : i32
    return %c0_i32, %c0_i32_0 : i32, i32
  }
  func.func @transform_5(%arg0: i32) -> (i32, i32) {
    %c0_i32 = arith.constant 0 : i32
    %c0_i32_0 = arith.constant 0 : i32
    return %arg0, %c0_i32 : i32, i32
  }
}

module attributes {stable_mosaic.version = 11 : i64} {
  func.func @_attention_kernel(%arg0: i32, %arg1: i32, %arg2: memref<1x8x32xbf16, #tpu.memory_space<vmem>>, %arg3: memref<1x8x64xbf16, #tpu.memory_space<vmem>>, %arg4: memref<1x8x8xbf16, #tpu.memory_space<vmem>>, %arg5: memref<32x32xbf16, #tpu.memory_space<vmem>>, %arg6: memref<1x32xf32, #tpu.memory_space<vmem>>, %arg7: memref<1x8x32xf32, #tpu.memory_space<vmem>>, %arg8: memref<1x8x32xf32, #tpu.memory_space<vmem>>, %arg9: memref<8x32xbf16, #tpu.memory_space<vmem>>) attributes {dimension_semantics = [#tpu.dimension_semantics<parallel>, #tpu.dimension_semantics<parallel>], iteration_bounds = array<i64: 2, 1>, scalar_prefetch = 0 : i64, scratch_operands = 1 : i64, tpu.core_type = #tpu.core_type<tc>, window_params = [{transform_indices = @transform_0, window_bounds = array<i64: 1, 8, 32>}, {transform_indices = @transform_1, window_bounds = array<i64: 1, 8, 64>}, {transform_indices = @transform_2, window_bounds = array<i64: 1, 8, 8>}, {pipeline_mode = #tpu.pipeline_mode<synchronous>, transform_indices = @transform_3, window_bounds = array<i64: 32, 32>}, {pipeline_mode = #tpu.pipeline_mode<synchronous>, transform_indices = @transform_4, window_bounds = array<i64: 1, 32>}, {transform_indices = @transform_5, window_bounds = array<i64: 1, 8, 32>}, {transform_indices = @transform_6, window_bounds = array<i64: 1, 8, 32>}]} {
    %c0 = arith.constant 0 : index
    %c0_0 = arith.constant 0 : index
    %c0_1 = arith.constant 0 : index
    %0 = vector.load %arg2[%c0, %c0_0, %c0_1] : memref<1x8x32xbf16, #tpu.memory_space<vmem>>, vector<1x8x32xbf16>
    %1 = vector.shape_cast %0 : vector<1x8x32xbf16> to vector<8x32xbf16>
    %2 = arith.extf %1 : vector<8x32xbf16> to vector<8x32xf32>
    %cst = arith.constant 0.353553385 : f32
    %3 = vector.broadcast %cst : f32 to vector<8x32xf32>
    %4 = arith.mulf %2, %3 : vector<8x32xf32>
    %5 = arith.truncf %4 : vector<8x32xf32> to vector<8x32xbf16>
    %c0_2 = arith.constant 0 : index
    %c0_3 = arith.constant 0 : index
    %c0_4 = arith.constant 0 : index
    %6 = vector.load %arg3[%c0_2, %c0_3, %c0_4] : memref<1x8x64xbf16, #tpu.memory_space<vmem>>, vector<1x8x64xbf16>
    %7 = vector.shape_cast %6 : vector<1x8x64xbf16> to vector<8x64xbf16>
    %c0_5 = arith.constant 0 : index
    %c0_6 = arith.constant 0 : index
    %c0_7 = arith.constant 0 : index
    %8 = vector.load %arg4[%c0_5, %c0_6, %c0_7] : memref<1x8x8xbf16, #tpu.memory_space<vmem>>, vector<1x8x8xbf16>
    %9 = vector.shape_cast %8 : vector<1x8x8xbf16> to vector<8x8xbf16>
    %10 = vector.extract_strided_slice %5 {offsets = [0, 0], sizes = [8, 8], strides = [1, 1]} : vector<8x32xbf16> to vector<8x8xbf16>
    %11 = vector.extract_strided_slice %7 {offsets = [0, 0], sizes = [8, 8], strides = [1, 1]} : vector<8x64xbf16> to vector<8x8xbf16>
    %12 = vector.extract_strided_slice %7 {offsets = [0, 32], sizes = [8, 8], strides = [1, 1]} : vector<8x64xbf16> to vector<8x8xbf16>
    %cst_8 = arith.constant dense<0.000000e+00> : vector<8x8xf32>
    %13 = tpu.matmul %10, %11, %cst_8 {dimension_numbers = #tpu.dot_dimension_numbers<[1], [1], [0], [0], [0, 0, 1, 0], [], []>} : vector<8x8xbf16>, vector<8x8xbf16>, vector<8x8xf32> -> vector<8x8xf32>
    %cst_9 = arith.constant 0.000000e+00 : bf16
    %14 = vector.broadcast %cst_9 : bf16 to vector<8x8xbf16>
    %15 = arith.cmpf ogt, %9, %14 : vector<8x8xbf16>
    %cst_10 = arith.constant -1.000000e+09 : f32
    %16 = vector.broadcast %cst_10 : f32 to vector<8x8xf32>
    %17 = arith.select %15, %13, %16 : vector<8x8xi1>, vector<8x8xf32>
    %cst_11 = arith.constant dense<0xFF800000> : vector<8xf32>
    %18 = vector.multi_reduction <maximumf>, %17, %cst_11 [1] : vector<8x8xf32> to vector<8xf32>
    %19 = vector.shape_cast %18 : vector<8xf32> to vector<8x1xf32>
    %20 = vector.broadcast %19 : vector<8x1xf32> to vector<8x8xf32>
    %21 = arith.subf %17, %20 : vector<8x8xf32>
    %22 = math.exp %21 : vector<8x8xf32>
    %cst_12 = arith.constant dense<0.000000e+00> : vector<8xf32>
    %23 = vector.multi_reduction <add>, %22, %cst_12 [1] : vector<8x8xf32> to vector<8xf32>
    %24 = vector.shape_cast %23 : vector<8xf32> to vector<8x1xf32>
    %25 = tpu.reciprocal %24 {approx = true} : vector<8x1xf32> -> vector<8x1xf32>
    %26 = vector.broadcast %25 : vector<8x1xf32> to vector<8x8xf32>
    %27 = arith.mulf %22, %26 : vector<8x8xf32>
    %28 = arith.truncf %27 : vector<8x8xf32> to vector<8x8xbf16>
    %cst_13 = arith.constant dense<0.000000e+00> : vector<8x8xf32>
    %29 = tpu.matmul %28, %12, %cst_13 {dimension_numbers = #tpu.dot_dimension_numbers<[1], [0], [0], [1], [0, 0, 1, 1], [], []>} : vector<8x8xbf16>, vector<8x8xbf16>, vector<8x8xf32> -> vector<8x8xf32>
    %30 = arith.truncf %29 : vector<8x8xf32> to vector<8x8xbf16>
    %c0_14 = arith.constant 0 : index
    %c0_15 = arith.constant 0 : index
    %31 = vector.load %arg9[%c0_14, %c0_15] : memref<8x32xbf16, #tpu.memory_space<vmem>>, vector<8x8xbf16>
    tpu.vector_store %arg9[%c0_14, %c0_15], %30 {strides = array<i32>} : memref<8x32xbf16, #tpu.memory_space<vmem>>, vector<8x8xbf16>,
    %32 = vector.extract_strided_slice %5 {offsets = [0, 8], sizes = [8, 8], strides = [1, 1]} : vector<8x32xbf16> to vector<8x8xbf16>
    %33 = vector.extract_strided_slice %7 {offsets = [0, 8], sizes = [8, 8], strides = [1, 1]} : vector<8x64xbf16> to vector<8x8xbf16>
    %34 = vector.extract_strided_slice %7 {offsets = [0, 40], sizes = [8, 8], strides = [1, 1]} : vector<8x64xbf16> to vector<8x8xbf16>
    %cst_16 = arith.constant dense<0.000000e+00> : vector<8x8xf32>
    %35 = tpu.matmul %32, %33, %cst_16 {dimension_numbers = #tpu.dot_dimension_numbers<[1], [1], [0], [0], [0, 0, 1, 0], [], []>} : vector<8x8xbf16>, vector<8x8xbf16>, vector<8x8xf32> -> vector<8x8xf32>
    %cst_17 = arith.constant 0.000000e+00 : bf16
    %36 = vector.broadcast %cst_17 : bf16 to vector<8x8xbf16>
    %37 = arith.cmpf ogt, %9, %36 : vector<8x8xbf16>
    %cst_18 = arith.constant -1.000000e+09 : f32
    %38 = vector.broadcast %cst_18 : f32 to vector<8x8xf32>
    %39 = arith.select %37, %35, %38 : vector<8x8xi1>, vector<8x8xf32>
    %cst_19 = arith.constant dense<0xFF800000> : vector<8xf32>
    %40 = vector.multi_reduction <maximumf>, %39, %cst_19 [1] : vector<8x8xf32> to vector<8xf32>
    %41 = vector.shape_cast %40 : vector<8xf32> to vector<8x1xf32>
    %42 = vector.broadcast %41 : vector<8x1xf32> to vector<8x8xf32>
    %43 = arith.subf %39, %42 : vector<8x8xf32>
    %44 = math.exp %43 : vector<8x8xf32>
    %cst_20 = arith.constant dense<0.000000e+00> : vector<8xf32>
    %45 = vector.multi_reduction <add>, %44, %cst_20 [1] : vector<8x8xf32> to vector<8xf32>
    %46 = vector.shape_cast %45 : vector<8xf32> to vector<8x1xf32>
    %47 = tpu.reciprocal %46 {approx = true} : vector<8x1xf32> -> vector<8x1xf32>
    %48 = vector.broadcast %47 : vector<8x1xf32> to vector<8x8xf32>
    %49 = arith.mulf %44, %48 : vector<8x8xf32>
    %50 = arith.truncf %49 : vector<8x8xf32> to vector<8x8xbf16>
    %cst_21 = arith.constant dense<0.000000e+00> : vector<8x8xf32>
    %51 = tpu.matmul %50, %34, %cst_21 {dimension_numbers = #tpu.dot_dimension_numbers<[1], [0], [0], [1], [0, 0, 1, 1], [], []>} : vector<8x8xbf16>, vector<8x8xbf16>, vector<8x8xf32> -> vector<8x8xf32>
    %52 = arith.truncf %51 : vector<8x8xf32> to vector<8x8xbf16>
    %c0_22 = arith.constant 0 : index
    %c8 = arith.constant 8 : index
    %53 = vector.load %arg9[%c0_22, %c8] : memref<8x32xbf16, #tpu.memory_space<vmem>>, vector<8x8xbf16>
    tpu.vector_store %arg9[%c0_22, %c8], %52 {strides = array<i32>} : memref<8x32xbf16, #tpu.memory_space<vmem>>, vector<8x8xbf16>,
    %54 = vector.extract_strided_slice %5 {offsets = [0, 16], sizes = [8, 8], strides = [1, 1]} : vector<8x32xbf16> to vector<8x8xbf16>
    %55 = vector.extract_strided_slice %7 {offsets = [0, 16], sizes = [8, 8], strides = [1, 1]} : vector<8x64xbf16> to vector<8x8xbf16>
    %56 = vector.extract_strided_slice %7 {offsets = [0, 48], sizes = [8, 8], strides = [1, 1]} : vector<8x64xbf16> to vector<8x8xbf16>
    %cst_23 = arith.constant dense<0.000000e+00> : vector<8x8xf32>
    %57 = tpu.matmul %54, %55, %cst_23 {dimension_numbers = #tpu.dot_dimension_numbers<[1], [1], [0], [0], [0, 0, 1, 0], [], []>} : vector<8x8xbf16>, vector<8x8xbf16>, vector<8x8xf32> -> vector<8x8xf32>
    %cst_24 = arith.constant 0.000000e+00 : bf16
    %58 = vector.broadcast %cst_24 : bf16 to vector<8x8xbf16>
    %59 = arith.cmpf ogt, %9, %58 : vector<8x8xbf16>
    %cst_25 = arith.constant -1.000000e+09 : f32
    %60 = vector.broadcast %cst_25 : f32 to vector<8x8xf32>
    %61 = arith.select %59, %57, %60 : vector<8x8xi1>, vector<8x8xf32>
    %cst_26 = arith.constant dense<0xFF800000> : vector<8xf32>
    %62 = vector.multi_reduction <maximumf>, %61, %cst_26 [1] : vector<8x8xf32> to vector<8xf32>
    %63 = vector.shape_cast %62 : vector<8xf32> to vector<8x1xf32>
    %64 = vector.broadcast %63 : vector<8x1xf32> to vector<8x8xf32>
    %65 = arith.subf %61, %64 : vector<8x8xf32>
    %66 = math.exp %65 : vector<8x8xf32>
    %cst_27 = arith.constant dense<0.000000e+00> : vector<8xf32>
    %67 = vector.multi_reduction <add>, %66, %cst_27 [1] : vector<8x8xf32> to vector<8xf32>
    %68 = vector.shape_cast %67 : vector<8xf32> to vector<8x1xf32>
    %69 = tpu.reciprocal %68 {approx = true} : vector<8x1xf32> -> vector<8x1xf32>
    %70 = vector.broadcast %69 : vector<8x1xf32> to vector<8x8xf32>
    %71 = arith.mulf %66, %70 : vector<8x8xf32>
    %72 = arith.truncf %71 : vector<8x8xf32> to vector<8x8xbf16>
    %cst_28 = arith.constant dense<0.000000e+00> : vector<8x8xf32>
    %73 = tpu.matmul %72, %56, %cst_28 {dimension_numbers = #tpu.dot_dimension_numbers<[1], [0], [0], [1], [0, 0, 1, 1], [], []>} : vector<8x8xbf16>, vector<8x8xbf16>, vector<8x8xf32> -> vector<8x8xf32>
    %74 = arith.truncf %73 : vector<8x8xf32> to vector<8x8xbf16>
    %c0_29 = arith.constant 0 : index
    %c16 = arith.constant 16 : index
    %75 = vector.load %arg9[%c0_29, %c16] : memref<8x32xbf16, #tpu.memory_space<vmem>>, vector<8x8xbf16>
    tpu.vector_store %arg9[%c0_29, %c16], %74 {strides = array<i32>} : memref<8x32xbf16, #tpu.memory_space<vmem>>, vector<8x8xbf16>,
    %76 = vector.extract_strided_slice %5 {offsets = [0, 24], sizes = [8, 8], strides = [1, 1]} : vector<8x32xbf16> to vector<8x8xbf16>
    %77 = vector.extract_strided_slice %7 {offsets = [0, 24], sizes = [8, 8], strides = [1, 1]} : vector<8x64xbf16> to vector<8x8xbf16>
    %78 = vector.extract_strided_slice %7 {offsets = [0, 56], sizes = [8, 8], strides = [1, 1]} : vector<8x64xbf16> to vector<8x8xbf16>
    %cst_30 = arith.constant dense<0.000000e+00> : vector<8x8xf32>
    %79 = tpu.matmul %76, %77, %cst_30 {dimension_numbers = #tpu.dot_dimension_numbers<[1], [1], [0], [0], [0, 0, 1, 0], [], []>} : vector<8x8xbf16>, vector<8x8xbf16>, vector<8x8xf32> -> vector<8x8xf32>
    %cst_31 = arith.constant 0.000000e+00 : bf16
    %80 = vector.broadcast %cst_31 : bf16 to vector<8x8xbf16>
    %81 = arith.cmpf ogt, %9, %80 : vector<8x8xbf16>
    %cst_32 = arith.constant -1.000000e+09 : f32
    %82 = vector.broadcast %cst_32 : f32 to vector<8x8xf32>
    %83 = arith.select %81, %79, %82 : vector<8x8xi1>, vector<8x8xf32>
    %cst_33 = arith.constant dense<0xFF800000> : vector<8xf32>
    %84 = vector.multi_reduction <maximumf>, %83, %cst_33 [1] : vector<8x8xf32> to vector<8xf32>
    %85 = vector.shape_cast %84 : vector<8xf32> to vector<8x1xf32>
    %86 = vector.broadcast %85 : vector<8x1xf32> to vector<8x8xf32>
    %87 = arith.subf %83, %86 : vector<8x8xf32>
    %88 = math.exp %87 : vector<8x8xf32>
    %cst_34 = arith.constant dense<0.000000e+00> : vector<8xf32>
    %89 = vector.multi_reduction <add>, %88, %cst_34 [1] : vector<8x8xf32> to vector<8xf32>
    %90 = vector.shape_cast %89 : vector<8xf32> to vector<8x1xf32>
    %91 = tpu.reciprocal %90 {approx = true} : vector<8x1xf32> -> vector<8x1xf32>
    %92 = vector.broadcast %91 : vector<8x1xf32> to vector<8x8xf32>
    %93 = arith.mulf %88, %92 : vector<8x8xf32>
    %94 = arith.truncf %93 : vector<8x8xf32> to vector<8x8xbf16>
    %cst_35 = arith.constant dense<0.000000e+00> : vector<8x8xf32>
    %95 = tpu.matmul %94, %78, %cst_35 {dimension_numbers = #tpu.dot_dimension_numbers<[1], [0], [0], [1], [0, 0, 1, 1], [], []>} : vector<8x8xbf16>, vector<8x8xbf16>, vector<8x8xf32> -> vector<8x8xf32>
    %96 = arith.truncf %95 : vector<8x8xf32> to vector<8x8xbf16>
    %c0_36 = arith.constant 0 : index
    %c24 = arith.constant 24 : index
    %97 = vector.load %arg9[%c0_36, %c24] : memref<8x32xbf16, #tpu.memory_space<vmem>>, vector<8x8xbf16>
    tpu.vector_store %arg9[%c0_36, %c24], %96 {strides = array<i32>} : memref<8x32xbf16, #tpu.memory_space<vmem>>, vector<8x8xbf16>,
    %c0_37 = arith.constant 0 : index
    %c0_38 = arith.constant 0 : index
    %98 = vector.load %arg9[%c0_37, %c0_38] : memref<8x32xbf16, #tpu.memory_space<vmem>>, vector<8x32xbf16>
    %c0_39 = arith.constant 0 : index
    %c0_40 = arith.constant 0 : index
    %99 = vector.load %arg5[%c0_39, %c0_40] : memref<32x32xbf16, #tpu.memory_space<vmem>>, vector<32x32xbf16>
    %cst_41 = arith.constant dense<0.000000e+00> : vector<8x32xf32>
    %100 = tpu.matmul %98, %99, %cst_41 {dimension_numbers = #tpu.dot_dimension_numbers<[1], [0], [0], [1], [0, 0, 1, 1], [], []>} : vector<8x32xbf16>, vector<32x32xbf16>, vector<8x32xf32> -> vector<8x32xf32>
    %c0_42 = arith.constant 0 : index
    %c0_43 = arith.constant 0 : index
    %101 = vector.load %arg6[%c0_42, %c0_43] : memref<1x32xf32, #tpu.memory_space<vmem>>, vector<1x32xf32>
    %102 = vector.broadcast %101 : vector<1x32xf32> to vector<8x32xf32>
    %103 = arith.addf %100, %102 : vector<8x32xf32>
    %c0_44 = arith.constant 0 : index
    %c0_45 = arith.constant 0 : index
    %c0_46 = arith.constant 0 : index
    %104 = vector.load %arg7[%c0_44, %c0_45, %c0_46] : memref<1x8x32xf32, #tpu.memory_space<vmem>>, vector<1x8x32xf32>
    %105 = vector.shape_cast %104 : vector<1x8x32xf32> to vector<8x32xf32>
    %106 = arith.addf %103, %105 : vector<8x32xf32>
    %c0_47 = arith.constant 0 : index
    %c0_48 = arith.constant 0 : index
    %c0_49 = arith.constant 0 : index
    %107 = vector.load %arg8[%c0_47, %c0_48, %c0_49] : memref<1x8x32xf32, #tpu.memory_space<vmem>>, vector<1x8x32xf32>
    %108 = vector.shape_cast %107 : vector<1x8x32xf32> to vector<8x32xf32>
    %109 = vector.shape_cast %106 : vector<8x32xf32> to vector<1x8x32xf32>
    tpu.vector_store %arg8[%c0_47, %c0_48, %c0_49], %109 {strides = array<i32>} : memref<1x8x32xf32, #tpu.memory_space<vmem>>, vector<1x8x32xf32>,
    return
  }
  func.func @transform_0(%arg0: i32, %arg1: i32) -> (i32, i32, i32) {
    %c0_i32 = arith.constant 0 : i32
    %c0_i32_0 = arith.constant 0 : i32
    return %arg0, %arg1, %c0_i32 : i32, i32, i32
  }
  func.func @transform_1(%arg0: i32, %arg1: i32) -> (i32, i32, i32) {
    %c0_i32 = arith.constant 0 : i32
    %c0_i32_0 = arith.constant 0 : i32
    %c0_i32_1 = arith.constant 0 : i32
    return %arg0, %c0_i32, %c0_i32_0 : i32, i32, i32
  }
  func.func @transform_2(%arg0: i32, %arg1: i32) -> (i32, i32, i32) {
    %c0_i32 = arith.constant 0 : i32
    %c0_i32_0 = arith.constant 0 : i32
    %c0_i32_1 = arith.constant 0 : i32
    return %c0_i32, %arg1, %c0_i32_0 : i32, i32, i32
  }
  func.func @transform_3(%arg0: i32, %arg1: i32) -> (i32, i32) {
    %c0_i32 = arith.constant 0 : i32
    %c0_i32_0 = arith.constant 0 : i32
    %c0_i32_1 = arith.constant 0 : i32
    return %c0_i32, %c0_i32_0 : i32, i32
  }
  func.func @transform_4(%arg0: i32, %arg1: i32) -> (i32, i32) {
    %c0_i32 = arith.constant 0 : i32
    %c0_i32_0 = arith.constant 0 : i32
    %c0_i32_1 = arith.constant 0 : i32
    return %c0_i32, %c0_i32_0 : i32, i32
  }
  func.func @transform_5(%arg0: i32, %arg1: i32) -> (i32, i32, i32) {
    %c0_i32 = arith.constant 0 : i32
    %c0_i32_0 = arith.constant 0 : i32
    return %arg0, %arg1, %c0_i32 : i32, i32, i32
  }
  func.func @transform_6(%arg0: i32, %arg1: i32) -> (i32, i32, i32) {
    %c0_i32 = arith.constant 0 : i32
    %c0_i32_0 = arith.constant 0 : i32
    return %arg0, %arg1, %c0_i32 : i32, i32, i32
  }
}

module attributes {stable_mosaic.version = 11 : i64} {
  func.func @_ln_qkv_kernel(%arg0: i32, %arg1: memref<16x32xf32, #tpu.memory_space<vmem>>, %arg2: memref<1x32xf32, #tpu.memory_space<vmem>>, %arg3: memref<1x32xf32, #tpu.memory_space<vmem>>, %arg4: memref<32x96xbf16, #tpu.memory_space<vmem>>, %arg5: memref<1x96xf32, #tpu.memory_space<vmem>>, %arg6: memref<16x32xbf16, #tpu.memory_space<vmem>>, %arg7: memref<16x64xbf16, #tpu.memory_space<vmem>>) attributes {dimension_semantics = [#tpu.dimension_semantics<parallel>], iteration_bounds = array<i64: 1>, scalar_prefetch = 0 : i64, scratch_operands = 0 : i64, tpu.core_type = #tpu.core_type<tc>, window_params = [{transform_indices = @transform_0, window_bounds = array<i64: 16, 32>}, {pipeline_mode = #tpu.pipeline_mode<synchronous>, transform_indices = @transform_1, window_bounds = array<i64: 1, 32>}, {pipeline_mode = #tpu.pipeline_mode<synchronous>, transform_indices = @transform_2, window_bounds = array<i64: 1, 32>}, {pipeline_mode = #tpu.pipeline_mode<synchronous>, transform_indices = @transform_3, window_bounds = array<i64: 32, 96>}, {pipeline_mode = #tpu.pipeline_mode<synchronous>, transform_indices = @transform_4, window_bounds = array<i64: 1, 96>}, {transform_indices = @transform_5, window_bounds = array<i64: 16, 32>}, {transform_indices = @transform_6, window_bounds = array<i64: 16, 64>}]} {
    %c0 = arith.constant 0 : index
    %c0_0 = arith.constant 0 : index
    %0 = vector.load %arg1[%c0, %c0_0] : memref<16x32xf32, #tpu.memory_space<vmem>>, vector<16x32xf32>
    %cst = arith.constant dense<0.000000e+00> : vector<16xf32>
    %1 = vector.multi_reduction <add>, %0, %cst [1] : vector<16x32xf32> to vector<16xf32>
    %2 = vector.shape_cast %1 : vector<16xf32> to vector<16x1xf32>
    %cst_1 = arith.constant 3.200000e+01 : f32
    %3 = vector.broadcast %cst_1 : f32 to vector<16x1xf32>
    %4 = arith.divf %2, %3 : vector<16x1xf32>
    %5 = vector.broadcast %4 : vector<16x1xf32> to vector<16x32xf32>
    %6 = arith.subf %0, %5 : vector<16x32xf32>
    %7 = arith.mulf %6, %6 : vector<16x32xf32>
    %cst_2 = arith.constant dense<0.000000e+00> : vector<16xf32>
    %8 = vector.multi_reduction <add>, %7, %cst_2 [1] : vector<16x32xf32> to vector<16xf32>
    %9 = vector.shape_cast %8 : vector<16xf32> to vector<16x1xf32>
    %cst_3 = arith.constant 3.200000e+01 : f32
    %10 = vector.broadcast %cst_3 : f32 to vector<16x1xf32>
    %11 = arith.divf %9, %10 : vector<16x1xf32>
    %12 = vector.broadcast %4 : vector<16x1xf32> to vector<16x32xf32>
    %13 = arith.subf %0, %12 : vector<16x32xf32>
    %cst_4 = arith.constant 9.99999974E-6 : f32
    %14 = vector.broadcast %cst_4 : f32 to vector<16x1xf32>
    %15 = arith.addf %11, %14 : vector<16x1xf32>
    %16 = math.rsqrt %15 : vector<16x1xf32>
    %17 = vector.broadcast %16 : vector<16x1xf32> to vector<16x32xf32>
    %18 = arith.mulf %13, %17 : vector<16x32xf32>
    %c0_5 = arith.constant 0 : index
    %c0_6 = arith.constant 0 : index
    %19 = vector.load %arg2[%c0_5, %c0_6] : memref<1x32xf32, #tpu.memory_space<vmem>>, vector<1x32xf32>
    %20 = vector.broadcast %19 : vector<1x32xf32> to vector<16x32xf32>
    %21 = arith.mulf %18, %20 : vector<16x32xf32>
    %c0_7 = arith.constant 0 : index
    %c0_8 = arith.constant 0 : index
    %22 = vector.load %arg3[%c0_7, %c0_8] : memref<1x32xf32, #tpu.memory_space<vmem>>, vector<1x32xf32>
    %23 = vector.broadcast %22 : vector<1x32xf32> to vector<16x32xf32>
    %24 = arith.addf %21, %23 : vector<16x32xf32>
    %25 = arith.truncf %24 : vector<16x32xf32> to vector<16x32xbf16>
    %c0_9 = arith.constant 0 : index
    %c0_10 = arith.constant 0 : index
    %26 = vector.load %arg4[%c0_9, %c0_10] : memref<32x96xbf16, #tpu.memory_space<vmem>>, vector<32x96xbf16>
    %cst_11 = arith.constant dense<0.000000e+00> : vector<16x96xf32>
    %27 = tpu.matmul %25, %26, %cst_11 {dimension_numbers = #tpu.dot_dimension_numbers<[1], [0], [0], [1], [0, 0, 1, 1], [], []>} : vector<16x32xbf16>, vector<32x96xbf16>, vector<16x96xf32> -> vector<16x96xf32>
    %c0_12 = arith.constant 0 : index
    %c0_13 = arith.constant 0 : index
    %28 = vector.load %arg5[%c0_12, %c0_13] : memref<1x96xf32, #tpu.memory_space<vmem>>, vector<1x96xf32>
    %29 = vector.broadcast %28 : vector<1x96xf32> to vector<16x96xf32>
    %30 = arith.addf %27, %29 : vector<16x96xf32>
    %31 = vector.extract_strided_slice %30 {offsets = [0, 0], sizes = [16, 32], strides = [1, 1]} : vector<16x96xf32> to vector<16x32xf32>
    %32 = arith.truncf %31 : vector<16x32xf32> to vector<16x32xbf16>
    %c0_14 = arith.constant 0 : index
    %c0_15 = arith.constant 0 : index
    %33 = vector.load %arg6[%c0_14, %c0_15] : memref<16x32xbf16, #tpu.memory_space<vmem>>, vector<16x32xbf16>
    tpu.vector_store %arg6[%c0_14, %c0_15], %32 {strides = array<i32>} : memref<16x32xbf16, #tpu.memory_space<vmem>>, vector<16x32xbf16>,
    %34 = vector.extract_strided_slice %30 {offsets = [0, 32], sizes = [16, 64], strides = [1, 1]} : vector<16x96xf32> to vector<16x64xf32>
    %35 = arith.truncf %34 : vector<16x64xf32> to vector<16x64xbf16>
    %c0_16 = arith.constant 0 : index
    %c0_17 = arith.constant 0 : index
    %36 = vector.load %arg7[%c0_16, %c0_17] : memref<16x64xbf16, #tpu.memory_space<vmem>>, vector<16x64xbf16>
    tpu.vector_store %arg7[%c0_16, %c0_17], %35 {strides = array<i32>} : memref<16x64xbf16, #tpu.memory_space<vmem>>, vector<16x64xbf16>,
    return
  }
  func.func @transform_0(%arg0: i32) -> (i32, i32) {
    %c0_i32 = arith.constant 0 : i32
    %c0_i32_0 = arith.constant 0 : i32
    return %arg0, %c0_i32 : i32, i32
  }
  func.func @transform_1(%arg0: i32) -> (i32, i32) {
    %c0_i32 = arith.constant 0 : i32
    %c0_i32_0 = arith.constant 0 : i32
    %c0_i32_1 = arith.constant 0 : i32
    return %c0_i32, %c0_i32_0 : i32, i32
  }
  func.func @transform_2(%arg0: i32) -> (i32, i32) {
    %c0_i32 = arith.constant 0 : i32
    %c0_i32_0 = arith.constant 0 : i32
    %c0_i32_1 = arith.constant 0 : i32
    return %c0_i32, %c0_i32_0 : i32, i32
  }
  func.func @transform_3(%arg0: i32) -> (i32, i32) {
    %c0_i32 = arith.constant 0 : i32
    %c0_i32_0 = arith.constant 0 : i32
    %c0_i32_1 = arith.constant 0 : i32
    return %c0_i32, %c0_i32_0 : i32, i32
  }
  func.func @transform_4(%arg0: i32) -> (i32, i32) {
    %c0_i32 = arith.constant 0 : i32
    %c0_i32_0 = arith.constant 0 : i32
    %c0_i32_1 = arith.constant 0 : i32
    return %c0_i32, %c0_i32_0 : i32, i32
  }
  func.func @transform_5(%arg0: i32) -> (i32, i32) {
    %c0_i32 = arith.constant 0 : i32
    %c0_i32_0 = arith.constant 0 : i32
    return %arg0, %c0_i32 : i32, i32
  }
  func.func @transform_6(%arg0: i32) -> (i32, i32) {
    %c0_i32 = arith.constant 0 : i32
    %c0_i32_0 = arith.constant 0 : i32
    return %arg0, %c0_i32 : i32, i32
  }
}

module attributes {stable_mosaic.version = 11 : i64} {
  func.func @_linear_kernel(%arg0: i32, %arg1: memref<16x32xf32, #tpu.memory_space<vmem>>, %arg2: memref<32x64xbf16, #tpu.memory_space<vmem>>, %arg3: memref<1x64xf32, #tpu.memory_space<vmem>>, %arg4: memref<16x64xbf16, #tpu.memory_space<vmem>>) attributes {dimension_semantics = [#tpu.dimension_semantics<parallel>], iteration_bounds = array<i64: 1>, scalar_prefetch = 0 : i64, scratch_operands = 0 : i64, tpu.core_type = #tpu.core_type<tc>, window_params = [{transform_indices = @transform_0, window_bounds = array<i64: 16, 32>}, {pipeline_mode = #tpu.pipeline_mode<synchronous>, transform_indices = @transform_1, window_bounds = array<i64: 32, 64>}, {pipeline_mode = #tpu.pipeline_mode<synchronous>, transform_indices = @transform_2, window_bounds = array<i64: 1, 64>}, {transform_indices = @transform_3, window_bounds = array<i64: 16, 64>}]} {
    %c0 = arith.constant 0 : index
    %c0_0 = arith.constant 0 : index
    %0 = vector.load %arg1[%c0, %c0_0] : memref<16x32xf32, #tpu.memory_space<vmem>>, vector<16x32xf32>
    %1 = arith.truncf %0 : vector<16x32xf32> to vector<16x32xbf16>
    %c0_1 = arith.constant 0 : index
    %c0_2 = arith.constant 0 : index
    %2 = vector.load %arg2[%c0_1, %c0_2] : memref<32x64xbf16, #tpu.memory_space<vmem>>, vector<32x64xbf16>
    %cst = arith.constant dense<0.000000e+00> : vector<16x64xf32>
    %3 = tpu.matmul %1, %2, %cst {dimension_numbers = #tpu.dot_dimension_numbers<[1], [0], [0], [1], [0, 0, 1, 1], [], []>} : vector<16x32xbf16>, vector<32x64xbf16>, vector<16x64xf32> -> vector<16x64xf32>
    %c0_3 = arith.constant 0 : index
    %c0_4 = arith.constant 0 : index
    %4 = vector.load %arg3[%c0_3, %c0_4] : memref<1x64xf32, #tpu.memory_space<vmem>>, vector<1x64xf32>
    %5 = vector.broadcast %4 : vector<1x64xf32> to vector<16x64xf32>
    %6 = arith.addf %3, %5 : vector<16x64xf32>
    %7 = arith.truncf %6 : vector<16x64xf32> to vector<16x64xbf16>
    %c0_5 = arith.constant 0 : index
    %c0_6 = arith.constant 0 : index
    %8 = vector.load %arg4[%c0_5, %c0_6] : memref<16x64xbf16, #tpu.memory_space<vmem>>, vector<16x64xbf16>
    tpu.vector_store %arg4[%c0_5, %c0_6], %7 {strides = array<i32>} : memref<16x64xbf16, #tpu.memory_space<vmem>>, vector<16x64xbf16>,
    return
  }
  func.func @transform_0(%arg0: i32) -> (i32, i32) {
    %c0_i32 = arith.constant 0 : i32
    %c0_i32_0 = arith.constant 0 : i32
    return %arg0, %c0_i32 : i32, i32
  }
  func.func @transform_1(%arg0: i32) -> (i32, i32) {
    %c0_i32 = arith.constant 0 : i32
    %c0_i32_0 = arith.constant 0 : i32
    %c0_i32_1 = arith.constant 0 : i32
    return %c0_i32, %c0_i32_0 : i32, i32
  }
  func.func @transform_2(%arg0: i32) -> (i32, i32) {
    %c0_i32 = arith.constant 0 : i32
    %c0_i32_0 = arith.constant 0 : i32
    %c0_i32_1 = arith.constant 0 : i32
    return %c0_i32, %c0_i32_0 : i32, i32
  }
  func.func @transform_3(%arg0: i32) -> (i32, i32) {
    %c0_i32 = arith.constant 0 : i32
    %c0_i32_0 = arith.constant 0 : i32
    return %arg0, %c0_i32 : i32, i32
  }
}

module attributes {stable_mosaic.version = 11 : i64} {
  func.func @_attention_kernel(%arg0: i32, %arg1: i32, %arg2: memref<1x8x32xbf16, #tpu.memory_space<vmem>>, %arg3: memref<1x8x64xbf16, #tpu.memory_space<vmem>>, %arg4: memref<1x1x8xbf16, #tpu.memory_space<vmem>>, %arg5: memref<32x32xbf16, #tpu.memory_space<vmem>>, %arg6: memref<1x32xf32, #tpu.memory_space<vmem>>, %arg7: memref<1x8x32xf32, #tpu.memory_space<vmem>>, %arg8: memref<1x8x32xf32, #tpu.memory_space<vmem>>, %arg9: memref<8x32xbf16, #tpu.memory_space<vmem>>) attributes {dimension_semantics = [#tpu.dimension_semantics<parallel>, #tpu.dimension_semantics<parallel>], iteration_bounds = array<i64: 2, 1>, scalar_prefetch = 0 : i64, scratch_operands = 1 : i64, tpu.core_type = #tpu.core_type<tc>, window_params = [{transform_indices = @transform_0, window_bounds = array<i64: 1, 8, 32>}, {transform_indices = @transform_1, window_bounds = array<i64: 1, 8, 64>}, {transform_indices = @transform_2, window_bounds = array<i64: 1, 1, 8>}, {pipeline_mode = #tpu.pipeline_mode<synchronous>, transform_indices = @transform_3, window_bounds = array<i64: 32, 32>}, {pipeline_mode = #tpu.pipeline_mode<synchronous>, transform_indices = @transform_4, window_bounds = array<i64: 1, 32>}, {transform_indices = @transform_5, window_bounds = array<i64: 1, 8, 32>}, {transform_indices = @transform_6, window_bounds = array<i64: 1, 8, 32>}]} {
    %c0 = arith.constant 0 : index
    %c0_0 = arith.constant 0 : index
    %c0_1 = arith.constant 0 : index
    %0 = vector.load %arg2[%c0, %c0_0, %c0_1] : memref<1x8x32xbf16, #tpu.memory_space<vmem>>, vector<1x8x32xbf16>
    %1 = vector.shape_cast %0 : vector<1x8x32xbf16> to vector<8x32xbf16>
    %2 = arith.extf %1 : vector<8x32xbf16> to vector<8x32xf32>
    %cst = arith.constant 0.353553385 : f32
    %3 = vector.broadcast %cst : f32 to vector<8x32xf32>
    %4 = arith.mulf %2, %3 : vector<8x32xf32>
    %5 = arith.truncf %4 : vector<8x32xf32> to vector<8x32xbf16>
    %c0_2 = arith.constant 0 : index
    %c0_3 = arith.constant 0 : index
    %c0_4 = arith.constant 0 : index
    %6 = vector.load %arg3[%c0_2, %c0_3, %c0_4] : memref<1x8x64xbf16, #tpu.memory_space<vmem>>, vector<1x8x64xbf16>
    %7 = vector.shape_cast %6 : vector<1x8x64xbf16> to vector<8x64xbf16>
    %c0_5 = arith.constant 0 : index
    %c0_6 = arith.constant 0 : index
    %c0_7 = arith.constant 0 : index
    %8 = vector.load %arg4[%c0_5, %c0_6, %c0_7] : memref<1x1x8xbf16, #tpu.memory_space<vmem>>, vector<1x1x8xbf16>
    %9 = vector.shape_cast %8 : vector<1x1x8xbf16> to vector<1x8xbf16>
    %10 = vector.extract_strided_slice %5 {offsets = [0, 0], sizes = [8, 8], strides = [1, 1]} : vector<8x32xbf16> to vector<8x8xbf16>
    %11 = vector.extract_strided_slice %7 {offsets = [0, 0], sizes = [8, 8], strides = [1, 1]} : vector<8x64xbf16> to vector<8x8xbf16>
    %12 = vector.extract_strided_slice %7 {offsets = [0, 32], sizes = [8, 8], strides = [1, 1]} : vector<8x64xbf16> to vector<8x8xbf16>
    %cst_8 = arith.constant dense<0.000000e+00> : vector<8x8xf32>
    %13 = tpu.matmul %10, %11, %cst_8 {dimension_numbers = #tpu.dot_dimension_numbers<[1], [1], [0], [0], [0, 0, 1, 0], [], []>} : vector<8x8xbf16>, vector<8x8xbf16>, vector<8x8xf32> -> vector<8x8xf32>
    %cst_9 = arith.constant 0.000000e+00 : bf16
    %14 = vector.broadcast %cst_9 : bf16 to vector<1x8xbf16>
    %15 = arith.cmpf ogt, %9, %14 : vector<1x8xbf16>
    %cst_10 = arith.constant -1.000000e+09 : f32
    %16 = vector.shape_cast %15 : vector<1x8xi1> to vector<1x8xi1>
    %17 = vector.broadcast %16 : vector<1x8xi1> to vector<8x8xi1>
    %18 = vector.broadcast %cst_10 : f32 to vector<8x8xf32>
    %19 = arith.select %17, %13, %18 : vector<8x8xi1>, vector<8x8xf32>
    %cst_11 = arith.constant dense<0xFF800000> : vector<8xf32>
    %20 = vector.multi_reduction <maximumf>, %19, %cst_11 [1] : vector<8x8xf32> to vector<8xf32>
    %21 = vector.shape_cast %20 : vector<8xf32> to vector<8x1xf32>
    %22 = vector.broadcast %21 : vector<8x1xf32> to vector<8x8xf32>
    %23 = arith.subf %19, %22 : vector<8x8xf32>
    %24 = math.exp %23 : vector<8x8xf32>
    %cst_12 = arith.constant dense<0.000000e+00> : vector<8xf32>
    %25 = vector.multi_reduction <add>, %24, %cst_12 [1] : vector<8x8xf32> to vector<8xf32>
    %26 = vector.shape_cast %25 : vector<8xf32> to vector<8x1xf32>
    %27 = tpu.reciprocal %26 {approx = true} : vector<8x1xf32> -> vector<8x1xf32>
    %28 = vector.broadcast %27 : vector<8x1xf32> to vector<8x8xf32>
    %29 = arith.mulf %24, %28 : vector<8x8xf32>
    %30 = arith.truncf %29 : vector<8x8xf32> to vector<8x8xbf16>
    %cst_13 = arith.constant dense<0.000000e+00> : vector<8x8xf32>
    %31 = tpu.matmul %30, %12, %cst_13 {dimension_numbers = #tpu.dot_dimension_numbers<[1], [0], [0], [1], [0, 0, 1, 1], [], []>} : vector<8x8xbf16>, vector<8x8xbf16>, vector<8x8xf32> -> vector<8x8xf32>
    %32 = arith.truncf %31 : vector<8x8xf32> to vector<8x8xbf16>
    %c0_14 = arith.constant 0 : index
    %c0_15 = arith.constant 0 : index
    %33 = vector.load %arg9[%c0_14, %c0_15] : memref<8x32xbf16, #tpu.memory_space<vmem>>, vector<8x8xbf16>
    tpu.vector_store %arg9[%c0_14, %c0_15], %32 {strides = array<i32>} : memref<8x32xbf16, #tpu.memory_space<vmem>>, vector<8x8xbf16>,
    %34 = vector.extract_strided_slice %5 {offsets = [0, 8], sizes = [8, 8], strides = [1, 1]} : vector<8x32xbf16> to vector<8x8xbf16>
    %35 = vector.extract_strided_slice %7 {offsets = [0, 8], sizes = [8, 8], strides = [1, 1]} : vector<8x64xbf16> to vector<8x8xbf16>
    %36 = vector.extract_strided_slice %7 {offsets = [0, 40], sizes = [8, 8], strides = [1, 1]} : vector<8x64xbf16> to vector<8x8xbf16>
    %cst_16 = arith.constant dense<0.000000e+00> : vector<8x8xf32>
    %37 = tpu.matmul %34, %35, %cst_16 {dimension_numbers = #tpu.dot_dimension_numbers<[1], [1], [0], [0], [0, 0, 1, 0], [], []>} : vector<8x8xbf16>, vector<8x8xbf16>, vector<8x8xf32> -> vector<8x8xf32>
    %cst_17 = arith.constant 0.000000e+00 : bf16
    %38 = vector.broadcast %cst_17 : bf16 to vector<1x8xbf16>
    %39 = arith.cmpf ogt, %9, %38 : vector<1x8xbf16>
    %cst_18 = arith.constant -1.000000e+09 : f32
    %40 = vector.shape_cast %39 : vector<1x8xi1> to vector<1x8xi1>
    %41 = vector.broadcast %40 : vector<1x8xi1> to vector<8x8xi1>
    %42 = vector.broadcast %cst_18 : f32 to vector<8x8xf32>
    %43 = arith.select %41, %37, %42 : vector<8x8xi1>, vector<8x8xf32>
    %cst_19 = arith.constant dense<0xFF800000> : vector<8xf32>
    %44 = vector.multi_reduction <maximumf>, %43, %cst_19 [1] : vector<8x8xf32> to vector<8xf32>
    %45 = vector.shape_cast %44 : vector<8xf32> to vector<8x1xf32>
    %46 = vector.broadcast %45 : vector<8x1xf32> to vector<8x8xf32>
    %47 = arith.subf %43, %46 : vector<8x8xf32>
    %48 = math.exp %47 : vector<8x8xf32>
    %cst_20 = arith.constant dense<0.000000e+00> : vector<8xf32>
    %49 = vector.multi_reduction <add>, %48, %cst_20 [1] : vector<8x8xf32> to vector<8xf32>
    %50 = vector.shape_cast %49 : vector<8xf32> to vector<8x1xf32>
    %51 = tpu.reciprocal %50 {approx = true} : vector<8x1xf32> -> vector<8x1xf32>
    %52 = vector.broadcast %51 : vector<8x1xf32> to vector<8x8xf32>
    %53 = arith.mulf %48, %52 : vector<8x8xf32>
    %54 = arith.truncf %53 : vector<8x8xf32> to vector<8x8xbf16>
    %cst_21 = arith.constant dense<0.000000e+00> : vector<8x8xf32>
    %55 = tpu.matmul %54, %36, %cst_21 {dimension_numbers = #tpu.dot_dimension_numbers<[1], [0], [0], [1], [0, 0, 1, 1], [], []>} : vector<8x8xbf16>, vector<8x8xbf16>, vector<8x8xf32> -> vector<8x8xf32>
    %56 = arith.truncf %55 : vector<8x8xf32> to vector<8x8xbf16>
    %c0_22 = arith.constant 0 : index
    %c8 = arith.constant 8 : index
    %57 = vector.load %arg9[%c0_22, %c8] : memref<8x32xbf16, #tpu.memory_space<vmem>>, vector<8x8xbf16>
    tpu.vector_store %arg9[%c0_22, %c8], %56 {strides = array<i32>} : memref<8x32xbf16, #tpu.memory_space<vmem>>, vector<8x8xbf16>,
    %58 = vector.extract_strided_slice %5 {offsets = [0, 16], sizes = [8, 8], strides = [1, 1]} : vector<8x32xbf16> to vector<8x8xbf16>
    %59 = vector.extract_strided_slice %7 {offsets = [0, 16], sizes = [8, 8], strides = [1, 1]} : vector<8x64xbf16> to vector<8x8xbf16>
    %60 = vector.extract_strided_slice %7 {offsets = [0, 48], sizes = [8, 8], strides = [1, 1]} : vector<8x64xbf16> to vector<8x8xbf16>
    %cst_23 = arith.constant dense<0.000000e+00> : vector<8x8xf32>
    %61 = tpu.matmul %58, %59, %cst_23 {dimension_numbers = #tpu.dot_dimension_numbers<[1], [1], [0], [0], [0, 0, 1, 0], [], []>} : vector<8x8xbf16>, vector<8x8xbf16>, vector<8x8xf32> -> vector<8x8xf32>
    %cst_24 = arith.constant 0.000000e+00 : bf16
    %62 = vector.broadcast %cst_24 : bf16 to vector<1x8xbf16>
    %63 = arith.cmpf ogt, %9, %62 : vector<1x8xbf16>
    %cst_25 = arith.constant -1.000000e+09 : f32
    %64 = vector.shape_cast %63 : vector<1x8xi1> to vector<1x8xi1>
    %65 = vector.broadcast %64 : vector<1x8xi1> to vector<8x8xi1>
    %66 = vector.broadcast %cst_25 : f32 to vector<8x8xf32>
    %67 = arith.select %65, %61, %66 : vector<8x8xi1>, vector<8x8xf32>
    %cst_26 = arith.constant dense<0xFF800000> : vector<8xf32>
    %68 = vector.multi_reduction <maximumf>, %67, %cst_26 [1] : vector<8x8xf32> to vector<8xf32>
    %69 = vector.shape_cast %68 : vector<8xf32> to vector<8x1xf32>
    %70 = vector.broadcast %69 : vector<8x1xf32> to vector<8x8xf32>
    %71 = arith.subf %67, %70 : vector<8x8xf32>
    %72 = math.exp %71 : vector<8x8xf32>
    %cst_27 = arith.constant dense<0.000000e+00> : vector<8xf32>
    %73 = vector.multi_reduction <add>, %72, %cst_27 [1] : vector<8x8xf32> to vector<8xf32>
    %74 = vector.shape_cast %73 : vector<8xf32> to vector<8x1xf32>
    %75 = tpu.reciprocal %74 {approx = true} : vector<8x1xf32> -> vector<8x1xf32>
    %76 = vector.broadcast %75 : vector<8x1xf32> to vector<8x8xf32>
    %77 = arith.mulf %72, %76 : vector<8x8xf32>
    %78 = arith.truncf %77 : vector<8x8xf32> to vector<8x8xbf16>
    %cst_28 = arith.constant dense<0.000000e+00> : vector<8x8xf32>
    %79 = tpu.matmul %78, %60, %cst_28 {dimension_numbers = #tpu.dot_dimension_numbers<[1], [0], [0], [1], [0, 0, 1, 1], [], []>} : vector<8x8xbf16>, vector<8x8xbf16>, vector<8x8xf32> -> vector<8x8xf32>
    %80 = arith.truncf %79 : vector<8x8xf32> to vector<8x8xbf16>
    %c0_29 = arith.constant 0 : index
    %c16 = arith.constant 16 : index
    %81 = vector.load %arg9[%c0_29, %c16] : memref<8x32xbf16, #tpu.memory_space<vmem>>, vector<8x8xbf16>
    tpu.vector_store %arg9[%c0_29, %c16], %80 {strides = array<i32>} : memref<8x32xbf16, #tpu.memory_space<vmem>>, vector<8x8xbf16>,
    %82 = vector.extract_strided_slice %5 {offsets = [0, 24], sizes = [8, 8], strides = [1, 1]} : vector<8x32xbf16> to vector<8x8xbf16>
    %83 = vector.extract_strided_slice %7 {offsets = [0, 24], sizes = [8, 8], strides = [1, 1]} : vector<8x64xbf16> to vector<8x8xbf16>
    %84 = vector.extract_strided_slice %7 {offsets = [0, 56], sizes = [8, 8], strides = [1, 1]} : vector<8x64xbf16> to vector<8x8xbf16>
    %cst_30 = arith.constant dense<0.000000e+00> : vector<8x8xf32>
    %85 = tpu.matmul %82, %83, %cst_30 {dimension_numbers = #tpu.dot_dimension_numbers<[1], [1], [0], [0], [0, 0, 1, 0], [], []>} : vector<8x8xbf16>, vector<8x8xbf16>, vector<8x8xf32> -> vector<8x8xf32>
    %cst_31 = arith.constant 0.000000e+00 : bf16
    %86 = vector.broadcast %cst_31 : bf16 to vector<1x8xbf16>
    %87 = arith.cmpf ogt, %9, %86 : vector<1x8xbf16>
    %cst_32 = arith.constant -1.000000e+09 : f32
    %88 = vector.shape_cast %87 : vector<1x8xi1> to vector<1x8xi1>
    %89 = vector.broadcast %88 : vector<1x8xi1> to vector<8x8xi1>
    %90 = vector.broadcast %cst_32 : f32 to vector<8x8xf32>
    %91 = arith.select %89, %85, %90 : vector<8x8xi1>, vector<8x8xf32>
    %cst_33 = arith.constant dense<0xFF800000> : vector<8xf32>
    %92 = vector.multi_reduction <maximumf>, %91, %cst_33 [1] : vector<8x8xf32> to vector<8xf32>
    %93 = vector.shape_cast %92 : vector<8xf32> to vector<8x1xf32>
    %94 = vector.broadcast %93 : vector<8x1xf32> to vector<8x8xf32>
    %95 = arith.subf %91, %94 : vector<8x8xf32>
    %96 = math.exp %95 : vector<8x8xf32>
    %cst_34 = arith.constant dense<0.000000e+00> : vector<8xf32>
    %97 = vector.multi_reduction <add>, %96, %cst_34 [1] : vector<8x8xf32> to vector<8xf32>
    %98 = vector.shape_cast %97 : vector<8xf32> to vector<8x1xf32>
    %99 = tpu.reciprocal %98 {approx = true} : vector<8x1xf32> -> vector<8x1xf32>
    %100 = vector.broadcast %99 : vector<8x1xf32> to vector<8x8xf32>
    %101 = arith.mulf %96, %100 : vector<8x8xf32>
    %102 = arith.truncf %101 : vector<8x8xf32> to vector<8x8xbf16>
    %cst_35 = arith.constant dense<0.000000e+00> : vector<8x8xf32>
    %103 = tpu.matmul %102, %84, %cst_35 {dimension_numbers = #tpu.dot_dimension_numbers<[1], [0], [0], [1], [0, 0, 1, 1], [], []>} : vector<8x8xbf16>, vector<8x8xbf16>, vector<8x8xf32> -> vector<8x8xf32>
    %104 = arith.truncf %103 : vector<8x8xf32> to vector<8x8xbf16>
    %c0_36 = arith.constant 0 : index
    %c24 = arith.constant 24 : index
    %105 = vector.load %arg9[%c0_36, %c24] : memref<8x32xbf16, #tpu.memory_space<vmem>>, vector<8x8xbf16>
    tpu.vector_store %arg9[%c0_36, %c24], %104 {strides = array<i32>} : memref<8x32xbf16, #tpu.memory_space<vmem>>, vector<8x8xbf16>,
    %c0_37 = arith.constant 0 : index
    %c0_38 = arith.constant 0 : index
    %106 = vector.load %arg9[%c0_37, %c0_38] : memref<8x32xbf16, #tpu.memory_space<vmem>>, vector<8x32xbf16>
    %c0_39 = arith.constant 0 : index
    %c0_40 = arith.constant 0 : index
    %107 = vector.load %arg5[%c0_39, %c0_40] : memref<32x32xbf16, #tpu.memory_space<vmem>>, vector<32x32xbf16>
    %cst_41 = arith.constant dense<0.000000e+00> : vector<8x32xf32>
    %108 = tpu.matmul %106, %107, %cst_41 {dimension_numbers = #tpu.dot_dimension_numbers<[1], [0], [0], [1], [0, 0, 1, 1], [], []>} : vector<8x32xbf16>, vector<32x32xbf16>, vector<8x32xf32> -> vector<8x32xf32>
    %c0_42 = arith.constant 0 : index
    %c0_43 = arith.constant 0 : index
    %109 = vector.load %arg6[%c0_42, %c0_43] : memref<1x32xf32, #tpu.memory_space<vmem>>, vector<1x32xf32>
    %110 = vector.broadcast %109 : vector<1x32xf32> to vector<8x32xf32>
    %111 = arith.addf %108, %110 : vector<8x32xf32>
    %c0_44 = arith.constant 0 : index
    %c0_45 = arith.constant 0 : index
    %c0_46 = arith.constant 0 : index
    %112 = vector.load %arg7[%c0_44, %c0_45, %c0_46] : memref<1x8x32xf32, #tpu.memory_space<vmem>>, vector<1x8x32xf32>
    %113 = vector.shape_cast %112 : vector<1x8x32xf32> to vector<8x32xf32>
    %114 = arith.addf %111, %113 : vector<8x32xf32>
    %c0_47 = arith.constant 0 : index
    %c0_48 = arith.constant 0 : index
    %c0_49 = arith.constant 0 : index
    %115 = vector.load %arg8[%c0_47, %c0_48, %c0_49] : memref<1x8x32xf32, #tpu.memory_space<vmem>>, vector<1x8x32xf32>
    %116 = vector.shape_cast %115 : vector<1x8x32xf32> to vector<8x32xf32>
    %117 = vector.shape_cast %114 : vector<8x32xf32> to vector<1x8x32xf32>
    tpu.vector_store %arg8[%c0_47, %c0_48, %c0_49], %117 {strides = array<i32>} : memref<1x8x32xf32, #tpu.memory_space<vmem>>, vector<1x8x32xf32>,
    return
  }
  func.func @transform_0(%arg0: i32, %arg1: i32) -> (i32, i32, i32) {
    %c0_i32 = arith.constant 0 : i32
    %c0_i32_0 = arith.constant 0 : i32
    return %arg0, %arg1, %c0_i32 : i32, i32, i32
  }
  func.func @transform_1(%arg0: i32, %arg1: i32) -> (i32, i32, i32) {
    %c0_i32 = arith.constant 0 : i32
    %c0_i32_0 = arith.constant 0 : i32
    %c0_i32_1 = arith.constant 0 : i32
    return %arg0, %c0_i32, %c0_i32_0 : i32, i32, i32
  }
  func.func @transform_2(%arg0: i32, %arg1: i32) -> (i32, i32, i32) {
    %c0_i32 = arith.constant 0 : i32
    %c0_i32_0 = arith.constant 0 : i32
    %c0_i32_1 = arith.constant 0 : i32
    return %arg0, %c0_i32, %c0_i32_0 : i32, i32, i32
  }
  func.func @transform_3(%arg0: i32, %arg1: i32) -> (i32, i32) {
    %c0_i32 = arith.constant 0 : i32
    %c0_i32_0 = arith.constant 0 : i32
    %c0_i32_1 = arith.constant 0 : i32
    return %c0_i32, %c0_i32_0 : i32, i32
  }
  func.func @transform_4(%arg0: i32, %arg1: i32) -> (i32, i32) {
    %c0_i32 = arith.constant 0 : i32
    %c0_i32_0 = arith.constant 0 : i32
    %c0_i32_1 = arith.constant 0 : i32
    return %c0_i32, %c0_i32_0 : i32, i32
  }
  func.func @transform_5(%arg0: i32, %arg1: i32) -> (i32, i32, i32) {
    %c0_i32 = arith.constant 0 : i32
    %c0_i32_0 = arith.constant 0 : i32
    return %arg0, %arg1, %c0_i32 : i32, i32, i32
  }
  func.func @transform_6(%arg0: i32, %arg1: i32) -> (i32, i32, i32) {
    %c0_i32 = arith.constant 0 : i32
    %c0_i32_0 = arith.constant 0 : i32
    return %arg0, %arg1, %c0_i32 : i32, i32, i32
  }
}

module attributes {stable_mosaic.version = 11 : i64} {
  func.func @_ln_ffn_kernel(%arg0: i32, %arg1: i32, %arg2: memref<16x32xf32, #tpu.memory_space<vmem>>, %arg3: memref<1x32xf32, #tpu.memory_space<vmem>>, %arg4: memref<1x32xf32, #tpu.memory_space<vmem>>, %arg5: memref<32x64xbf16, #tpu.memory_space<vmem>>, %arg6: memref<1x64xf32, #tpu.memory_space<vmem>>, %arg7: memref<64x32xbf16, #tpu.memory_space<vmem>>, %arg8: memref<1x32xf32, #tpu.memory_space<vmem>>, %arg9: memref<16x32xf32, #tpu.memory_space<vmem>>, %arg10: memref<16x32xbf16, #tpu.memory_space<vmem>>, %arg11: memref<16x32xf32, #tpu.memory_space<vmem>>) attributes {dimension_semantics = [#tpu.dimension_semantics<parallel>, #tpu.dimension_semantics<arbitrary>], iteration_bounds = array<i64: 1, 1>, scalar_prefetch = 0 : i64, scratch_operands = 2 : i64, tpu.core_type = #tpu.core_type<tc>, window_params = [{transform_indices = @transform_0, window_bounds = array<i64: 16, 32>}, {pipeline_mode = #tpu.pipeline_mode<synchronous>, transform_indices = @transform_1, window_bounds = array<i64: 1, 32>}, {pipeline_mode = #tpu.pipeline_mode<synchronous>, transform_indices = @transform_2, window_bounds = array<i64: 1, 32>}, {transform_indices = @transform_3, window_bounds = array<i64: 32, 64>}, {transform_indices = @transform_4, window_bounds = array<i64: 1, 64>}, {transform_indices = @transform_5, window_bounds = array<i64: 64, 32>}, {pipeline_mode = #tpu.pipeline_mode<synchronous>, transform_indices = @transform_6, window_bounds = array<i64: 1, 32>}, {transform_indices = @transform_7, window_bounds = array<i64: 16, 32>}]} {
    %c0_i32 = arith.constant 0 : i32
    %0 = arith.cmpi eq, %arg1, %c0_i32 : i32
    %1 = arith.extui %0 : i1 to i32
    %c0_i32_0 = arith.constant 0 : i32
    %2 = arith.cmpi ne, %1, %c0_i32_0 : i32
    scf.if %2 {
      %c0_16 = arith.constant 0 : index
      %c0_17 = arith.constant 0 : index
      %20 = vector.load %arg2[%c0_16, %c0_17] : memref<16x32xf32, #tpu.memory_space<vmem>>, vector<16x32xf32>
      %cst_18 = arith.constant dense<0.000000e+00> : vector<16xf32>
      %21 = vector.multi_reduction <add>, %20, %cst_18 [1] : vector<16x32xf32> to vector<16xf32>
      %22 = vector.shape_cast %21 : vector<16xf32> to vector<16x1xf32>
      %cst_19 = arith.constant 3.200000e+01 : f32
      %23 = vector.broadcast %cst_19 : f32 to vector<16x1xf32>
      %24 = arith.divf %22, %23 : vector<16x1xf32>
      %25 = vector.broadcast %24 : vector<16x1xf32> to vector<16x32xf32>
      %26 = arith.subf %20, %25 : vector<16x32xf32>
      %27 = arith.mulf %26, %26 : vector<16x32xf32>
      %cst_20 = arith.constant dense<0.000000e+00> : vector<16xf32>
      %28 = vector.multi_reduction <add>, %27, %cst_20 [1] : vector<16x32xf32> to vector<16xf32>
      %29 = vector.shape_cast %28 : vector<16xf32> to vector<16x1xf32>
      %cst_21 = arith.constant 3.200000e+01 : f32
      %30 = vector.broadcast %cst_21 : f32 to vector<16x1xf32>
      %31 = arith.divf %29, %30 : vector<16x1xf32>
      %32 = vector.broadcast %24 : vector<16x1xf32> to vector<16x32xf32>
      %33 = arith.subf %20, %32 : vector<16x32xf32>
      %cst_22 = arith.constant 9.99999974E-6 : f32
      %34 = vector.broadcast %cst_22 : f32 to vector<16x1xf32>
      %35 = arith.addf %31, %34 : vector<16x1xf32>
      %36 = math.rsqrt %35 : vector<16x1xf32>
      %37 = vector.broadcast %36 : vector<16x1xf32> to vector<16x32xf32>
      %38 = arith.mulf %33, %37 : vector<16x32xf32>
      %c0_23 = arith.constant 0 : index
      %c0_24 = arith.constant 0 : index
      %39 = vector.load %arg3[%c0_23, %c0_24] : memref<1x32xf32, #tpu.memory_space<vmem>>, vector<1x32xf32>
      %40 = vector.broadcast %39 : vector<1x32xf32> to vector<16x32xf32>
      %41 = arith.mulf %38, %40 : vector<16x32xf32>
      %c0_25 = arith.constant 0 : index
      %c0_26 = arith.constant 0 : index
      %42 = vector.load %arg4[%c0_25, %c0_26] : memref<1x32xf32, #tpu.memory_space<vmem>>, vector<1x32xf32>
      %43 = vector.broadcast %42 : vector<1x32xf32> to vector<16x32xf32>
      %44 = arith.addf %41, %43 : vector<16x32xf32>
      %45 = arith.truncf %44 : vector<16x32xf32> to vector<16x32xbf16>
      %c0_27 = arith.constant 0 : index
      %c0_28 = arith.constant 0 : index
      %46 = vector.load %arg10[%c0_27, %c0_28] : memref<16x32xbf16, #tpu.memory_space<vmem>>, vector<16x32xbf16>
      tpu.vector_store %arg10[%c0_27, %c0_28], %45 {strides = array<i32>} : memref<16x32xbf16, #tpu.memory_space<vmem>>, vector<16x32xbf16>,
      %cst_29 = arith.constant 0.000000e+00 : f32
      %47 = vector.broadcast %cst_29 : f32 to vector<16x32xf32>
      %c0_30 = arith.constant 0 : index
      %c0_31 = arith.constant 0 : index
      %48 = vector.load %arg11[%c0_30, %c0_31] : memref<16x32xf32, #tpu.memory_space<vmem>>, vector<16x32xf32>
      tpu.vector_store %arg11[%c0_30, %c0_31], %47 {strides = array<i32>} : memref<16x32xf32, #tpu.memory_space<vmem>>, vector<16x32xf32>,
    } else {
    }
    %c0 = arith.constant 0 : index
    %c0_1 = arith.constant 0 : index
    %3 = vector.load %arg10[%c0, %c0_1] : memref<16x32xbf16, #tpu.memory_space<vmem>>, vector<16x32xbf16>
    %c0_2 = arith.constant 0 : index
    %c0_3 = arith.constant 0 : index
    %4 = vector.load %arg5[%c0_2, %c0_3] : memref<32x64xbf16, #tpu.memory_space<vmem>>, vector<32x64xbf16>
    %cst = arith.constant dense<0.000000e+00> : vector<16x64xf32>
    %5 = tpu.matmul %3, %4, %cst {dimension_numbers = #tpu.dot_dimension_numbers<[1], [0], [0], [1], [0, 0, 1, 1], [], []>} : vector<16x32xbf16>, vector<32x64xbf16>, vector<16x64xf32> -> vector<16x64xf32>
    %c0_4 = arith.constant 0 : index
    %c0_5 = arith.constant 0 : index
    %6 = vector.load %arg6[%c0_4, %c0_5] : memref<1x64xf32, #tpu.memory_space<vmem>>, vector<1x64xf32>
    %7 = vector.broadcast %6 : vector<1x64xf32> to vector<16x64xf32>
    %8 = arith.addf %5, %7 : vector<16x64xf32>
    %cst_6 = arith.constant 0.000000e+00 : f32
    %9 = vector.broadcast %cst_6 : f32 to vector<16x64xf32>
    %10 = arith.maximumf %8, %9 : vector<16x64xf32>
    %11 = arith.truncf %10 : vector<16x64xf32> to vector<16x64xbf16>
    %c0_7 = arith.constant 0 : index
    %c0_8 = arith.constant 0 : index
    %12 = vector.load %arg11[%c0_7, %c0_8] : memref<16x32xf32, #tpu.memory_space<vmem>>, vector<16x32xf32>
    %c0_9 = arith.constant 0 : index
    %c0_10 = arith.constant 0 : index
    %13 = vector.load %arg7[%c0_9, %c0_10] : memref<64x32xbf16, #tpu.memory_space<vmem>>, vector<64x32xbf16>
    %cst_11 = arith.constant dense<0.000000e+00> : vector<16x32xf32>
    %14 = tpu.matmul %11, %13, %cst_11 {dimension_numbers = #tpu.dot_dimension_numbers<[1], [0], [0], [1], [0, 0, 1, 1], [], []>} : vector<16x64xbf16>, vector<64x32xbf16>, vector<16x32xf32> -> vector<16x32xf32>
    %15 = arith.addf %12, %14 : vector<16x32xf32>
    %c0_12 = arith.constant 0 : index
    %c0_13 = arith.constant 0 : index
    %16 = vector.load %arg11[%c0_12, %c0_13] : memref<16x32xf32, #tpu.memory_space<vmem>>, vector<16x32xf32>
    tpu.vector_store %arg11[%c0_12, %c0_13], %15 {strides = array<i32>} : memref<16x32xf32, #tpu.memory_space<vmem>>, vector<16x32xf32>,
    %c0_i32_14 = arith.constant 0 : i32
    %17 = arith.cmpi eq, %arg1, %c0_i32_14 : i32
    %18 = arith.extui %17 : i1 to i32
    %c0_i32_15 = arith.constant 0 : i32
    %19 = arith.cmpi ne, %18, %c0_i32_15 : i32
    scf.if %19 {
      %c0_16 = arith.constant 0 : index
      %c0_17 = arith.constant 0 : index
      %20 = vector.load %arg2[%c0_16, %c0_17] : memref<16x32xf32, #tpu.memory_space<vmem>>, vector<16x32xf32>
      %c0_18 = arith.constant 0 : index
      %c0_19 = arith.constant 0 : index
      %21 = vector.load %arg11[%c0_18, %c0_19] : memref<16x32xf32, #tpu.memory_space<vmem>>, vector<16x32xf32>
      %22 = arith.addf %20, %21 : vector<16x32xf32>
      %c0_20 = arith.constant 0 : index
      %c0_21 = arith.constant 0 : index
      %23 = vector.load %arg8[%c0_20, %c0_21] : memref<1x32xf32, #tpu.memory_space<vmem>>, vector<1x32xf32>
      %24 = vector.broadcast %23 : vector<1x32xf32> to vector<16x32xf32>
      %25 = arith.addf %22, %24 : vector<16x32xf32>
      %c0_22 = arith.constant 0 : index
      %c0_23 = arith.constant 0 : index
      %26 = vector.load %arg9[%c0_22, %c0_23] : memref<16x32xf32, #tpu.memory_space<vmem>>, vector<16x32xf32>
      tpu.vector_store %arg9[%c0_22, %c0_23], %25 {strides = array<i32>} : memref<16x32xf32, #tpu.memory_space<vmem>>, vector<16x32xf32>,
    } else {
    }
    return
  }
  func.func @transform_0(%arg0: i32, %arg1: i32) -> (i32, i32) {
    %c0_i32 = arith.constant 0 : i32
    %c0_i32_0 = arith.constant 0 : i32
    return %arg0, %c0_i32 : i32, i32
  }
  func.func @transform_1(%arg0: i32, %arg1: i32) -> (i32, i32) {
    %c0_i32 = arith.constant 0 : i32
    %c0_i32_0 = arith.constant 0 : i32
    %c0_i32_1 = arith.constant 0 : i32
    return %c0_i32, %c0_i32_0 : i32, i32
  }
  func.func @transform_2(%arg0: i32, %arg1: i32) -> (i32, i32) {
    %c0_i32 = arith.constant 0 : i32
    %c0_i32_0 = arith.constant 0 : i32
    %c0_i32_1 = arith.constant 0 : i32
    return %c0_i32, %c0_i32_0 : i32, i32
  }
  func.func @transform_3(%arg0: i32, %arg1: i32) -> (i32, i32) {
    %c0_i32 = arith.constant 0 : i32
    %c0_i32_0 = arith.constant 0 : i32
    return %c0_i32, %arg1 : i32, i32
  }
  func.func @transform_4(%arg0: i32, %arg1: i32) -> (i32, i32) {
    %c0_i32 = arith.constant 0 : i32
    %c0_i32_0 = arith.constant 0 : i32
    return %c0_i32, %arg1 : i32, i32
  }
  func.func @transform_5(%arg0: i32, %arg1: i32) -> (i32, i32) {
    %c0_i32 = arith.constant 0 : i32
    %c0_i32_0 = arith.constant 0 : i32
    return %arg1, %c0_i32 : i32, i32
  }
  func.func @transform_6(%arg0: i32, %arg1: i32) -> (i32, i32) {
    %c0_i32 = arith.constant 0 : i32
    %c0_i32_0 = arith.constant 0 : i32
    %c0_i32_1 = arith.constant 0 : i32
    return %c0_i32, %c0_i32_0 : i32, i32
  }
  func.func @transform_7(%arg0: i32, %arg1: i32) -> (i32, i32) {
    %c0_i32 = arith.constant 0 : i32
    %c0_i32_0 = arith.constant 0 : i32
    return %arg0, %c0_i32 : i32, i32
  }
}

module attributes {stable_mosaic.version = 11 : i64} {
  func.func @_ln_qkv_kernel(%arg0: i32, %arg1: memref<16x32xf32, #tpu.memory_space<vmem>>, %arg2: memref<1x32xf32, #tpu.memory_space<vmem>>, %arg3: memref<1x32xf32, #tpu.memory_space<vmem>>, %arg4: memref<32x96xbf16, #tpu.memory_space<vmem>>, %arg5: memref<1x96xf32, #tpu.memory_space<vmem>>, %arg6: memref<16x32xbf16, #tpu.memory_space<vmem>>, %arg7: memref<16x64xbf16, #tpu.memory_space<vmem>>) attributes {dimension_semantics = [#tpu.dimension_semantics<parallel>], iteration_bounds = array<i64: 1>, scalar_prefetch = 0 : i64, scratch_operands = 0 : i64, tpu.core_type = #tpu.core_type<tc>, window_params = [{transform_indices = @transform_0, window_bounds = array<i64: 16, 32>}, {pipeline_mode = #tpu.pipeline_mode<synchronous>, transform_indices = @transform_1, window_bounds = array<i64: 1, 32>}, {pipeline_mode = #tpu.pipeline_mode<synchronous>, transform_indices = @transform_2, window_bounds = array<i64: 1, 32>}, {pipeline_mode = #tpu.pipeline_mode<synchronous>, transform_indices = @transform_3, window_bounds = array<i64: 32, 96>}, {pipeline_mode = #tpu.pipeline_mode<synchronous>, transform_indices = @transform_4, window_bounds = array<i64: 1, 96>}, {transform_indices = @transform_5, window_bounds = array<i64: 16, 32>}, {transform_indices = @transform_6, window_bounds = array<i64: 16, 64>}]} {
    %c0 = arith.constant 0 : index
    %c0_0 = arith.constant 0 : index
    %0 = vector.load %arg1[%c0, %c0_0] : memref<16x32xf32, #tpu.memory_space<vmem>>, vector<16x32xf32>
    %cst = arith.constant dense<0.000000e+00> : vector<16xf32>
    %1 = vector.multi_reduction <add>, %0, %cst [1] : vector<16x32xf32> to vector<16xf32>
    %2 = vector.shape_cast %1 : vector<16xf32> to vector<16x1xf32>
    %cst_1 = arith.constant 3.200000e+01 : f32
    %3 = vector.broadcast %cst_1 : f32 to vector<16x1xf32>
    %4 = arith.divf %2, %3 : vector<16x1xf32>
    %5 = vector.broadcast %4 : vector<16x1xf32> to vector<16x32xf32>
    %6 = arith.subf %0, %5 : vector<16x32xf32>
    %7 = arith.mulf %6, %6 : vector<16x32xf32>
    %cst_2 = arith.constant dense<0.000000e+00> : vector<16xf32>
    %8 = vector.multi_reduction <add>, %7, %cst_2 [1] : vector<16x32xf32> to vector<16xf32>
    %9 = vector.shape_cast %8 : vector<16xf32> to vector<16x1xf32>
    %cst_3 = arith.constant 3.200000e+01 : f32
    %10 = vector.broadcast %cst_3 : f32 to vector<16x1xf32>
    %11 = arith.divf %9, %10 : vector<16x1xf32>
    %12 = vector.broadcast %4 : vector<16x1xf32> to vector<16x32xf32>
    %13 = arith.subf %0, %12 : vector<16x32xf32>
    %cst_4 = arith.constant 9.99999974E-6 : f32
    %14 = vector.broadcast %cst_4 : f32 to vector<16x1xf32>
    %15 = arith.addf %11, %14 : vector<16x1xf32>
    %16 = math.rsqrt %15 : vector<16x1xf32>
    %17 = vector.broadcast %16 : vector<16x1xf32> to vector<16x32xf32>
    %18 = arith.mulf %13, %17 : vector<16x32xf32>
    %c0_5 = arith.constant 0 : index
    %c0_6 = arith.constant 0 : index
    %19 = vector.load %arg2[%c0_5, %c0_6] : memref<1x32xf32, #tpu.memory_space<vmem>>, vector<1x32xf32>
    %20 = vector.broadcast %19 : vector<1x32xf32> to vector<16x32xf32>
    %21 = arith.mulf %18, %20 : vector<16x32xf32>
    %c0_7 = arith.constant 0 : index
    %c0_8 = arith.constant 0 : index
    %22 = vector.load %arg3[%c0_7, %c0_8] : memref<1x32xf32, #tpu.memory_space<vmem>>, vector<1x32xf32>
    %23 = vector.broadcast %22 : vector<1x32xf32> to vector<16x32xf32>
    %24 = arith.addf %21, %23 : vector<16x32xf32>
    %25 = arith.truncf %24 : vector<16x32xf32> to vector<16x32xbf16>
    %c0_9 = arith.constant 0 : index
    %c0_10 = arith.constant 0 : index
    %26 = vector.load %arg4[%c0_9, %c0_10] : memref<32x96xbf16, #tpu.memory_space<vmem>>, vector<32x96xbf16>
    %cst_11 = arith.constant dense<0.000000e+00> : vector<16x96xf32>
    %27 = tpu.matmul %25, %26, %cst_11 {dimension_numbers = #tpu.dot_dimension_numbers<[1], [0], [0], [1], [0, 0, 1, 1], [], []>} : vector<16x32xbf16>, vector<32x96xbf16>, vector<16x96xf32> -> vector<16x96xf32>
    %c0_12 = arith.constant 0 : index
    %c0_13 = arith.constant 0 : index
    %28 = vector.load %arg5[%c0_12, %c0_13] : memref<1x96xf32, #tpu.memory_space<vmem>>, vector<1x96xf32>
    %29 = vector.broadcast %28 : vector<1x96xf32> to vector<16x96xf32>
    %30 = arith.addf %27, %29 : vector<16x96xf32>
    %31 = vector.extract_strided_slice %30 {offsets = [0, 0], sizes = [16, 32], strides = [1, 1]} : vector<16x96xf32> to vector<16x32xf32>
    %32 = arith.truncf %31 : vector<16x32xf32> to vector<16x32xbf16>
    %c0_14 = arith.constant 0 : index
    %c0_15 = arith.constant 0 : index
    %33 = vector.load %arg6[%c0_14, %c0_15] : memref<16x32xbf16, #tpu.memory_space<vmem>>, vector<16x32xbf16>
    tpu.vector_store %arg6[%c0_14, %c0_15], %32 {strides = array<i32>} : memref<16x32xbf16, #tpu.memory_space<vmem>>, vector<16x32xbf16>,
    %34 = vector.extract_strided_slice %30 {offsets = [0, 32], sizes = [16, 64], strides = [1, 1]} : vector<16x96xf32> to vector<16x64xf32>
    %35 = arith.truncf %34 : vector<16x64xf32> to vector<16x64xbf16>
    %c0_16 = arith.constant 0 : index
    %c0_17 = arith.constant 0 : index
    %36 = vector.load %arg7[%c0_16, %c0_17] : memref<16x64xbf16, #tpu.memory_space<vmem>>, vector<16x64xbf16>
    tpu.vector_store %arg7[%c0_16, %c0_17], %35 {strides = array<i32>} : memref<16x64xbf16, #tpu.memory_space<vmem>>, vector<16x64xbf16>,
    return
  }
  func.func @transform_0(%arg0: i32) -> (i32, i32) {
    %c0_i32 = arith.constant 0 : i32
    %c0_i32_0 = arith.constant 0 : i32
    return %arg0, %c0_i32 : i32, i32
  }
  func.func @transform_1(%arg0: i32) -> (i32, i32) {
    %c0_i32 = arith.constant 0 : i32
    %c0_i32_0 = arith.constant 0 : i32
    %c0_i32_1 = arith.constant 0 : i32
    return %c0_i32, %c0_i32_0 : i32, i32
  }
  func.func @transform_2(%arg0: i32) -> (i32, i32) {
    %c0_i32 = arith.constant 0 : i32
    %c0_i32_0 = arith.constant 0 : i32
    %c0_i32_1 = arith.constant 0 : i32
    return %c0_i32, %c0_i32_0 : i32, i32
  }
  func.func @transform_3(%arg0: i32) -> (i32, i32) {
    %c0_i32 = arith.constant 0 : i32
    %c0_i32_0 = arith.constant 0 : i32
    %c0_i32_1 = arith.constant 0 : i32
    return %c0_i32, %c0_i32_0 : i32, i32
  }
  func.func @transform_4(%arg0: i32) -> (i32, i32) {
    %c0_i32 = arith.constant 0 : i32
    %c0_i32_0 = arith.constant 0 : i32
    %c0_i32_1 = arith.constant 0 : i32
    return %c0_i32, %c0_i32_0 : i32, i32
  }
  func.func @transform_5(%arg0: i32) -> (i32, i32) {
    %c0_i32 = arith.constant 0 : i32
    %c0_i32_0 = arith.constant 0 : i32
    return %arg0, %c0_i32 : i32, i32
  }
  func.func @transform_6(%arg0: i32) -> (i32, i32) {
    %c0_i32 = arith.constant 0 : i32
    %c0_i32_0 = arith.constant 0 : i32
    return %arg0, %c0_i32 : i32, i32
  }
}

module attributes {stable_mosaic.version = 11 : i64} {
  func.func @_attention_kernel(%arg0: i32, %arg1: i32, %arg2: memref<1x8x32xbf16, #tpu.memory_space<vmem>>, %arg3: memref<1x8x64xbf16, #tpu.memory_space<vmem>>, %arg4: memref<1x8x8xbf16, #tpu.memory_space<vmem>>, %arg5: memref<32x32xbf16, #tpu.memory_space<vmem>>, %arg6: memref<1x32xf32, #tpu.memory_space<vmem>>, %arg7: memref<1x8x32xf32, #tpu.memory_space<vmem>>, %arg8: memref<1x8x32xf32, #tpu.memory_space<vmem>>, %arg9: memref<8x32xbf16, #tpu.memory_space<vmem>>) attributes {dimension_semantics = [#tpu.dimension_semantics<parallel>, #tpu.dimension_semantics<parallel>], iteration_bounds = array<i64: 2, 1>, scalar_prefetch = 0 : i64, scratch_operands = 1 : i64, tpu.core_type = #tpu.core_type<tc>, window_params = [{transform_indices = @transform_0, window_bounds = array<i64: 1, 8, 32>}, {transform_indices = @transform_1, window_bounds = array<i64: 1, 8, 64>}, {transform_indices = @transform_2, window_bounds = array<i64: 1, 8, 8>}, {pipeline_mode = #tpu.pipeline_mode<synchronous>, transform_indices = @transform_3, window_bounds = array<i64: 32, 32>}, {pipeline_mode = #tpu.pipeline_mode<synchronous>, transform_indices = @transform_4, window_bounds = array<i64: 1, 32>}, {transform_indices = @transform_5, window_bounds = array<i64: 1, 8, 32>}, {transform_indices = @transform_6, window_bounds = array<i64: 1, 8, 32>}]} {
    %c0 = arith.constant 0 : index
    %c0_0 = arith.constant 0 : index
    %c0_1 = arith.constant 0 : index
    %0 = vector.load %arg2[%c0, %c0_0, %c0_1] : memref<1x8x32xbf16, #tpu.memory_space<vmem>>, vector<1x8x32xbf16>
    %1 = vector.shape_cast %0 : vector<1x8x32xbf16> to vector<8x32xbf16>
    %2 = arith.extf %1 : vector<8x32xbf16> to vector<8x32xf32>
    %cst = arith.constant 0.353553385 : f32
    %3 = vector.broadcast %cst : f32 to vector<8x32xf32>
    %4 = arith.mulf %2, %3 : vector<8x32xf32>
    %5 = arith.truncf %4 : vector<8x32xf32> to vector<8x32xbf16>
    %c0_2 = arith.constant 0 : index
    %c0_3 = arith.constant 0 : index
    %c0_4 = arith.constant 0 : index
    %6 = vector.load %arg3[%c0_2, %c0_3, %c0_4] : memref<1x8x64xbf16, #tpu.memory_space<vmem>>, vector<1x8x64xbf16>
    %7 = vector.shape_cast %6 : vector<1x8x64xbf16> to vector<8x64xbf16>
    %c0_5 = arith.constant 0 : index
    %c0_6 = arith.constant 0 : index
    %c0_7 = arith.constant 0 : index
    %8 = vector.load %arg4[%c0_5, %c0_6, %c0_7] : memref<1x8x8xbf16, #tpu.memory_space<vmem>>, vector<1x8x8xbf16>
    %9 = vector.shape_cast %8 : vector<1x8x8xbf16> to vector<8x8xbf16>
    %10 = vector.extract_strided_slice %5 {offsets = [0, 0], sizes = [8, 8], strides = [1, 1]} : vector<8x32xbf16> to vector<8x8xbf16>
    %11 = vector.extract_strided_slice %7 {offsets = [0, 0], sizes = [8, 8], strides = [1, 1]} : vector<8x64xbf16> to vector<8x8xbf16>
    %12 = vector.extract_strided_slice %7 {offsets = [0, 32], sizes = [8, 8], strides = [1, 1]} : vector<8x64xbf16> to vector<8x8xbf16>
    %cst_8 = arith.constant dense<0.000000e+00> : vector<8x8xf32>
    %13 = tpu.matmul %10, %11, %cst_8 {dimension_numbers = #tpu.dot_dimension_numbers<[1], [1], [0], [0], [0, 0, 1, 0], [], []>} : vector<8x8xbf16>, vector<8x8xbf16>, vector<8x8xf32> -> vector<8x8xf32>
    %cst_9 = arith.constant 0.000000e+00 : bf16
    %14 = vector.broadcast %cst_9 : bf16 to vector<8x8xbf16>
    %15 = arith.cmpf ogt, %9, %14 : vector<8x8xbf16>
    %cst_10 = arith.constant -1.000000e+09 : f32
    %16 = vector.broadcast %cst_10 : f32 to vector<8x8xf32>
    %17 = arith.select %15, %13, %16 : vector<8x8xi1>, vector<8x8xf32>
    %cst_11 = arith.constant dense<0xFF800000> : vector<8xf32>
    %18 = vector.multi_reduction <maximumf>, %17, %cst_11 [1] : vector<8x8xf32> to vector<8xf32>
    %19 = vector.shape_cast %18 : vector<8xf32> to vector<8x1xf32>
    %20 = vector.broadcast %19 : vector<8x1xf32> to vector<8x8xf32>
    %21 = arith.subf %17, %20 : vector<8x8xf32>
    %22 = math.exp %21 : vector<8x8xf32>
    %cst_12 = arith.constant dense<0.000000e+00> : vector<8xf32>
    %23 = vector.multi_reduction <add>, %22, %cst_12 [1] : vector<8x8xf32> to vector<8xf32>
    %24 = vector.shape_cast %23 : vector<8xf32> to vector<8x1xf32>
    %25 = tpu.reciprocal %24 {approx = true} : vector<8x1xf32> -> vector<8x1xf32>
    %26 = vector.broadcast %25 : vector<8x1xf32> to vector<8x8xf32>
    %27 = arith.mulf %22, %26 : vector<8x8xf32>
    %28 = arith.truncf %27 : vector<8x8xf32> to vector<8x8xbf16>
    %cst_13 = arith.constant dense<0.000000e+00> : vector<8x8xf32>
    %29 = tpu.matmul %28, %12, %cst_13 {dimension_numbers = #tpu.dot_dimension_numbers<[1], [0], [0], [1], [0, 0, 1, 1], [], []>} : vector<8x8xbf16>, vector<8x8xbf16>, vector<8x8xf32> -> vector<8x8xf32>
    %30 = arith.truncf %29 : vector<8x8xf32> to vector<8x8xbf16>
    %c0_14 = arith.constant 0 : index
    %c0_15 = arith.constant 0 : index
    %31 = vector.load %arg9[%c0_14, %c0_15] : memref<8x32xbf16, #tpu.memory_space<vmem>>, vector<8x8xbf16>
    tpu.vector_store %arg9[%c0_14, %c0_15], %30 {strides = array<i32>} : memref<8x32xbf16, #tpu.memory_space<vmem>>, vector<8x8xbf16>,
    %32 = vector.extract_strided_slice %5 {offsets = [0, 8], sizes = [8, 8], strides = [1, 1]} : vector<8x32xbf16> to vector<8x8xbf16>
    %33 = vector.extract_strided_slice %7 {offsets = [0, 8], sizes = [8, 8], strides = [1, 1]} : vector<8x64xbf16> to vector<8x8xbf16>
    %34 = vector.extract_strided_slice %7 {offsets = [0, 40], sizes = [8, 8], strides = [1, 1]} : vector<8x64xbf16> to vector<8x8xbf16>
    %cst_16 = arith.constant dense<0.000000e+00> : vector<8x8xf32>
    %35 = tpu.matmul %32, %33, %cst_16 {dimension_numbers = #tpu.dot_dimension_numbers<[1], [1], [0], [0], [0, 0, 1, 0], [], []>} : vector<8x8xbf16>, vector<8x8xbf16>, vector<8x8xf32> -> vector<8x8xf32>
    %cst_17 = arith.constant 0.000000e+00 : bf16
    %36 = vector.broadcast %cst_17 : bf16 to vector<8x8xbf16>
    %37 = arith.cmpf ogt, %9, %36 : vector<8x8xbf16>
    %cst_18 = arith.constant -1.000000e+09 : f32
    %38 = vector.broadcast %cst_18 : f32 to vector<8x8xf32>
    %39 = arith.select %37, %35, %38 : vector<8x8xi1>, vector<8x8xf32>
    %cst_19 = arith.constant dense<0xFF800000> : vector<8xf32>
    %40 = vector.multi_reduction <maximumf>, %39, %cst_19 [1] : vector<8x8xf32> to vector<8xf32>
    %41 = vector.shape_cast %40 : vector<8xf32> to vector<8x1xf32>
    %42 = vector.broadcast %41 : vector<8x1xf32> to vector<8x8xf32>
    %43 = arith.subf %39, %42 : vector<8x8xf32>
    %44 = math.exp %43 : vector<8x8xf32>
    %cst_20 = arith.constant dense<0.000000e+00> : vector<8xf32>
    %45 = vector.multi_reduction <add>, %44, %cst_20 [1] : vector<8x8xf32> to vector<8xf32>
    %46 = vector.shape_cast %45 : vector<8xf32> to vector<8x1xf32>
    %47 = tpu.reciprocal %46 {approx = true} : vector<8x1xf32> -> vector<8x1xf32>
    %48 = vector.broadcast %47 : vector<8x1xf32> to vector<8x8xf32>
    %49 = arith.mulf %44, %48 : vector<8x8xf32>
    %50 = arith.truncf %49 : vector<8x8xf32> to vector<8x8xbf16>
    %cst_21 = arith.constant dense<0.000000e+00> : vector<8x8xf32>
    %51 = tpu.matmul %50, %34, %cst_21 {dimension_numbers = #tpu.dot_dimension_numbers<[1], [0], [0], [1], [0, 0, 1, 1], [], []>} : vector<8x8xbf16>, vector<8x8xbf16>, vector<8x8xf32> -> vector<8x8xf32>
    %52 = arith.truncf %51 : vector<8x8xf32> to vector<8x8xbf16>
    %c0_22 = arith.constant 0 : index
    %c8 = arith.constant 8 : index
    %53 = vector.load %arg9[%c0_22, %c8] : memref<8x32xbf16, #tpu.memory_space<vmem>>, vector<8x8xbf16>
    tpu.vector_store %arg9[%c0_22, %c8], %52 {strides = array<i32>} : memref<8x32xbf16, #tpu.memory_space<vmem>>, vector<8x8xbf16>,
    %54 = vector.extract_strided_slice %5 {offsets = [0, 16], sizes = [8, 8], strides = [1, 1]} : vector<8x32xbf16> to vector<8x8xbf16>
    %55 = vector.extract_strided_slice %7 {offsets = [0, 16], sizes = [8, 8], strides = [1, 1]} : vector<8x64xbf16> to vector<8x8xbf16>
    %56 = vector.extract_strided_slice %7 {offsets = [0, 48], sizes = [8, 8], strides = [1, 1]} : vector<8x64xbf16> to vector<8x8xbf16>
    %cst_23 = arith.constant dense<0.000000e+00> : vector<8x8xf32>
    %57 = tpu.matmul %54, %55, %cst_23 {dimension_numbers = #tpu.dot_dimension_numbers<[1], [1], [0], [0], [0, 0, 1, 0], [], []>} : vector<8x8xbf16>, vector<8x8xbf16>, vector<8x8xf32> -> vector<8x8xf32>
    %cst_24 = arith.constant 0.000000e+00 : bf16
    %58 = vector.broadcast %cst_24 : bf16 to vector<8x8xbf16>
    %59 = arith.cmpf ogt, %9, %58 : vector<8x8xbf16>
    %cst_25 = arith.constant -1.000000e+09 : f32
    %60 = vector.broadcast %cst_25 : f32 to vector<8x8xf32>
    %61 = arith.select %59, %57, %60 : vector<8x8xi1>, vector<8x8xf32>
    %cst_26 = arith.constant dense<0xFF800000> : vector<8xf32>
    %62 = vector.multi_reduction <maximumf>, %61, %cst_26 [1] : vector<8x8xf32> to vector<8xf32>
    %63 = vector.shape_cast %62 : vector<8xf32> to vector<8x1xf32>
    %64 = vector.broadcast %63 : vector<8x1xf32> to vector<8x8xf32>
    %65 = arith.subf %61, %64 : vector<8x8xf32>
    %66 = math.exp %65 : vector<8x8xf32>
    %cst_27 = arith.constant dense<0.000000e+00> : vector<8xf32>
    %67 = vector.multi_reduction <add>, %66, %cst_27 [1] : vector<8x8xf32> to vector<8xf32>
    %68 = vector.shape_cast %67 : vector<8xf32> to vector<8x1xf32>
    %69 = tpu.reciprocal %68 {approx = true} : vector<8x1xf32> -> vector<8x1xf32>
    %70 = vector.broadcast %69 : vector<8x1xf32> to vector<8x8xf32>
    %71 = arith.mulf %66, %70 : vector<8x8xf32>
    %72 = arith.truncf %71 : vector<8x8xf32> to vector<8x8xbf16>
    %cst_28 = arith.constant dense<0.000000e+00> : vector<8x8xf32>
    %73 = tpu.matmul %72, %56, %cst_28 {dimension_numbers = #tpu.dot_dimension_numbers<[1], [0], [0], [1], [0, 0, 1, 1], [], []>} : vector<8x8xbf16>, vector<8x8xbf16>, vector<8x8xf32> -> vector<8x8xf32>
    %74 = arith.truncf %73 : vector<8x8xf32> to vector<8x8xbf16>
    %c0_29 = arith.constant 0 : index
    %c16 = arith.constant 16 : index
    %75 = vector.load %arg9[%c0_29, %c16] : memref<8x32xbf16, #tpu.memory_space<vmem>>, vector<8x8xbf16>
    tpu.vector_store %arg9[%c0_29, %c16], %74 {strides = array<i32>} : memref<8x32xbf16, #tpu.memory_space<vmem>>, vector<8x8xbf16>,
    %76 = vector.extract_strided_slice %5 {offsets = [0, 24], sizes = [8, 8], strides = [1, 1]} : vector<8x32xbf16> to vector<8x8xbf16>
    %77 = vector.extract_strided_slice %7 {offsets = [0, 24], sizes = [8, 8], strides = [1, 1]} : vector<8x64xbf16> to vector<8x8xbf16>
    %78 = vector.extract_strided_slice %7 {offsets = [0, 56], sizes = [8, 8], strides = [1, 1]} : vector<8x64xbf16> to vector<8x8xbf16>
    %cst_30 = arith.constant dense<0.000000e+00> : vector<8x8xf32>
    %79 = tpu.matmul %76, %77, %cst_30 {dimension_numbers = #tpu.dot_dimension_numbers<[1], [1], [0], [0], [0, 0, 1, 0], [], []>} : vector<8x8xbf16>, vector<8x8xbf16>, vector<8x8xf32> -> vector<8x8xf32>
    %cst_31 = arith.constant 0.000000e+00 : bf16
    %80 = vector.broadcast %cst_31 : bf16 to vector<8x8xbf16>
    %81 = arith.cmpf ogt, %9, %80 : vector<8x8xbf16>
    %cst_32 = arith.constant -1.000000e+09 : f32
    %82 = vector.broadcast %cst_32 : f32 to vector<8x8xf32>
    %83 = arith.select %81, %79, %82 : vector<8x8xi1>, vector<8x8xf32>
    %cst_33 = arith.constant dense<0xFF800000> : vector<8xf32>
    %84 = vector.multi_reduction <maximumf>, %83, %cst_33 [1] : vector<8x8xf32> to vector<8xf32>
    %85 = vector.shape_cast %84 : vector<8xf32> to vector<8x1xf32>
    %86 = vector.broadcast %85 : vector<8x1xf32> to vector<8x8xf32>
    %87 = arith.subf %83, %86 : vector<8x8xf32>
    %88 = math.exp %87 : vector<8x8xf32>
    %cst_34 = arith.constant dense<0.000000e+00> : vector<8xf32>
    %89 = vector.multi_reduction <add>, %88, %cst_34 [1] : vector<8x8xf32> to vector<8xf32>
    %90 = vector.shape_cast %89 : vector<8xf32> to vector<8x1xf32>
    %91 = tpu.reciprocal %90 {approx = true} : vector<8x1xf32> -> vector<8x1xf32>
    %92 = vector.broadcast %91 : vector<8x1xf32> to vector<8x8xf32>
    %93 = arith.mulf %88, %92 : vector<8x8xf32>
    %94 = arith.truncf %93 : vector<8x8xf32> to vector<8x8xbf16>
    %cst_35 = arith.constant dense<0.000000e+00> : vector<8x8xf32>
    %95 = tpu.matmul %94, %78, %cst_35 {dimension_numbers = #tpu.dot_dimension_numbers<[1], [0], [0], [1], [0, 0, 1, 1], [], []>} : vector<8x8xbf16>, vector<8x8xbf16>, vector<8x8xf32> -> vector<8x8xf32>
    %96 = arith.truncf %95 : vector<8x8xf32> to vector<8x8xbf16>
    %c0_36 = arith.constant 0 : index
    %c24 = arith.constant 24 : index
    %97 = vector.load %arg9[%c0_36, %c24] : memref<8x32xbf16, #tpu.memory_space<vmem>>, vector<8x8xbf16>
    tpu.vector_store %arg9[%c0_36, %c24], %96 {strides = array<i32>} : memref<8x32xbf16, #tpu.memory_space<vmem>>, vector<8x8xbf16>,
    %c0_37 = arith.constant 0 : index
    %c0_38 = arith.constant 0 : index
    %98 = vector.load %arg9[%c0_37, %c0_38] : memref<8x32xbf16, #tpu.memory_space<vmem>>, vector<8x32xbf16>
    %c0_39 = arith.constant 0 : index
    %c0_40 = arith.constant 0 : index
    %99 = vector.load %arg5[%c0_39, %c0_40] : memref<32x32xbf16, #tpu.memory_space<vmem>>, vector<32x32xbf16>
    %cst_41 = arith.constant dense<0.000000e+00> : vector<8x32xf32>
    %100 = tpu.matmul %98, %99, %cst_41 {dimension_numbers = #tpu.dot_dimension_numbers<[1], [0], [0], [1], [0, 0, 1, 1], [], []>} : vector<8x32xbf16>, vector<32x32xbf16>, vector<8x32xf32> -> vector<8x32xf32>
    %c0_42 = arith.constant 0 : index
    %c0_43 = arith.constant 0 : index
    %101 = vector.load %arg6[%c0_42, %c0_43] : memref<1x32xf32, #tpu.memory_space<vmem>>, vector<1x32xf32>
    %102 = vector.broadcast %101 : vector<1x32xf32> to vector<8x32xf32>
    %103 = arith.addf %100, %102 : vector<8x32xf32>
    %c0_44 = arith.constant 0 : index
    %c0_45 = arith.constant 0 : index
    %c0_46 = arith.constant 0 : index
    %104 = vector.load %arg7[%c0_44, %c0_45, %c0_46] : memref<1x8x32xf32, #tpu.memory_space<vmem>>, vector<1x8x32xf32>
    %105 = vector.shape_cast %104 : vector<1x8x32xf32> to vector<8x32xf32>
    %106 = arith.addf %103, %105 : vector<8x32xf32>
    %c0_47 = arith.constant 0 : index
    %c0_48 = arith.constant 0 : index
    %c0_49 = arith.constant 0 : index
    %107 = vector.load %arg8[%c0_47, %c0_48, %c0_49] : memref<1x8x32xf32, #tpu.memory_space<vmem>>, vector<1x8x32xf32>
    %108 = vector.shape_cast %107 : vector<1x8x32xf32> to vector<8x32xf32>
    %109 = vector.shape_cast %106 : vector<8x32xf32> to vector<1x8x32xf32>
    tpu.vector_store %arg8[%c0_47, %c0_48, %c0_49], %109 {strides = array<i32>} : memref<1x8x32xf32, #tpu.memory_space<vmem>>, vector<1x8x32xf32>,
    return
  }
  func.func @transform_0(%arg0: i32, %arg1: i32) -> (i32, i32, i32) {
    %c0_i32 = arith.constant 0 : i32
    %c0_i32_0 = arith.constant 0 : i32
    return %arg0, %arg1, %c0_i32 : i32, i32, i32
  }
  func.func @transform_1(%arg0: i32, %arg1: i32) -> (i32, i32, i32) {
    %c0_i32 = arith.constant 0 : i32
    %c0_i32_0 = arith.constant 0 : i32
    %c0_i32_1 = arith.constant 0 : i32
    return %arg0, %c0_i32, %c0_i32_0 : i32, i32, i32
  }
  func.func @transform_2(%arg0: i32, %arg1: i32) -> (i32, i32, i32) {
    %c0_i32 = arith.constant 0 : i32
    %c0_i32_0 = arith.constant 0 : i32
    %c0_i32_1 = arith.constant 0 : i32
    return %c0_i32, %arg1, %c0_i32_0 : i32, i32, i32
  }
  func.func @transform_3(%arg0: i32, %arg1: i32) -> (i32, i32) {
    %c0_i32 = arith.constant 0 : i32
    %c0_i32_0 = arith.constant 0 : i32
    %c0_i32_1 = arith.constant 0 : i32
    return %c0_i32, %c0_i32_0 : i32, i32
  }
  func.func @transform_4(%arg0: i32, %arg1: i32) -> (i32, i32) {
    %c0_i32 = arith.constant 0 : i32
    %c0_i32_0 = arith.constant 0 : i32
    %c0_i32_1 = arith.constant 0 : i32
    return %c0_i32, %c0_i32_0 : i32, i32
  }
  func.func @transform_5(%arg0: i32, %arg1: i32) -> (i32, i32, i32) {
    %c0_i32 = arith.constant 0 : i32
    %c0_i32_0 = arith.constant 0 : i32
    return %arg0, %arg1, %c0_i32 : i32, i32, i32
  }
  func.func @transform_6(%arg0: i32, %arg1: i32) -> (i32, i32, i32) {
    %c0_i32 = arith.constant 0 : i32
    %c0_i32_0 = arith.constant 0 : i32
    return %arg0, %arg1, %c0_i32 : i32, i32, i32
  }
}

module attributes {stable_mosaic.version = 11 : i64} {
  func.func @_ln_linear_kernel(%arg0: i32, %arg1: memref<16x32xf32, #tpu.memory_space<vmem>>, %arg2: memref<1x32xf32, #tpu.memory_space<vmem>>, %arg3: memref<1x32xf32, #tpu.memory_space<vmem>>, %arg4: memref<32x32xbf16, #tpu.memory_space<vmem>>, %arg5: memref<1x32xf32, #tpu.memory_space<vmem>>, %arg6: memref<16x32xbf16, #tpu.memory_space<vmem>>) attributes {dimension_semantics = [#tpu.dimension_semantics<parallel>], iteration_bounds = array<i64: 1>, scalar_prefetch = 0 : i64, scratch_operands = 0 : i64, tpu.core_type = #tpu.core_type<tc>, window_params = [{transform_indices = @transform_0, window_bounds = array<i64: 16, 32>}, {pipeline_mode = #tpu.pipeline_mode<synchronous>, transform_indices = @transform_1, window_bounds = array<i64: 1, 32>}, {pipeline_mode = #tpu.pipeline_mode<synchronous>, transform_indices = @transform_2, window_bounds = array<i64: 1, 32>}, {pipeline_mode = #tpu.pipeline_mode<synchronous>, transform_indices = @transform_3, window_bounds = array<i64: 32, 32>}, {pipeline_mode = #tpu.pipeline_mode<synchronous>, transform_indices = @transform_4, window_bounds = array<i64: 1, 32>}, {transform_indices = @transform_5, window_bounds = array<i64: 16, 32>}]} {
    %c0 = arith.constant 0 : index
    %c0_0 = arith.constant 0 : index
    %0 = vector.load %arg1[%c0, %c0_0] : memref<16x32xf32, #tpu.memory_space<vmem>>, vector<16x32xf32>
    %cst = arith.constant dense<0.000000e+00> : vector<16xf32>
    %1 = vector.multi_reduction <add>, %0, %cst [1] : vector<16x32xf32> to vector<16xf32>
    %2 = vector.shape_cast %1 : vector<16xf32> to vector<16x1xf32>
    %cst_1 = arith.constant 3.200000e+01 : f32
    %3 = vector.broadcast %cst_1 : f32 to vector<16x1xf32>
    %4 = arith.divf %2, %3 : vector<16x1xf32>
    %5 = vector.broadcast %4 : vector<16x1xf32> to vector<16x32xf32>
    %6 = arith.subf %0, %5 : vector<16x32xf32>
    %7 = arith.mulf %6, %6 : vector<16x32xf32>
    %cst_2 = arith.constant dense<0.000000e+00> : vector<16xf32>
    %8 = vector.multi_reduction <add>, %7, %cst_2 [1] : vector<16x32xf32> to vector<16xf32>
    %9 = vector.shape_cast %8 : vector<16xf32> to vector<16x1xf32>
    %cst_3 = arith.constant 3.200000e+01 : f32
    %10 = vector.broadcast %cst_3 : f32 to vector<16x1xf32>
    %11 = arith.divf %9, %10 : vector<16x1xf32>
    %12 = vector.broadcast %4 : vector<16x1xf32> to vector<16x32xf32>
    %13 = arith.subf %0, %12 : vector<16x32xf32>
    %cst_4 = arith.constant 9.99999974E-6 : f32
    %14 = vector.broadcast %cst_4 : f32 to vector<16x1xf32>
    %15 = arith.addf %11, %14 : vector<16x1xf32>
    %16 = math.rsqrt %15 : vector<16x1xf32>
    %17 = vector.broadcast %16 : vector<16x1xf32> to vector<16x32xf32>
    %18 = arith.mulf %13, %17 : vector<16x32xf32>
    %c0_5 = arith.constant 0 : index
    %c0_6 = arith.constant 0 : index
    %19 = vector.load %arg2[%c0_5, %c0_6] : memref<1x32xf32, #tpu.memory_space<vmem>>, vector<1x32xf32>
    %20 = vector.broadcast %19 : vector<1x32xf32> to vector<16x32xf32>
    %21 = arith.mulf %18, %20 : vector<16x32xf32>
    %c0_7 = arith.constant 0 : index
    %c0_8 = arith.constant 0 : index
    %22 = vector.load %arg3[%c0_7, %c0_8] : memref<1x32xf32, #tpu.memory_space<vmem>>, vector<1x32xf32>
    %23 = vector.broadcast %22 : vector<1x32xf32> to vector<16x32xf32>
    %24 = arith.addf %21, %23 : vector<16x32xf32>
    %25 = arith.truncf %24 : vector<16x32xf32> to vector<16x32xbf16>
    %c0_9 = arith.constant 0 : index
    %c0_10 = arith.constant 0 : index
    %26 = vector.load %arg4[%c0_9, %c0_10] : memref<32x32xbf16, #tpu.memory_space<vmem>>, vector<32x32xbf16>
    %cst_11 = arith.constant dense<0.000000e+00> : vector<16x32xf32>
    %27 = tpu.matmul %25, %26, %cst_11 {dimension_numbers = #tpu.dot_dimension_numbers<[1], [0], [0], [1], [0, 0, 1, 1], [], []>} : vector<16x32xbf16>, vector<32x32xbf16>, vector<16x32xf32> -> vector<16x32xf32>
    %c0_12 = arith.constant 0 : index
    %c0_13 = arith.constant 0 : index
    %28 = vector.load %arg5[%c0_12, %c0_13] : memref<1x32xf32, #tpu.memory_space<vmem>>, vector<1x32xf32>
    %29 = vector.broadcast %28 : vector<1x32xf32> to vector<16x32xf32>
    %30 = arith.addf %27, %29 : vector<16x32xf32>
    %31 = arith.truncf %30 : vector<16x32xf32> to vector<16x32xbf16>
    %c0_14 = arith.constant 0 : index
    %c0_15 = arith.constant 0 : index
    %32 = vector.load %arg6[%c0_14, %c0_15] : memref<16x32xbf16, #tpu.memory_space<vmem>>, vector<16x32xbf16>
    tpu.vector_store %arg6[%c0_14, %c0_15], %31 {strides = array<i32>} : memref<16x32xbf16, #tpu.memory_space<vmem>>, vector<16x32xbf16>,
    return
  }
  func.func @transform_0(%arg0: i32) -> (i32, i32) {
    %c0_i32 = arith.constant 0 : i32
    %c0_i32_0 = arith.constant 0 : i32
    return %arg0, %c0_i32 : i32, i32
  }
  func.func @transform_1(%arg0: i32) -> (i32, i32) {
    %c0_i32 = arith.constant 0 : i32
    %c0_i32_0 = arith.constant 0 : i32
    %c0_i32_1 = arith.constant 0 : i32
    return %c0_i32, %c0_i32_0 : i32, i32
  }
  func.func @transform_2(%arg0: i32) -> (i32, i32) {
    %c0_i32 = arith.constant 0 : i32
    %c0_i32_0 = arith.constant 0 : i32
    %c0_i32_1 = arith.constant 0 : i32
    return %c0_i32, %c0_i32_0 : i32, i32
  }
  func.func @transform_3(%arg0: i32) -> (i32, i32) {
    %c0_i32 = arith.constant 0 : i32
    %c0_i32_0 = arith.constant 0 : i32
    %c0_i32_1 = arith.constant 0 : i32
    return %c0_i32, %c0_i32_0 : i32, i32
  }
  func.func @transform_4(%arg0: i32) -> (i32, i32) {
    %c0_i32 = arith.constant 0 : i32
    %c0_i32_0 = arith.constant 0 : i32
    %c0_i32_1 = arith.constant 0 : i32
    return %c0_i32, %c0_i32_0 : i32, i32
  }
  func.func @transform_5(%arg0: i32) -> (i32, i32) {
    %c0_i32 = arith.constant 0 : i32
    %c0_i32_0 = arith.constant 0 : i32
    return %arg0, %c0_i32 : i32, i32
  }
}

module attributes {stable_mosaic.version = 11 : i64} {
  func.func @_layernorm_kernel(%arg0: i32, %arg1: memref<16x32xf32, #tpu.memory_space<vmem>>, %arg2: memref<1x32xf32, #tpu.memory_space<vmem>>, %arg3: memref<1x32xf32, #tpu.memory_space<vmem>>, %arg4: memref<16x32xf32, #tpu.memory_space<vmem>>) attributes {dimension_semantics = [#tpu.dimension_semantics<parallel>], iteration_bounds = array<i64: 1>, scalar_prefetch = 0 : i64, scratch_operands = 0 : i64, tpu.core_type = #tpu.core_type<tc>, window_params = [{transform_indices = @transform_0, window_bounds = array<i64: 16, 32>}, {pipeline_mode = #tpu.pipeline_mode<synchronous>, transform_indices = @transform_1, window_bounds = array<i64: 1, 32>}, {pipeline_mode = #tpu.pipeline_mode<synchronous>, transform_indices = @transform_2, window_bounds = array<i64: 1, 32>}, {transform_indices = @transform_3, window_bounds = array<i64: 16, 32>}]} {
    %c0 = arith.constant 0 : index
    %c0_0 = arith.constant 0 : index
    %0 = vector.load %arg1[%c0, %c0_0] : memref<16x32xf32, #tpu.memory_space<vmem>>, vector<16x32xf32>
    %cst = arith.constant dense<0.000000e+00> : vector<16xf32>
    %1 = vector.multi_reduction <add>, %0, %cst [1] : vector<16x32xf32> to vector<16xf32>
    %2 = vector.shape_cast %1 : vector<16xf32> to vector<16x1xf32>
    %cst_1 = arith.constant 3.200000e+01 : f32
    %3 = vector.broadcast %cst_1 : f32 to vector<16x1xf32>
    %4 = arith.divf %2, %3 : vector<16x1xf32>
    %5 = vector.broadcast %4 : vector<16x1xf32> to vector<16x32xf32>
    %6 = arith.subf %0, %5 : vector<16x32xf32>
    %7 = arith.mulf %6, %6 : vector<16x32xf32>
    %cst_2 = arith.constant dense<0.000000e+00> : vector<16xf32>
    %8 = vector.multi_reduction <add>, %7, %cst_2 [1] : vector<16x32xf32> to vector<16xf32>
    %9 = vector.shape_cast %8 : vector<16xf32> to vector<16x1xf32>
    %cst_3 = arith.constant 3.200000e+01 : f32
    %10 = vector.broadcast %cst_3 : f32 to vector<16x1xf32>
    %11 = arith.divf %9, %10 : vector<16x1xf32>
    %12 = vector.broadcast %4 : vector<16x1xf32> to vector<16x32xf32>
    %13 = arith.subf %0, %12 : vector<16x32xf32>
    %cst_4 = arith.constant 9.99999974E-6 : f32
    %14 = vector.broadcast %cst_4 : f32 to vector<16x1xf32>
    %15 = arith.addf %11, %14 : vector<16x1xf32>
    %16 = math.rsqrt %15 : vector<16x1xf32>
    %17 = vector.broadcast %16 : vector<16x1xf32> to vector<16x32xf32>
    %18 = arith.mulf %13, %17 : vector<16x32xf32>
    %c0_5 = arith.constant 0 : index
    %c0_6 = arith.constant 0 : index
    %19 = vector.load %arg2[%c0_5, %c0_6] : memref<1x32xf32, #tpu.memory_space<vmem>>, vector<1x32xf32>
    %20 = vector.broadcast %19 : vector<1x32xf32> to vector<16x32xf32>
    %21 = arith.mulf %18, %20 : vector<16x32xf32>
    %c0_7 = arith.constant 0 : index
    %c0_8 = arith.constant 0 : index
    %22 = vector.load %arg3[%c0_7, %c0_8] : memref<1x32xf32, #tpu.memory_space<vmem>>, vector<1x32xf32>
    %23 = vector.broadcast %22 : vector<1x32xf32> to vector<16x32xf32>
    %24 = arith.addf %21, %23 : vector<16x32xf32>
    %c0_9 = arith.constant 0 : index
    %c0_10 = arith.constant 0 : index
    %25 = vector.load %arg4[%c0_9, %c0_10] : memref<16x32xf32, #tpu.memory_space<vmem>>, vector<16x32xf32>
    tpu.vector_store %arg4[%c0_9, %c0_10], %24 {strides = array<i32>} : memref<16x32xf32, #tpu.memory_space<vmem>>, vector<16x32xf32>,
    return
  }
  func.func @transform_0(%arg0: i32) -> (i32, i32) {
    %c0_i32 = arith.constant 0 : i32
    %c0_i32_0 = arith.constant 0 : i32
    return %arg0, %c0_i32 : i32, i32
  }
  func.func @transform_1(%arg0: i32) -> (i32, i32) {
    %c0_i32 = arith.constant 0 : i32
    %c0_i32_0 = arith.constant 0 : i32
    %c0_i32_1 = arith.constant 0 : i32
    return %c0_i32, %c0_i32_0 : i32, i32
  }
  func.func @transform_2(%arg0: i32) -> (i32, i32) {
    %c0_i32 = arith.constant 0 : i32
    %c0_i32_0 = arith.constant 0 : i32
    %c0_i32_1 = arith.constant 0 : i32
    return %c0_i32, %c0_i32_0 : i32, i32
  }
  func.func @transform_3(%arg0: i32) -> (i32, i32) {
    %c0_i32 = arith.constant 0 : i32
    %c0_i32_0 = arith.constant 0 : i32
    return %arg0, %c0_i32 : i32, i32
  }
}

module attributes {stable_mosaic.version = 11 : i64} {
  func.func @_linear_kernel(%arg0: i32, %arg1: memref<16x32xf32, #tpu.memory_space<vmem>>, %arg2: memref<32x64xbf16, #tpu.memory_space<vmem>>, %arg3: memref<1x64xf32, #tpu.memory_space<vmem>>, %arg4: memref<16x64xbf16, #tpu.memory_space<vmem>>) attributes {dimension_semantics = [#tpu.dimension_semantics<parallel>], iteration_bounds = array<i64: 1>, scalar_prefetch = 0 : i64, scratch_operands = 0 : i64, tpu.core_type = #tpu.core_type<tc>, window_params = [{transform_indices = @transform_0, window_bounds = array<i64: 16, 32>}, {pipeline_mode = #tpu.pipeline_mode<synchronous>, transform_indices = @transform_1, window_bounds = array<i64: 32, 64>}, {pipeline_mode = #tpu.pipeline_mode<synchronous>, transform_indices = @transform_2, window_bounds = array<i64: 1, 64>}, {transform_indices = @transform_3, window_bounds = array<i64: 16, 64>}]} {
    %c0 = arith.constant 0 : index
    %c0_0 = arith.constant 0 : index
    %0 = vector.load %arg1[%c0, %c0_0] : memref<16x32xf32, #tpu.memory_space<vmem>>, vector<16x32xf32>
    %1 = arith.truncf %0 : vector<16x32xf32> to vector<16x32xbf16>
    %c0_1 = arith.constant 0 : index
    %c0_2 = arith.constant 0 : index
    %2 = vector.load %arg2[%c0_1, %c0_2] : memref<32x64xbf16, #tpu.memory_space<vmem>>, vector<32x64xbf16>
    %cst = arith.constant dense<0.000000e+00> : vector<16x64xf32>
    %3 = tpu.matmul %1, %2, %cst {dimension_numbers = #tpu.dot_dimension_numbers<[1], [0], [0], [1], [0, 0, 1, 1], [], []>} : vector<16x32xbf16>, vector<32x64xbf16>, vector<16x64xf32> -> vector<16x64xf32>
    %c0_3 = arith.constant 0 : index
    %c0_4 = arith.constant 0 : index
    %4 = vector.load %arg3[%c0_3, %c0_4] : memref<1x64xf32, #tpu.memory_space<vmem>>, vector<1x64xf32>
    %5 = vector.broadcast %4 : vector<1x64xf32> to vector<16x64xf32>
    %6 = arith.addf %3, %5 : vector<16x64xf32>
    %7 = arith.truncf %6 : vector<16x64xf32> to vector<16x64xbf16>
    %c0_5 = arith.constant 0 : index
    %c0_6 = arith.constant 0 : index
    %8 = vector.load %arg4[%c0_5, %c0_6] : memref<16x64xbf16, #tpu.memory_space<vmem>>, vector<16x64xbf16>
    tpu.vector_store %arg4[%c0_5, %c0_6], %7 {strides = array<i32>} : memref<16x64xbf16, #tpu.memory_space<vmem>>, vector<16x64xbf16>,
    return
  }
  func.func @transform_0(%arg0: i32) -> (i32, i32) {
    %c0_i32 = arith.constant 0 : i32
    %c0_i32_0 = arith.constant 0 : i32
    return %arg0, %c0_i32 : i32, i32
  }
  func.func @transform_1(%arg0: i32) -> (i32, i32) {
    %c0_i32 = arith.constant 0 : i32
    %c0_i32_0 = arith.constant 0 : i32
    %c0_i32_1 = arith.constant 0 : i32
    return %c0_i32, %c0_i32_0 : i32, i32
  }
  func.func @transform_2(%arg0: i32) -> (i32, i32) {
    %c0_i32 = arith.constant 0 : i32
    %c0_i32_0 = arith.constant 0 : i32
    %c0_i32_1 = arith.constant 0 : i32
    return %c0_i32, %c0_i32_0 : i32, i32
  }
  func.func @transform_3(%arg0: i32) -> (i32, i32) {
    %c0_i32 = arith.constant 0 : i32
    %c0_i32_0 = arith.constant 0 : i32
    return %arg0, %c0_i32 : i32, i32
  }
}

</mosaic_0001>

<bundles_post_ra>
// kernel: decoder_forward.13
= control target key start
LH: loop header
LB: loop body
LE: loop exit
PB: predicated region body
PF: predicated region fallthrough
CT: control target
= control target key end

     0   :  { %vm25_vm0 = vcmask 261120   ;;  %v173_v4 = vmov 32.0   ;;  %vm129_vm8 = vcmask 257024   ;;  %s174_s10 = smov 96   ;;  %vm140_vm9 = vcmask 519168   ;;  %s248_s0 = inlined_call_operand.vmem [shape: f32[16,32], index: 0, kind: input, shape index: {}]   ;;  %s249_s1 = inlined_call_operand.vmem [shape: f32[1,32], index: 1, kind: input, shape index: {}]   ;;  %s250_s2 = inlined_call_operand.vmem [shape: f32[1,32], index: 2, kind: input, shape index: {}]   ;;  %s251_s4 = inlined_call_operand.vmem [shape: f32[1,96], index: 4, kind: input, shape index: {}]   ;;  %s252_s3 = inlined_call_operand.vmem [shape: bf16[32,96], index: 3, kind: input, shape index: {}]   ;;  %s253_s5 = inlined_call_operand.vmem [shape: bf16[16,32], index: 5, kind: output, shape index: {0}]   ;;  %s254_s6 = inlined_call_operand.vmem [shape: bf16[16,64], index: 6, kind: output, shape index: {1}]  }
   0x1   :  { %v23_v0 = vld [vmem:[%s248_s0] sm:$0xff]  ;;  %v24_v2 = vld [vmem:[%s248_s0 + $0x8] sm:$0xff]  ;;  %167 = vrcp.f32 %v173_v4 }
   0x2   :  { %v26_v1 = vsel %vm25_vm0, %v23_v0, 0.0  ;;  %v29_v3 = vsel %vm25_vm0, %v24_v2, 0.0  ;;  %v161_v21 = vld [vmem:[%s252_s3 + $0x8] sm:$0xff]  ;;  %v160_v23 = vld [vmem:[%s252_s3] sm:$0xff] }
   0x3   :  { %27 = vadd.xlane.f32.xlu0 %v26_v1  ;;  %119 = vmatpush.bf16.msra.mxu0 %v161_v21  ;;  %v164_v42 = vld [vmem:[%s249_s1] ss:$0 sm:$0xff] }
   0x4   :  { %v165_v47 = vld [vmem:[%s250_s2] ss:$0 sm:$0xff] }
   0x5   :  { %v166_v52 = vld [vmem:[%s251_s4] ss:$0 sm:$0xff] }
   0x7   :  { %v168_v5 = vpop.eup %167  ;;  %120 = vmatpush.bf16.msra.mxu0 %v160_v23 }
   0x8   :  { %v33_v6 = vmul.f32 32.0, %v168_v5  ;;  %vm37_vm1 = vweird.f32 %v168_v5 }
   0xa   :  { %v34_v7 = vsub.f32 1.0, %v33_v6 }
   0xb   :  { %30 = vadd.xlane.f32.xlu0 %v29_v3 }
   0xc   :  { %v35_v8 = vmul.f32 %v168_v5, %v34_v7 }
   0xe   :  { %v36_v9 = vadd.f32 %v168_v5, %v35_v8 }
  0x10   :  { %v38_v10 = vsel %vm37_vm1, %v168_v5, %v36_v9 }
  0x76   :  { %v28_v11 = vpop.xlane.xlu0 %27 }
  0x77   :  { %v39_v12 = vmul.f32 %v38_v10, %v28_v11 }
  0x79   :  { %v41_v13 = vsub.f32 %v23_v0, %v39_v12 }
  0x7b   :  { %v43_v14 = vmul.f32 %v41_v13, %v41_v13 }
  0x7d   :  { %v45_v15 = vsel %vm25_vm0, %v43_v14, 0.0 }
  0x7e   :  { %46 = vadd.xlane.f32.xlu1 %v45_v15  ;;  %v31_v16 = vpop.xlane.xlu0 %30 }
  0x7f   :  { %v40_v17 = vmul.f32 %v38_v10, %v31_v16 }
  0x81   :  { %v42_v18 = vsub.f32 %v24_v2, %v40_v17 }
  0x83   :  { %v44_v19 = vmul.f32 %v42_v18, %v42_v18 }
  0x85   :  { %v48_v20 = vsel %vm25_vm0, %v44_v19, 0.0 }
  0x86   :  { %49 = vadd.xlane.f32.xlu1 %v48_v20 }
  0xf1   :  { %v47_v22 = vpop.xlane.xlu1 %46 }
  0xf2   :  { %v51_v24 = vmul.f32 %v47_v22, %v38_v10 }
  0xf4   :  { %v53_v25 = vadd.f32 1e-05, %v51_v24 }
  0xf6   :  { %169 = vrsqrt.f32 %v53_v25  ;;  %vm61_vm3 = vweird.f32 %v53_v25 }
  0xf9   :  { %v50_v26 = vpop.xlane.xlu1 %49 }
  0xfa   :  { %v52_v27 = vmul.f32 %v50_v26, %v38_v10 }
  0xfc   :  { %v170_v28 = vpop.eup %169  ;;  %v54_v29 = vadd.f32 1e-05, %v52_v27 }
  0xfd   :  { %v56_v30 = vmul.f32 %v170_v28, %v53_v25  ;;  %vm62_vm2 = vweird.f32 %v170_v28 }
  0xfe   :  { %171 = vrsqrt.f32 %v54_v29  ;;  %vm63_vm4 = vmor %vm61_vm3, %vm62_vm2  ;;  %vm71_vm6 = vweird.f32 %v54_v29 }
  0xff   :  { %v57_v31 = vmul.f32 %v170_v28, %v56_v30 }
 0x101   :  { %v58_v32 = vmul.f32 0.5, %v57_v31 }
 0x103   :  { %v59_v33 = vsub.f32 1.5, %v58_v32 }
 0x104   :  { %v172_v34 = vpop.eup %171 }
 0x105   :  { %v60_v35 = vmul.f32 %v170_v28, %v59_v33  ;;  %v66_v36 = vmul.f32 %v172_v34, %v54_v29  ;;  %vm72_vm5 = vweird.f32 %v172_v34 }
 0x106   :  { %vm73_vm7 = vmor %vm71_vm6, %vm72_vm5 }
 0x107   :  { %v67_v37 = vmul.f32 %v172_v34, %v66_v36  ;;  %v64_v38 = vsel %vm63_vm4, %v170_v28, %v60_v35 }
 0x108   :  { %v75_v41 = vmul.f32 %v64_v38, %v41_v13 }
 0x109   :  { %v68_v39 = vmul.f32 0.5, %v67_v37 }
 0x10a   :  { %v81_v46 = vmul.f32 %v164_v42, %v75_v41 }
 0x10b   :  { %v69_v40 = vsub.f32 1.5, %v68_v39 }
 0x10c   :  { %v87_v49 = vadd.f32 %v165_v47, %v81_v46 }
 0x10d   :  { %v70_v43 = vmul.f32 %v172_v34, %v69_v40 }
 0x10f   :  { %v74_v44 = vsel %vm73_vm7, %v172_v34, %v70_v43 }
 0x110   :  { %v76_v45 = vmul.f32 %v74_v44, %v42_v18 }
 0x112   :  { %v82_v48 = vmul.f32 %v164_v42, %v76_v45 }
 0x114   :  { %v88_v50 = vadd.f32 %v165_v47, %v82_v48 }
 0x116   :  { %v89_v51 = vpack.c.bf16 %v88_v50, %v87_v49 }
 0x118   :  { %159 = vmatmul.msk.bf16.vlgmr.msra.gmra.mxu0 %vm25_vm0, %v89_v51 }
 0x195   :  { %v122_v53 = vpop.f32.mrf.mxu0 }
 0x196   :  { %v123_v54 = vadd.f32 %v166_v52, %v122_v53 }
 0x198   :  { %v127_v55 = vpack.c.bf16 %v123_v54, %v123_v54 }
 0x19a   :  { %130 = vst.msk [vmem:[%s253_s5] sm:$0xf] %vm129_vm8, %v127_v55  ;;  %134 = vrot.lane.b32.xlu2 %v127_v55, %s174_s10 }
 0x19d   :  { %v124_v56 = vpop.f32.mrf.mxu0 }
 0x19e   :  { %v125_v57 = vadd.f32 %v166_v52, %v124_v56 }
 0x1a0   :  { %v128_v58 = vpack.c.bf16 %v125_v57, %v125_v57 }
 0x1a2   :  { %131 = vst.msk [vmem:[%s253_s5 + $0x4] sm:$0xf] %vm129_vm8, %v128_v58  ;;  %136 = vrot.lane.b32.xlu2 %v128_v58, %s174_s10 }
 0x1f4   :  { %v135_v59 = vpop.permute.xlu2 %134 }
 0x1f5   :  { %141 = vst.msk [vmem:[%s254_s6] sm:$0xf] %vm140_vm9, %v135_v59 }
 0x1fc   :  { %v137_v60 = vpop.permute.xlu2 %136 }
 0x1fd   :  { %142 = vst.msk [vmem:[%s254_s6 + $0x4] sm:$0xf] %vm140_vm9, %v137_v60 }

// kernel: decoder_forward.15
= control target key start
LH: loop header
LB: loop body
LE: loop exit
PB: predicated region body
PF: predicated region fallthrough
CT: control target
= control target key end

     0   :  { %10 = vsyncpa [#allocation3], 0  ;;  %s389_s0 = inlined_call_operand.vmem [shape: f32[16,32], index: 0, kind: input, shape index: {}]   ;;  %s390_s1 = inlined_call_operand.hbm [shape: f32[1,32], index: 1, kind: input, shape index: {}]   ;;  %s391_s2 = inlined_call_operand.hbm [shape: f32[1,32], index: 2, kind: input, shape index: {}]   ;;  %s392_s3 = inlined_call_operand.hbm [shape: bf16[32,32], index: 3, kind: input, shape index: {}]   ;;  %s393_s4 = inlined_call_operand.hbm [shape: f32[1,32], index: 4, kind: input, shape index: {}]   ;;  %s394_s5 = inlined_call_operand.vmem [shape: bf16[16,32], index: 5, kind: output, shape index: {}]  }
   0x1   :  { %11 = vsyncpa [#allocation5], 0  ;;  %s31_s20 = sshll.u32 %s391_s2, 4  ;;  %s32_s20 = int_to_ptr.hbm [resolvable:$true] %s31_s20 }
   0x2   :  { %12 = vsyncpa [#allocation8], 0  ;;  %s323_s21 = smov [#allocation4]   ;;  %s20_s25 = sshll.u32 %s390_s1, 4  ;;  %s21_s25 = int_to_ptr.hbm [resolvable:$true] %s20_s25 }
   0x3   :  { %s33_s22 = sshll.u32 %s323_s21, 4  ;;  %s324_s26 = smov [#allocation2]   ;;  %s34_s22 = int_to_ptr.vmem [resolvable:$true] %s33_s22 }
   0x4   :  { %36 = dma.hbm_to_vmem [thread:$0]  %s32_s20, 16, %s34_s22, [#allocation5]  }
   0x5   :  { %s22_s27 = sshll.u32 %s324_s26, 4  ;;  %s41_s30 = sshll.u32 %s392_s3, 4  ;;  %s23_s27 = int_to_ptr.vmem [resolvable:$true] %s22_s27  ;;  %s42_s30 = int_to_ptr.hbm [resolvable:$true] %s41_s30 }
   0x6   :  { %25 = dma.hbm_to_vmem [thread:$0]  %s21_s25, 16, %s23_s27, [#allocation3]  }
   0x7   :  { %s325_s2 = smov [#allocation6]   ;;  %s55_s9 = sshll.u32 %s393_s4, 4  ;;  %s56_s9 = int_to_ptr.hbm [resolvable:$true] %s55_s9 }
   0x8   :  { %s43_s6 = sshll.u32 %s325_s2, 4  ;;  %s326_s10 = smov 64   ;;  %s44_s6 = int_to_ptr.vmem [resolvable:$true] %s43_s6 }
   0x9   :  { %s327_s1 = smov 4   ;;  %s328_s11 = smov [#allocation7]  }
   0xa   :  { %49 = dma.hbm_to_vmem [thread:$0]  %s42_s30, 256, %s44_s6, [#allocation5], %s326_s10, %s326_s10, %s327_s1  }
   0xb   :  { %s57_s12 = sshll.u32 %s328_s11, 4  ;;  %s58_s12 = int_to_ptr.vmem [resolvable:$true] %s57_s12 }
   0xc   :  { %60 = dma.hbm_to_vmem [thread:$0]  %s56_s9, 16, %s58_s12, [#allocation8]  }
   0xd   :  { %317 = dma.done.wait [#allocation3], 16  }
   0xe   :  { %318 = vsyncadd [#allocation3], 4294967280 }
   0xf   :  { %319 = dma.done.wait [#allocation5], 272  }
  0x10   :  { %320 = vsyncadd [#allocation5], 4294967024 }
  0x11   :  { %321 = dma.done.wait [#allocation8], 16  }
  0x12   :  { %322 = vsyncadd [#allocation8], 4294967280  ;;  %vm80_vm0 = vcmask 261120   ;;  %v78_v0 = vld [vmem:[%s389_s0] sm:$0xff]  ;;  %v79_v2 = vld [vmem:[%s389_s0 + $0x8] sm:$0xff]  ;;  %v329_v4 = vmov 32.0  }
  0x13   :  { %v81_v1 = vsel %vm80_vm0, %v78_v0, 0.0  ;;  %v84_v3 = vsel %vm80_vm0, %v79_v2, 0.0  ;;  %215 = vrcp.f32 %v329_v4  ;;  %v204_v21 = vld [vmem:[#allocation6 + $0x8] sm:$0xff]  ;;  %v203_v23 = vld [vmem:[#allocation6] sm:$0xff]  ;;  %v212_v42 = vld [vmem:[#allocation2] ss:$0 sm:$0xff] }
  0x14   :  { %82 = vadd.xlane.f32.xlu0 %v81_v1  ;;  %174 = vmatpush.bf16.msra.mxu0 %v204_v21  ;;  %v213_v47 = vld [vmem:[#allocation4] ss:$0 sm:$0xff]  ;;  %v214_v52 = vld [vmem:[#allocation7] ss:$0 sm:$0xff]  ;;  %vm184_vm8 = vcmask 257024  }
  0x18   :  { %175 = vmatpush.bf16.msra.mxu0 %v203_v23 }
  0x19   :  { %v216_v5 = vpop.eup %215 }
  0x1a   :  { %v88_v6 = vmul.f32 32.0, %v216_v5  ;;  %vm92_vm1 = vweird.f32 %v216_v5 }
  0x1c   :  { %85 = vadd.xlane.f32.xlu0 %v84_v3  ;;  %v89_v7 = vsub.f32 1.0, %v88_v6 }
  0x1e   :  { %v90_v8 = vmul.f32 %v216_v5, %v89_v7 }
  0x20   :  { %v91_v9 = vadd.f32 %v216_v5, %v90_v8 }
  0x22   :  { %v93_v10 = vsel %vm92_vm1, %v216_v5, %v91_v9 }
  0x87   :  { %v83_v11 = vpop.xlane.xlu0 %82 }
  0x88   :  { %v94_v12 = vmul.f32 %v93_v10, %v83_v11 }
  0x8a   :  { %v96_v13 = vsub.f32 %v78_v0, %v94_v12 }
  0x8c   :  { %v98_v14 = vmul.f32 %v96_v13, %v96_v13 }
  0x8e   :  { %v100_v15 = vsel %vm80_vm0, %v98_v14, 0.0 }
  0x8f   :  { %101 = vadd.xlane.f32.xlu1 %v100_v15  ;;  %v86_v16 = vpop.xlane.xlu0 %85 }
  0x90   :  { %v95_v17 = vmul.f32 %v93_v10, %v86_v16 }
  0x92   :  { %v97_v18 = vsub.f32 %v79_v2, %v95_v17 }
  0x94   :  { %v99_v19 = vmul.f32 %v97_v18, %v97_v18 }
  0x96   :  { %v103_v20 = vsel %vm80_vm0, %v99_v19, 0.0 }
  0x97   :  { %104 = vadd.xlane.f32.xlu1 %v103_v20 }
 0x102   :  { %v102_v22 = vpop.xlane.xlu1 %101 }
 0x103   :  { %v106_v24 = vmul.f32 %v102_v22, %v93_v10 }
 0x105   :  { %v108_v25 = vadd.f32 1e-05, %v106_v24 }
 0x107   :  { %217 = vrsqrt.f32 %v108_v25  ;;  %vm116_vm3 = vweird.f32 %v108_v25 }
 0x10a   :  { %v105_v26 = vpop.xlane.xlu1 %104 }
 0x10b   :  { %v107_v27 = vmul.f32 %v105_v26, %v93_v10 }
 0x10d   :  { %v218_v28 = vpop.eup %217  ;;  %v109_v29 = vadd.f32 1e-05, %v107_v27 }
 0x10e   :  { %v111_v30 = vmul.f32 %v218_v28, %v108_v25  ;;  %vm117_vm2 = vweird.f32 %v218_v28 }
 0x10f   :  { %219 = vrsqrt.f32 %v109_v29  ;;  %vm118_vm4 = vmor %vm116_vm3, %vm117_vm2  ;;  %vm126_vm6 = vweird.f32 %v109_v29 }
 0x110   :  { %v112_v31 = vmul.f32 %v218_v28, %v111_v30 }
 0x112   :  { %v113_v32 = vmul.f32 0.5, %v112_v31 }
 0x114   :  { %v114_v33 = vsub.f32 1.5, %v113_v32 }
 0x115   :  { %v220_v34 = vpop.eup %219 }
 0x116   :  { %v115_v35 = vmul.f32 %v218_v28, %v114_v33  ;;  %v121_v36 = vmul.f32 %v220_v34, %v109_v29  ;;  %vm127_vm5 = vweird.f32 %v220_v34 }
 0x117   :  { %vm128_vm7 = vmor %vm126_vm6, %vm127_vm5 }
 0x118   :  { %v122_v37 = vmul.f32 %v220_v34, %v121_v36  ;;  %v119_v38 = vsel %vm118_vm4, %v218_v28, %v115_v35 }
 0x119   :  { %v130_v41 = vmul.f32 %v119_v38, %v96_v13 }
 0x11a   :  { %v123_v39 = vmul.f32 0.5, %v122_v37 }
 0x11b   :  { %v136_v46 = vmul.f32 %v212_v42, %v130_v41 }
 0x11c   :  { %v124_v40 = vsub.f32 1.5, %v123_v39 }
 0x11d   :  { %v142_v49 = vadd.f32 %v213_v47, %v136_v46 }
 0x11e   :  { %v125_v43 = vmul.f32 %v220_v34, %v124_v40 }
 0x120   :  { %v129_v44 = vsel %vm128_vm7, %v220_v34, %v125_v43 }
 0x121   :  { %v131_v45 = vmul.f32 %v129_v44, %v97_v18 }
 0x123   :  { %v137_v48 = vmul.f32 %v212_v42, %v131_v45 }
 0x125   :  { %v143_v50 = vadd.f32 %v213_v47, %v137_v48 }
 0x127   :  { %v144_v51 = vpack.c.bf16 %v143_v50, %v142_v49 }
 0x129   :  { %202 = vmatmul.msk.bf16.vlgmr.msra.gmra.mxu0 %vm80_vm0, %v144_v51 }
 0x1a6   :  { %v177_v53 = vpop.f32.mrf.mxu0 }
 0x1a7   :  { %v178_v54 = vadd.f32 %v214_v52, %v177_v53 }
 0x1a9   :  { %v182_v55 = vpack.c.bf16 %v178_v54, %v178_v54 }
 0x1ab   :  { %185 = vst.msk [vmem:[%s394_s5] sm:$0xf] %vm184_vm8, %v182_v55 }
 0x1ae   :  { %v179_v56 = vpop.f32.mrf.mxu0 }
 0x1af   :  { %v180_v57 = vadd.f32 %v214_v52, %v179_v56 }
 0x1b1   :  { %v183_v58 = vpack.c.bf16 %v180_v57, %v180_v57 }
 0x1b3   :  { %186 = vst.msk [vmem:[%s394_s5 + $0x4] sm:$0xf] %vm184_vm8, %v183_v58 }
 0x1b4   :  { %191 = vsyncpa [#allocation3], 1 }
 0x1b5   :  { %192 = vsyncpa [#allocation5], 1 }
 0x1b6   :  { %193 = vsyncpa [#allocation8], 1 }

// kernel: decoder_forward.14
= control target key start
LH: loop header
LB: loop body
LE: loop exit
PB: predicated region body
PF: predicated region fallthrough
CT: control target
= control target key end

     0   :  { %11 = vsyncpa [#allocation4], 0  ;;  %s1191_s0 = inlined_call_operand.vmem [shape: bf16[2,8,32], index: 0, kind: input, shape index: {}]   ;;  %s1192_s1 = inlined_call_operand.vmem [shape: bf16[2,8,64], index: 1, kind: input, shape index: {}]   ;;  %s1193_s2 = inlined_call_operand.vmem [shape: bf16[1,8,8], index: 2, kind: input, shape index: {}]   ;;  %s1194_s3 = inlined_call_operand.hbm [shape: bf16[32,32], index: 3, kind: input, shape index: {}]   ;;  %s1195_s4 = inlined_call_operand.hbm [shape: f32[1,32], index: 4, kind: input, shape index: {}]   ;;  %s1196_s5 = inlined_call_operand.vmem [shape: f32[2,8,32], index: 5, kind: input, shape index: {}]   ;;  %s1197_s6 = inlined_call_operand.vmem [shape: f32[2,8,32], index: 6, kind: output, shape index: {}]  }
   0x1   :  { %12 = vsyncpa [#allocation6], 0  ;;  %s1067_s21 = smov 0   ;;  %s1069_s22 = smov 0  }
   0x2   :  { %s1071_s23 = smov 0  }
   0x3 LB: > { %s817_s24 = sadd.s32 4294967295, %s1016_s23   ;;  %s30_s25 = sadd.s32 1, %s1012_s22  ;;  %s1016_s23 = sphi %s1071_s23, %s18_s23   ;;  %s1012_s22 = sphi %s1069_s22, %s1203_s22   ;;  %s1008_s21 = sphi %s1067_s21, %s1202_s21  }
   0x4   : > { %p32_p0 = scmp.ge.s32.totalorder %s30_s25, 2  ;;  %p819_p1 = scmp.ge.s32.totalorder %s1016_s23, 1 }
   0x5   : > { %p213_p2 = scmp.lt.s32.totalorder %s1016_s23, 3  ;;  %p1092_p4 = scmp.eq.s32.totalorder %s817_s24, 0 }
   0x6   : > { %s1205_s25 = smov (%p32_p0, %s30_s25), 0  ;;  %s231_s30 = sshll.u32 %s1194_s3, 4  ;;  %s232_s30 = int_to_ptr.hbm [resolvable:$true] %s231_s30 }
   0x7   : > { %p1088_p3 = pnand %p819_p1, %p213_p2  ;;  %s1018_s7 = smov [#allocation3]  }
   0x8   : > { %s233_s8 = sshll.u32 %s1018_s7, 4  ;;  %s246_s11 = sshll.u32 %s1195_s4, 4  ;;  %s234_s8 = int_to_ptr.vmem [resolvable:$true] %s233_s8  ;;  %s247_s11 = int_to_ptr.hbm [resolvable:$true] %s246_s11 }
   0x9   : > { %p860_p5 = pneg %p1088_p3  ;;  %s1019_s12 = smov 64  }
   0xa   : > { %s1020_s13 = smov 4   ;;  %s1021_s14 = smov [#allocation5]  }
   0xb   : > { %p861_p6 = pnand %p1092_p4, %p860_p5  ;;  %s248_s15 = sshll.u32 %s1021_s14, 4  ;;  %s249_s15 = int_to_ptr.vmem [resolvable:$true] %s248_s15 }
   0xc   : > { %288 = sbr.rel (%p1088_p3) target bundleno = 1228 (0x4cc), region = 44 }
   0xd   : > { %863 = dma.hbm_to_vmem [thread:$0]  (!%p861_p6), %s232_s30, 256, %s234_s8, [#allocation4], %s1019_s12, %s1019_s12, %s1020_s13  }
   0xe   : > { %866 = dma.hbm_to_vmem [thread:$0]  (!%p861_p6), %s247_s11, 16, %s249_s15, [#allocation6]  }
  0x11   : > { %999 = dma.done.wait (%p1092_p4), [#allocation4], 256  }
  0x12   : > { %1001 = vsyncadd (%p1092_p4), [#allocation4], 4294967040 }
  0x13   : > { %1003 = dma.done.wait (%p1092_p4), [#allocation6], 16  }
  0x14   : > { %1005 = vsyncadd (%p1092_p4), [#allocation6], 4294967280  ;;  %p343_p7 = scmp.lt.s32.totalorder %s1008_s21, 1  ;;  %vm379_vm0 = vcmask 64512   ;;  %s1022_s27 = smov 96   ;;  %vm422_vm2 = vcmask 1043456  }
  0x15   : > { %s1023_s28 = smov 112   ;;  %s1024_s29 = smov 104   ;;  %v378_v8 = vld [vmem:[%s1193_s2] sm:$0xf]  ;;  %vm440_vm3 = vcmask 60416   ;;  %vm507_vm4 = vcmask 126016  }
  0x16   : > { %s1207_s21 = smov (!%p343_p7, %s1008_s21), 1  ;;  %v399_v11 = vunpack.c.l.bf16 %v378_v8  ;;  %s1025_s8 = smov 120   ;;  %vm571_vm5 = vcmask 191616   ;;  %vm635_vm6 = vcmask 257216   ;;  %vm658_vm7 = vcmask 261120  }
  0x17   : > { %s827_s16 = sshll.u32 %s1207_s21, 2  ;;  %s1026_s9 = smov 88  }
  0x18   : > { %s349_s19 = scalar_lea.vmem %s1191_s0, %s827_s16  ;;  %s353_s26 = scalar_lea.vmem %s1192_s1, %s827_s16  ;;  %vm1137_vm1 = vcmp.gt.f32.partialorder %v399_v11, 0.0 }
  0x19   : > { %v373_v0 = vld [vmem:[%s349_s19] sm:$0xf]  ;;  %s1027_s10 = smov 80   ;;  %s1028_s11 = smov 72  }
  0x1a   : > { %v377_v1 = vld [vmem:[%s353_s26] sm:$0xf]  ;;  %v374_v3 = vunpack.c.l.bf16 %v373_v0  ;;  %s1029_s12 = smov 8   ;;  %s1030_s13 = smov 24  }
  0x1b   : > { %v384_v2 = vsel %vm379_vm0, %v377_v1, 0  ;;  %v415_v6 = vunpack.c.l.b16 %v377_v1  ;;  %s1031_s14 = smov 16   ;;  %s829_s15 = sshll.u32 %s1207_s21, 3 }
  0x1c   : > { %393 = vmatpush.bf16.xpose.msra.mxu0 %v384_v2  ;;  %v375_v4 = vmul.f32 0.35355338, %v374_v3  ;;  %s364_s18 = scalar_lea.vmem %s1196_s5, %s829_s15  ;;  %s371_s24 = scalar_lea.vmem %s1197_s6, %s829_s15 }
  0x1d   : > { %v1129_v7 = vpack.c.b16 %v415_v6, %v415_v6 }
  0x1e   : > { %v376_v5 = vpack.c.bf16 %v375_v4, %v375_v4 }
  0x1f   : > { %417 = vrot.lane.b32.xlu2 %v1129_v7, %s1022_s27 }
  0x20   : > { %v443_v9 = vunpack.c.l.b16 %v376_v5 }
  0x22   : > { %v444_v10 = vpack.c.b16 %v443_v9, %v443_v9 }
  0x23   : > { %831 = vmatmul.msk.bf16.vlgmr.msra.gmra.mxu0 %vm379_vm0, %v376_v5 }
  0x27   : > { %511 = vrot.lane.b32.xlu2 %v1129_v7, %s1023_s28 }
  0x2f   : > { %575 = vrot.lane.b32.xlu2 %v1129_v7, %s1024_s29 }
  0x37   : > { %509 = vrot.lane.b32.xlu2 %v444_v10, %s1023_s28 }
  0x79   : > { %v418_v17 = vpop.permute.xlu2 %417 }
  0x7a   : > { %v424_v28 = vsel %vm422_vm2, %v418_v17, 0 }
  0x7b   : > { %433 = vmatpush.bf16.msra.mxu1 %v424_v28 }
  0x81   : > { %v512_v18 = vpop.permute.xlu2 %511 }
  0x82   : > { %v517_v29 = vsel %vm379_vm0, %v512_v18, 0 }
  0x83   : > { %526 = vmatpush.bf16.xpose.msrb.mxu1 %v517_v29 }
  0x89   : > { %v576_v22 = vpop.permute.xlu2 %575 }
  0x8a   : > { %v581_v23 = vsel %vm379_vm0, %v576_v22, 0 }
  0x8b   : > { %590 = vmatpush.bf16.xpose.msrb.mxu0 %v581_v23 }
  0x91   : > { %v510_v36 = vpop.permute.xlu2 %509 }
  0xa0   : > { %v395_v13 = vpop.f32.mrf.mxu0 }
  0xa1   : > { %v401_v14 = vsel %vm1137_vm1, %v395_v13, -1e+09 }
  0xa2   : > { %v402_v15 = vsel %vm379_vm0, %v401_v14, -inf }
  0xa3   : > { %403 = vmax.xlane.f32.xlu0 %v402_v15 }
  0xa8   : > { %v397_v16 = vpop.f32.mrf.mxu0 }
  0xb7   : > { %447 = vrot.lane.b32.xlu0 %v1129_v7, %s1025_s8 }
  0xbf   : > { %573 = vrot.lane.b32.xlu0 %v444_v10, %s1024_s29 }
 0x116   : > { %v404_v19 = vpop.xlane.xlu0 %403 }
 0x117   : > { %v405_v20 = vsub.f32 %v401_v14, %v404_v19 }
 0x119   : > { %v406_v21 = vmul.f32 1.442695, %v405_v20 }
 0x11b   : > { %910 = vpow2.f32 %v406_v21 }
 0x121   : > { %v911_v24 = vpop.eup %910 }
 0x122   : > { %v408_v25 = vsel %vm379_vm0, %v911_v24, 0.0 }
 0x123   : > { %409 = vadd.xlane.f32.xlu1 %v408_v25 }
 0x129   : > { %v448_v26 = vpop.permute.xlu0 %447 }
 0x12a   : > { %v453_v30 = vsel %vm379_vm0, %v448_v26, 0 }
 0x12b   : > { %462 = vmatpush.bf16.xpose.msra.mxu2 %v453_v30  ;;  %v851_v30 = vld [vmem:[#allocation3 + $0x8] sm:$0xff] }
 0x131   : > { %v574_v27 = vpop.permute.xlu0 %573 }
 0x132   : > { %837 = vmatmul.msk.bf16.vlgmr.msrb.gmra.mxu0 %vm379_vm0, %v574_v27 }
 0x13c   : > { %445 = vrot.lane.b32.xlu1 %v444_v10, %s1025_s8 }
 0x196   : > { %v410_v31 = vpop.xlane.xlu1 %409 }
 0x197   : > { %912 = vrcp.f32 %v410_v31  ;;  %v850_v31 = vld [vmem:[#allocation3] sm:$0xff] }
 0x19d   : > { %v913_v32 = vpop.eup %912 }
 0x19e   : > { %v412_v33 = vmul.f32 %v913_v32, %v911_v24 }
 0x1a0   : > { %v413_v34 = vpack.c.bf16 %v412_v33, %v412_v33 }
 0x1a2   : > { %832 = vmatmul.msk.bf16.vlgmr.msra.gmra.mxu1 %vm379_vm0, %v413_v34 }
 0x1a3   : > { %668 = vmatpush.bf16.msra.mxu1 %v851_v30 }
 0x1a7   : > { %669 = vmatpush.bf16.msra.mxu1 %v850_v31 }
 0x1ae   : > { %v446_v35 = vpop.permute.xlu1 %445 }
 0x1af   : > { %833 = vmatmul.msk.bf16.vlgmr.msra.gmra.mxu2 %vm379_vm0, %v446_v35  ;;  %v592_v37 = vpop.f32.mrf.mxu0 }
 0x1b0   : > { %v596_v38 = vsel %vm1137_vm1, %v592_v37, -1e+09 }
 0x1b1   : > { %v597_v39 = vsel %vm379_vm0, %v596_v38, -inf }
 0x1b2   : > { %835 = vmatmul.msk.bf16.vlgmr.msrb.gmra.mxu1 %vm379_vm0, %v510_v36  ;;  %598 = vmax.xlane.f32.xlu0 %v597_v39  ;;  %v909_v36 = vld [vmem:[#allocation5] ss:$0 sm:$0xff] }
 0x1b7   : > { %v594_v40 = vpop.f32.mrf.mxu0 }
 0x21f   : > { %v435_v41 = vpop.f32.mrf.mxu1 }
 0x220   : > { %v439_v42 = vpack.c.bf16 %v435_v41, %v435_v41 }
 0x222   : > { %441 = vst.msk [vmem:[#allocation2] sm:$0xf] %vm440_vm3, %v439_v42 }
 0x225   : > { %v599_v54 = vpop.xlane.xlu0 %598 }
 0x226   : > { %v600_v58 = vsub.f32 %v596_v38, %v599_v54  ;;  %v675_v38 = vld [vmem:[%s364_s18] sm:$0xff] }
 0x227   : > { %v437_v43 = vpop.f32.mrf.mxu1 }
 0x228   : > { %v601_v60 = vmul.f32 1.442695, %v600_v58 }
 0x22f   : > { %v528_v44 = vpop.f32.mrf.mxu1 }
 0x230   : > { %v532_v45 = vsel %vm1137_vm1, %v528_v44, -1e+09 }
 0x231   : > { %v533_v46 = vsel %vm379_vm0, %v532_v45, -inf }
 0x232   : > { %534 = vmax.xlane.f32.xlu1 %v533_v46  ;;  %v464_v47 = vpop.f32.mrf.mxu2 }
 0x233   : > { %v468_v48 = vsel %vm1137_vm1, %v464_v47, -1e+09 }
 0x234   : > { %v469_v49 = vsel %vm379_vm0, %v468_v48, -inf }
 0x235   : > { %470 = vmax.xlane.f32.xlu2 %v469_v49 }
 0x237   : > { %v530_v50 = vpop.f32.mrf.mxu1 }
 0x23a   : > { %v466_v51 = vpop.f32.mrf.mxu2 }
 0x24b   : > { %481 = vrot.lane.b32.xlu1 %v1129_v7, %s1026_s9 }
 0x2a5   : > { %v535_v52 = vpop.xlane.xlu1 %534 }
 0x2a6   : > { %v536_v53 = vsub.f32 %v532_v45, %v535_v52 }
 0x2a8   : > { %v537_v55 = vmul.f32 1.442695, %v536_v53  ;;  %v471_v56 = vpop.xlane.xlu2 %470 }
 0x2a9   : > { %v472_v57 = vsub.f32 %v468_v48, %v471_v56 }
 0x2aa   : > { %914 = vpow2.f32 %v537_v55 }
 0x2ab   : > { %v473_v59 = vmul.f32 1.442695, %v472_v57 }
 0x2ad   : > { %916 = vpow2.f32 %v473_v59 }
 0x2ae   : > { %918 = vpow2.f32 %v601_v60 }
 0x2b0   : > { %v915_v61 = vpop.eup %914 }
 0x2b1   : > { %v539_v62 = vsel %vm379_vm0, %v915_v61, 0.0 }
 0x2b2   : > { %540 = vadd.xlane.f32.xlu0 %v539_v62 }
 0x2b3   : > { %v917_v63 = vpop.eup %916 }
 0x2b4   : > { %v475_v0 = vsel %vm379_vm0, %v917_v63, 0.0  ;;  %v919_v1 = vpop.eup %918 }
 0x2b5   : > { %476 = vadd.xlane.f32.xlu2 %v475_v0  ;;  %v603_v2 = vsel %vm379_vm0, %v919_v1, 0.0 }
 0x2bd   : > { %604 = vadd.xlane.f32.xlu2 %v603_v2  ;;  %v482_v3 = vpop.permute.xlu1 %481 }
 0x2be   : > { %v487_v4 = vsel %vm422_vm2, %v482_v3, 0 }
 0x2bf   : > { %496 = vmatpush.bf16.msra.mxu3 %v487_v4 }
 0x2c6   : > { %545 = vrot.lane.b32.xlu0 %v1129_v7, %s1027_s10 }
 0x2d5   : > { %609 = vrot.lane.b32.xlu2 %v1129_v7, %s1028_s11 }
 0x325   : > { %v541_v8 = vpop.xlane.xlu0 %540 }
 0x328   : > { %v477_v5 = vpop.xlane.xlu2 %476 }
 0x329   : > { %920 = vrcp.f32 %v477_v5 }
 0x32f   : > { %v921_v6 = vpop.eup %920 }
 0x330   : > { %v605_v9 = vpop.xlane.xlu2 %604  ;;  %v479_v10 = vmul.f32 %v921_v6, %v917_v63 }
 0x331   : > { %922 = vrcp.f32 %v605_v9 }
 0x332   : > { %v480_v11 = vpack.c.bf16 %v479_v10, %v479_v10  ;;  %924 = vrcp.f32 %v541_v8 }
 0x334   : > { %834 = vmatmul.msk.bf16.vlgmr.msra.gmra.mxu3 %vm379_vm0, %v480_v11 }
 0x337   : > { %v923_v12 = vpop.eup %922 }
 0x338   : > { %v607_v13 = vmul.f32 %v923_v12, %v919_v1  ;;  %v610_v14 = vpop.permute.xlu2 %609  ;;  %v546_v15 = vpop.permute.xlu0 %545 }
 0x339   : > { %v551_v7 = vsel %vm422_vm2, %v546_v15, 0  ;;  %v615_v16 = vsel %vm422_vm2, %v610_v14, 0  ;;  %v925_v18 = vpop.eup %924 }
 0x33a   : > { %560 = vmatpush.bf16.msrb.mxu3 %v551_v7  ;;  %624 = vmatpush.bf16.msrb.mxu2 %v615_v16  ;;  %v608_v17 = vpack.c.bf16 %v607_v13, %v607_v13  ;;  %v543_v19 = vmul.f32 %v925_v18, %v915_v61 }
 0x33c   : > { %v544_v20 = vpack.c.bf16 %v543_v19, %v543_v19 }
 0x33d   : > { %838 = vmatmul.msk.bf16.vlgmr.msrb.gmra.mxu2 %vm379_vm0, %v608_v17 }
 0x344   : > { %836 = vmatmul.msk.bf16.vlgmr.msrb.gmra.mxu3 %vm379_vm0, %v544_v20 }
 0x3b7   : > { %v498_v21 = vpop.f32.mrf.mxu3 }
 0x3b8   : > { %v502_v22 = vpack.c.bf16 %v498_v21, %v498_v21 }
 0x3ba   : > { %504 = vrot.lane.b32.xlu1 %v502_v22, %s1029_s12 }
 0x3bf   : > { %v500_v23 = vpop.f32.mrf.mxu3 }
 0x3c0   : > { %v626_v24 = vpop.f32.mrf.mxu2 }
 0x3c1   : > { %v630_v25 = vpack.c.bf16 %v626_v24, %v626_v24 }
 0x3c3   : > { %632 = vrot.lane.b32.xlu1 %v630_v25, %s1030_s13 }
 0x3c7   : > { %v562_v26 = vpop.f32.mrf.mxu3 }
 0x3c8   : > { %v566_v27 = vpack.c.bf16 %v562_v26, %v562_v26  ;;  %v628_v28 = vpop.f32.mrf.mxu2 }
 0x3ca   : > { %568 = vrot.lane.b32.xlu0 %v566_v27, %s1031_s14 }
 0x3cf   : > { %v564_v29 = vpop.f32.mrf.mxu3 }
 0x42c   : > { %v505_v32 = vpop.permute.xlu1 %504 }
 0x42d   : > { %508 = vst.msk [vmem:[#allocation2] sm:$0xf] %vm507_vm4, %v505_v32 }
 0x435   : > { %v633_v34 = vpop.permute.xlu1 %632 }
 0x43c   : > { %v569_v33 = vpop.permute.xlu0 %568 }
 0x43d   : > { %572 = vst.msk [vmem:[#allocation2] sm:$0xf] %vm571_vm5, %v569_v33 }
 0x43e   : > { %636 = vst.msk [vmem:[#allocation2] sm:$0xf] %vm635_vm6, %v633_v34 }
 0x445   : > { %v637_v35 = vld [vmem:[#allocation2] sm:$0xf] }
 0x446   : > { %847 = vmatmul.msk.bf16.vlgmr.msra.gmra.mxu1 %vm658_vm7, %v637_v35 }
 0x4c3   : > { %v671_v37 = vpop.f32.mrf.mxu1 }
 0x4c4   : > { %v672_v39 = vadd.f32 %v909_v36, %v671_v37 }
 0x4c6   : > { %v676_v40 = vadd.f32 %v675_v38, %v672_v39 }
 0x4c8   : > { %677 = vst.msk [vmem:[%s371_s24] sm:$0xff] %vm658_vm7, %v676_v40 }
 0x4cb   : > { %v673_v41 = vpop.f32.mrf.mxu1 }
 0x4cc PF: > { %s18_s23 = sadd.s32 1, %s1016_s23   ;;  %s1202_s21 = smov %s1012_s22 }
 0x4cd   : > { %p15_p8 = scmp.ge.s32.totalorder %s18_s23, 4   ;;  %s1203_s22 = smov %s1205_s25 }
 0x4cf   :  { %17 = sbr.rel (!%p15_p8) target bundleno = 3 (0x3), region = 92 }
 0x4d4   :  { %703 = vsyncpa [#allocation4], 1 }
 0x4d5   :  { %705 = vsyncpa [#allocation4 + $0x1], 1 }
 0x4d6   :  { %706 = vsyncpa [#allocation6], 1 }

// kernel: decoder_forward.16
= control target key start
LH: loop header
LB: loop body
LE: loop exit
PB: predicated region body
PF: predicated region fallthrough
CT: control target
= control target key end

     0   :  { %8 = vsyncpa [#allocation3], 0  ;;  %s249_s0 = inlined_call_operand.hbm [shape: f32[16,32], index: 0, kind: input, shape index: {}]   ;;  %s250_s1 = inlined_call_operand.hbm [shape: bf16[32,64], index: 1, kind: input, shape index: {}]   ;;  %s251_s2 = inlined_call_operand.hbm [shape: f32[1,64], index: 2, kind: input, shape index: {}]   ;;  %s252_s3 = inlined_call_operand.vmem [shape: bf16[16,64], index: 3, kind: output, shape index: {}]  }
   0x1   :  { %9 = vsyncpa [#allocation5], 0  ;;  %s27_s14 = sshll.u32 %s250_s1, 4  ;;  %s207_s15 = smov [#allocation4]   ;;  %s28_s14 = int_to_ptr.hbm [resolvable:$true] %s27_s14 }
   0x2   :  { %s29_s16 = sshll.u32 %s207_s15, 4  ;;  %s14_s19 = sshll.u32 %s249_s0, 4  ;;  %s30_s16 = int_to_ptr.vmem [resolvable:$true] %s29_s16  ;;  %s15_s19 = int_to_ptr.hbm [resolvable:$true] %s14_s19 }
   0x3   :  { %s208_s20 = smov 64   ;;  %s209_s21 = smov 4  }
   0x4   :  { %35 = dma.hbm_to_vmem [thread:$0]  %s28_s14, 256, %s30_s16, [#allocation5], %s208_s20, %s208_s20, %s209_s21  }
   0x5   :  { %s210_s22 = smov [#allocation2]   ;;  %s211_s24 = smov 128  }
   0x6   :  { %s16_s23 = sshll.u32 %s210_s22, 4  ;;  %s212_s25 = smov 8   ;;  %s17_s23 = int_to_ptr.vmem [resolvable:$true] %s16_s23 }
   0x7   :  { %22 = dma.hbm_to_vmem [thread:$0]  %s15_s19, 256, %s17_s23, [#allocation3], %s211_s24, %s211_s24, %s212_s25  }
   0x8   :  { %s41_s27 = sshll.u32 %s251_s2, 4  ;;  %s213_s28 = smov [#allocation6]   ;;  %s42_s27 = int_to_ptr.hbm [resolvable:$true] %s41_s27 }
   0x9   :  { %s43_s29 = sshll.u32 %s213_s28, 4  ;;  %s44_s29 = int_to_ptr.vmem [resolvable:$true] %s43_s29 }
   0xa   :  { %46 = dma.hbm_to_vmem [thread:$0]  %s42_s27, 16, %s44_s29, [#allocation5]  }
   0xb   :  { %203 = dma.done.wait [#allocation3], 256  }
   0xc   :  { %204 = vsyncadd [#allocation3], 4294967040 }
   0xd   :  { %205 = dma.done.wait [#allocation5], 272  }
   0xe   :  { %206 = vsyncadd [#allocation5], 4294967024  ;;  %v122_v0 = vld [vmem:[#allocation4 + $0x8] sm:$0xff]  ;;  %v121_v1 = vld [vmem:[#allocation4] sm:$0xff]  ;;  %vm83_vm0 = vcmask 261120   ;;  %vm103_vm1 = vcmask 519168  }
   0xf   :  { %93 = vmatpush.bf16.msra.mxu0 %v122_v0  ;;  %v60_v2 = vld [vmem:[#allocation2] sm:$0xff]  ;;  %v61_v3 = vld [vmem:[#allocation2 + $0x8] sm:$0xff] }
  0x10   :  { %v62_v4 = vpack.c.bf16 %v61_v3, %v60_v2  ;;  %v130_v5 = vld [vmem:[#allocation6] ss:$0 sm:$0xff] }
  0x13   :  { %94 = vmatpush.bf16.msra.mxu0 %v121_v1 }
  0x16   :  { %120 = vmatmul.msk.bf16.vlgmr.msra.gmra.mxu0 %vm83_vm0, %v62_v4 }
  0x93   :  { %v96_v6 = vpop.f32.mrf.mxu0 }
  0x94   :  { %v97_v7 = vadd.f32 %v130_v5, %v96_v6 }
  0x96   :  { %v101_v8 = vpack.c.bf16 %v97_v7, %v97_v7 }
  0x98   :  { %104 = vst.msk [vmem:[%s252_s3] sm:$0xf] %vm103_vm1, %v101_v8 }
  0x9b   :  { %v98_v9 = vpop.f32.mrf.mxu0 }
  0x9c   :  { %v99_v10 = vadd.f32 %v130_v5, %v98_v9 }
  0x9e   :  { %v102_v11 = vpack.c.bf16 %v99_v10, %v99_v10 }
  0xa0   :  { %105 = vst.msk [vmem:[%s252_s3 + $0x4] sm:$0xf] %vm103_vm1, %v102_v11 }
  0xa1   :  { %110 = vsyncpa [#allocation3], 1 }
  0xa2   :  { %111 = vsyncpa [#allocation5], 1 }

// kernel: decoder_forward.18
= control target key start
LH: loop header
LB: loop body
LE: loop exit
PB: predicated region body
PF: predicated region fallthrough
CT: control target
= control target key end

     0   :  { %vm33_vm0 = vcmask 261120   ;;  %v278_v4 = vmov 32.0   ;;  %vm99_vm6 = vcmask 257024   ;;  %v279_v58 = vmov 0.0   ;;  %s383_s0 = inlined_call_operand.vmem [shape: f32[16,32], index: 0, kind: input, shape index: {}]   ;;  %s384_s1 = inlined_call_operand.vmem [shape: f32[1,32], index: 1, kind: input, shape index: {}]   ;;  %s385_s2 = inlined_call_operand.vmem [shape: f32[1,32], index: 2, kind: input, shape index: {}]   ;;  %s386_s4 = inlined_call_operand.vmem [shape: f32[1,64], index: 4, kind: input, shape index: {}]   ;;  %s387_s3 = inlined_call_operand.vmem [shape: bf16[32,64], index: 3, kind: input, shape index: {}]   ;;  %s388_s6 = inlined_call_operand.vmem [shape: f32[1,32], index: 6, kind: input, shape index: {}]   ;;  %s389_s5 = inlined_call_operand.vmem [shape: bf16[64,32], index: 5, kind: input, shape index: {}]   ;;  %s390_s7 = inlined_call_operand.vmem [shape: f32[16,32], index: 7, kind: output, shape index: {}]  }
   0x1   :  { %v323_v0 = vld [vmem:[%s383_s0] sm:$0xff]  ;;  %v330_v2 = vld [vmem:[%s383_s0 + $0x8] sm:$0xff]  ;;  %272 = vrcp.f32 %v278_v4  ;;  %v265_v54 = vld [vmem:[%s389_s5 + $0x18] sm:$0xff]  ;;  %102 = vst.msk [vmem:[#allocation3] sm:$0xff] %vm33_vm0, %v279_v58  ;;  %vm186_vm9 = vcmask 523264  }
   0x2   :  { %v34_v1 = vsel %vm33_vm0, %v323_v0, 0.0  ;;  %v37_v3 = vsel %vm33_vm0, %v330_v2, 0.0  ;;  %v261_v24 = vld [vmem:[%s387_s3 + $0x8] sm:$0xff]  ;;  %v260_v27 = vld [vmem:[%s387_s3] sm:$0xff]  ;;  %194 = vmatpush.bf16.msra.mxu1 %v265_v54  ;;  %v264_v55 = vld [vmem:[%s389_s5 + $0x10] sm:$0xff]  ;;  %103 = vst.msk [vmem:[#allocation3 + $0x8] sm:$0xff] %vm33_vm0, %v279_v58 }
   0x3   :  { %35 = vadd.xlane.f32.xlu0 %v34_v1  ;;  %141 = vmatpush.bf16.msra.mxu0 %v261_v24  ;;  %v268_v37 = vld [vmem:[%s384_s1] ss:$0 sm:$0xff]  ;;  %v263_v56 = vld [vmem:[%s389_s5 + $0x8] sm:$0xff] }
   0x4   :  { %v269_v40 = vld [vmem:[%s385_s2] ss:$0 sm:$0xff] }
   0x5   :  { %v262_v57 = vld [vmem:[%s389_s5] sm:$0xff] }
   0x6   :  { %195 = vmatpush.bf16.msra.mxu1 %v264_v55  ;;  %v270_v60 = vld [vmem:[%s386_s4] ss:$0 sm:$0xff] }
   0x7   :  { %v273_v5 = vpop.eup %272  ;;  %142 = vmatpush.bf16.msra.mxu0 %v260_v27 }
   0x8   :  { %v41_v6 = vmul.f32 32.0, %v273_v5  ;;  %vm45_vm1 = vweird.f32 %v273_v5 }
   0xa   :  { %v42_v7 = vsub.f32 1.0, %v41_v6  ;;  %196 = vmatpush.bf16.msra.mxu1 %v263_v56 }
   0xb   :  { %38 = vadd.xlane.f32.xlu0 %v37_v3 }
   0xc   :  { %v43_v8 = vmul.f32 %v273_v5, %v42_v7 }
   0xe   :  { %v44_v9 = vadd.f32 %v273_v5, %v43_v8  ;;  %197 = vmatpush.bf16.msra.mxu1 %v262_v57  ;;  %v153_v8 = vld [vmem:[#allocation3 + $0x8] sm:$0xff] }
  0x10   :  { %v46_v10 = vsel %vm45_vm1, %v273_v5, %v44_v9  ;;  %v152_v5 = vld [vmem:[#allocation3] sm:$0xff] }
  0x76   :  { %v36_v11 = vpop.xlane.xlu0 %35 }
  0x77   :  { %v47_v12 = vmul.f32 %v46_v10, %v36_v11 }
  0x79   :  { %v49_v13 = vsub.f32 %v323_v0, %v47_v12 }
  0x7b   :  { %v51_v14 = vmul.f32 %v49_v13, %v49_v13 }
  0x7d   :  { %v53_v15 = vsel %vm33_vm0, %v51_v14, 0.0 }
  0x7e   :  { %54 = vadd.xlane.f32.xlu1 %v53_v15  ;;  %v39_v16 = vpop.xlane.xlu0 %38 }
  0x7f   :  { %v48_v17 = vmul.f32 %v46_v10, %v39_v16 }
  0x81   :  { %v50_v18 = vsub.f32 %v330_v2, %v48_v17 }
  0x83   :  { %v52_v19 = vmul.f32 %v50_v18, %v50_v18 }
  0x85   :  { %v56_v20 = vsel %vm33_vm0, %v52_v19, 0.0 }
  0x86   :  { %57 = vadd.xlane.f32.xlu1 %v56_v20 }
  0xf1   :  { %v55_v21 = vpop.xlane.xlu1 %54 }
  0xf2   :  { %v59_v22 = vmul.f32 %v55_v21, %v46_v10 }
  0xf4   :  { %v61_v23 = vadd.f32 1e-05, %v59_v22 }
  0xf6   :  { %274 = vrsqrt.f32 %v61_v23  ;;  %vm69_vm3 = vweird.f32 %v61_v23 }
  0xf9   :  { %v58_v25 = vpop.xlane.xlu1 %57 }
  0xfa   :  { %v60_v26 = vmul.f32 %v58_v25, %v46_v10  ;;  %v271_v10 = vld [vmem:[%s388_s6] ss:$0 sm:$0xff] }
  0xfc   :  { %v275_v28 = vpop.eup %274  ;;  %v62_v29 = vadd.f32 1e-05, %v60_v26 }
  0xfd   :  { %v64_v30 = vmul.f32 %v275_v28, %v61_v23  ;;  %vm70_vm2 = vweird.f32 %v275_v28 }
  0xfe   :  { %276 = vrsqrt.f32 %v62_v29  ;;  %vm71_vm4 = vmor %vm69_vm3, %vm70_vm2  ;;  %vm79_vm7 = vweird.f32 %v62_v29 }
  0xff   :  { %v65_v31 = vmul.f32 %v275_v28, %v64_v30 }
 0x101   :  { %v66_v32 = vmul.f32 0.5, %v65_v31 }
 0x103   :  { %v67_v33 = vsub.f32 1.5, %v66_v32 }
 0x104   :  { %v277_v34 = vpop.eup %276 }
 0x105   :  { %v68_v35 = vmul.f32 %v275_v28, %v67_v33  ;;  %v74_v36 = vmul.f32 %v277_v34, %v62_v29  ;;  %vm80_vm5 = vweird.f32 %v277_v34 }
 0x106   :  { %vm81_vm8 = vmor %vm79_vm7, %vm80_vm5 }
 0x107   :  { %v72_v38 = vsel %vm71_vm4, %v275_v28, %v68_v35  ;;  %v75_v39 = vmul.f32 %v277_v34, %v74_v36 }
 0x108   :  { %v83_v41 = vmul.f32 %v72_v38, %v49_v13 }
 0x109   :  { %v76_v42 = vmul.f32 0.5, %v75_v39 }
 0x10a   :  { %v89_v43 = vmul.f32 %v268_v37, %v83_v41 }
 0x10b   :  { %v77_v44 = vsub.f32 1.5, %v76_v42 }
 0x10c   :  { %v95_v45 = vadd.f32 %v269_v40, %v89_v43 }
 0x10d   :  { %v78_v46 = vmul.f32 %v277_v34, %v77_v44 }
 0x10e   :  { %v97_v47 = vpack.c.bf16 %v95_v45, %v95_v45 }
 0x10f   :  { %v82_v48 = vsel %vm81_vm8, %v277_v34, %v78_v46 }
 0x110   :  { %100 = vst.msk [vmem:[#allocation2] sm:$0xf] %vm99_vm6, %v97_v47  ;;  %v84_v49 = vmul.f32 %v82_v48, %v50_v18 }
 0x112   :  { %v90_v50 = vmul.f32 %v268_v37, %v84_v49 }
 0x114   :  { %v96_v51 = vadd.f32 %v269_v40, %v90_v50 }
 0x116   :  { %v98_v52 = vpack.c.bf16 %v96_v51, %v96_v51 }
 0x118   :  { %101 = vst.msk [vmem:[#allocation2 + $0x4] sm:$0xf] %vm99_vm6, %v98_v52 }
 0x11f   :  { %v259_v53 = vld [vmem:[#allocation2] sm:$0xff] }
 0x120   :  { %241 = vmatmul.msk.bf16.vlgmr.msra.gmra.mxu0 %vm33_vm0, %v259_v53 }
 0x19d   :  { %v144_v59 = vpop.f32.mrf.mxu0 }
 0x19e   :  { %v145_v61 = vadd.f32 %v270_v60, %v144_v59 }
 0x1a0   :  { %v149_v1 = vmax.f32 %v145_v61, 0.0 }
 0x1a5   :  { %v146_v62 = vpop.f32.mrf.mxu0 }
 0x1a6   :  { %v147_v63 = vadd.f32 %v270_v60, %v146_v62 }
 0x1a8   :  { %v150_v3 = vmax.f32 %v147_v63, 0.0 }
 0x1aa   :  { %v151_v4 = vpack.c.bf16 %v150_v3, %v149_v1 }
 0x1ac   :  { %258 = vmatmul.msk.bf16.vlgmr.msra.gmra.mxu1 %vm186_vm9, %v151_v4 }
 0x229   :  { %v199_v6 = vpop.f32.mrf.mxu1 }
 0x22a   :  { %v204_v7 = vadd.f32 %v199_v6, %v152_v5 }
 0x22c   :  { %206 = vst.msk [vmem:[#allocation3] sm:$0xff] %vm33_vm0, %v204_v7 }
 0x231   :  { %v201_v9 = vpop.f32.mrf.mxu1 }
 0x232   :  { %v205_v11 = vadd.f32 %v201_v9, %v153_v8 }
 0x233   :  { %v213_v12 = vld [vmem:[#allocation3] sm:$0xff] }
 0x234   :  { %v215_v13 = vadd.f32 %v213_v12, %v323_v0  ;;  %207 = vst.msk [vmem:[#allocation3 + $0x8] sm:$0xff] %vm33_vm0, %v205_v11 }
 0x236   :  { %v221_v14 = vadd.f32 %v271_v10, %v215_v13 }
 0x238   :  { %223 = vst.msk [vmem:[%s390_s7] sm:$0xff] %vm33_vm0, %v221_v14 }
 0x23b   :  { %v214_v15 = vld [vmem:[#allocation3 + $0x8] sm:$0xff] }
 0x23c   :  { %v216_v16 = vadd.f32 %v214_v15, %v330_v2 }
 0x23e   :  { %v222_v17 = vadd.f32 %v271_v10, %v216_v16 }
 0x240   :  { %224 = vst.msk [vmem:[%s390_s7 + $0x8] sm:$0xff] %vm33_vm0, %v222_v17 }

// kernel: decoder_forward.17
= control target key start
LH: loop header
LB: loop body
LE: loop exit
PB: predicated region body
PF: predicated region fallthrough
CT: control target
= control target key end

     0   :  { %11 = vsyncpa [#allocation4], 0  ;;  %s990_s21 = smov 0   ;;  %s992_s22 = smov 0   ;;  %s1089_s0 = inlined_call_operand.vmem [shape: bf16[2,8,32], index: 0, kind: input, shape index: {}]   ;;  %s1090_s1 = inlined_call_operand.vmem [shape: bf16[2,8,64], index: 1, kind: input, shape index: {}]   ;;  %s1091_s2 = inlined_call_operand.vmem [shape: bf16[2,1,8], index: 2, kind: input, shape index: {}]   ;;  %s1092_s3 = inlined_call_operand.hbm [shape: bf16[32,32], index: 3, kind: input, shape index: {}]   ;;  %s1093_s4 = inlined_call_operand.vmem [shape: f32[1,32], index: 4, kind: input, shape index: {}]   ;;  %s1094_s5 = inlined_call_operand.vmem [shape: f32[2,8,32], index: 5, kind: input, shape index: {}]   ;;  %s1095_s6 = inlined_call_operand.vmem [shape: f32[2,8,32], index: 6, kind: output, shape index: {}]  }
   0x1   :  { %s994_s23 = smov 0  }
   0x2 LB: > { %s786_s24 = sadd.s32 4294967295, %s939_s23   ;;  %s29_s25 = sadd.s32 1, %s935_s22  ;;  %s939_s23 = sphi %s994_s23, %s17_s23   ;;  %s935_s22 = sphi %s992_s22, %s1099_s22   ;;  %s931_s21 = sphi %s990_s21, %s1098_s21  }
   0x3   : > { %p31_p0 = scmp.ge.s32.totalorder %s29_s25, 2  ;;  %p788_p1 = scmp.ge.s32.totalorder %s939_s23, 1 }
   0x4   : > { %p212_p2 = scmp.lt.s32.totalorder %s939_s23, 3  ;;  %p826_p4 = scmp.eq.s32.totalorder %s786_s24, 0 }
   0x5   : > { %s1101_s25 = smov (%p31_p0, %s29_s25), 0  ;;  %s223_s28 = sshll.u32 %s1092_s3, 4  ;;  %s224_s28 = int_to_ptr.hbm [resolvable:$true] %s223_s28 }
   0x6   : > { %p213_p3 = pnand %p788_p1, %p212_p2  ;;  %s941_s29 = smov [#allocation3]  }
   0x7   : > { %s225_s30 = sshll.u32 %s941_s29, 4  ;;  %s942_s7 = smov 64   ;;  %s226_s30 = int_to_ptr.vmem [resolvable:$true] %s225_s30 }
   0x8   : > { %p822_p5 = pneg %p213_p3  ;;  %s943_s8 = smov 4  }
   0x9   : > { %277 = sbr.rel (%p213_p3) target bundleno = 1223 (0x4c7), region = 44 }
   0xa   : > { %p823_p6 = pnand %p826_p4, %p822_p5 }
   0xc   : > { %825 = dma.hbm_to_vmem [thread:$0]  (!%p823_p6), %s224_s28, 256, %s226_s30, [#allocation4], %s942_s7, %s942_s7, %s943_s8  }
   0xe   : > { %926 = dma.done.wait (%p826_p4), [#allocation4], 256  }
   0xf   : > { %928 = vsyncadd (%p826_p4), [#allocation4], 4294967040  ;;  %p326_p7 = scmp.lt.s32.totalorder %s931_s21, 1  ;;  %vm361_vm0 = vcmask 64512   ;;  %s944_s16 = smov 96   ;;  %v947_v10 = vmov 0  }
  0x10   : > { %s945_s17 = smov 112   ;;  %s946_s18 = smov 104   ;;  %vm407_vm3 = vcmask 1043456   ;;  %vm425_vm4 = vcmask 60416   ;;  %vm492_vm5 = vcmask 126016   ;;  %vm556_vm6 = vcmask 191616  }
  0x11   : > { %s1103_s21 = smov (!%p326_p7, %s931_s21), 1  ;;  %s948_s26 = smov 120   ;;  %vm620_vm7 = vcmask 257216   ;;  %vm643_vm8 = vcmask 261120  }
  0x12   : > { %s793_s9 = sshll.u32 %s1103_s21, 2  ;;  %s339_s24 = scalar_lea.vmem %s1091_s2, %s1103_s21 }
  0x13   : > { %s332_s12 = scalar_lea.vmem %s1089_s0, %s793_s9  ;;  %s336_s15 = scalar_lea.vmem %s1090_s1, %s793_s9  ;;  %v360_v8 = vld [vmem:[%s339_s24] sm:$0x1] }
  0x14   : > { %v355_v0 = vld [vmem:[%s332_s12] sm:$0xf]  ;;  %v381_v9 = vunpack.c.l.bf16 %v360_v8  ;;  %s949_s27 = smov 88   ;;  %s950_s28 = smov 80  }
  0x15   : > { %v359_v1 = vld [vmem:[%s336_s15] sm:$0xf]  ;;  %v356_v3 = vunpack.c.l.bf16 %v355_v0  ;;  %s951_s29 = smov 72   ;;  %s952_s30 = smov 8  }
  0x16   : > { %v366_v2 = vsel %vm361_vm0, %v359_v1, 0  ;;  %v400_v6 = vunpack.c.l.b16 %v359_v1  ;;  %vm382_vm1 = vcmp.gt.f32.partialorder %v381_v9, 0.0  ;;  %s953_s7 = smov 24   ;;  %s954_s8 = smov 16  }
  0x17   : > { %375 = vmatpush.bf16.xpose.msra.mxu0 %v366_v2  ;;  %v357_v4 = vmul.f32 0.35355338, %v356_v3  ;;  %v383_v11 = vsel %vm382_vm1, 1, %v947_v10  ;;  %s795_s9 = sshll.u32 %s1103_s21, 3 }
  0x18   : > { %v1023_v7 = vpack.c.b16 %v400_v6, %v400_v6  ;;  %v384_v14 = vperm.slane %v383_v11, 0  ;;  %s346_s12 = scalar_lea.vmem %s1094_s5, %s795_s9 }
  0x19   : > { %v358_v5 = vpack.c.bf16 %v357_v4, %v357_v4 }
  0x1a   : > { %402 = vrot.lane.b32.xlu2 %v1023_v7, %s944_s16  ;;  %vm1032_vm2 = vcmp.eq.s32.totalorder %v384_v14, 1 }
  0x1b   : > { %v428_v12 = vunpack.c.l.b16 %v358_v5 }
  0x1d   : > { %v429_v13 = vpack.c.b16 %v428_v12, %v428_v12 }
  0x1e   : > { %797 = vmatmul.msk.bf16.vlgmr.msra.gmra.mxu0 %vm361_vm0, %v358_v5 }
  0x22   : > { %496 = vrot.lane.b32.xlu2 %v1023_v7, %s945_s17 }
  0x2a   : > { %560 = vrot.lane.b32.xlu2 %v1023_v7, %s946_s18 }
  0x32   : > { %494 = vrot.lane.b32.xlu2 %v429_v13, %s945_s17  ;;  %s353_s17 = scalar_lea.vmem %s1095_s6, %s795_s9 }
  0x74   : > { %v403_v20 = vpop.permute.xlu2 %402 }
  0x75   : > { %v409_v31 = vsel %vm407_vm3, %v403_v20, 0 }
  0x76   : > { %418 = vmatpush.bf16.msra.mxu1 %v409_v31 }
  0x7c   : > { %v497_v21 = vpop.permute.xlu2 %496 }
  0x7d   : > { %v502_v32 = vsel %vm361_vm0, %v497_v21, 0 }
  0x7e   : > { %511 = vmatpush.bf16.xpose.msrb.mxu1 %v502_v32 }
  0x84   : > { %v561_v25 = vpop.permute.xlu2 %560 }
  0x85   : > { %v566_v26 = vsel %vm361_vm0, %v561_v25, 0 }
  0x86   : > { %575 = vmatpush.bf16.xpose.msrb.mxu0 %v566_v26 }
  0x8c   : > { %v495_v39 = vpop.permute.xlu2 %494 }
  0x9b   : > { %v377_v16 = vpop.f32.mrf.mxu0 }
  0x9c   : > { %v386_v17 = vsel %vm1032_vm2, %v377_v16, -1e+09 }
  0x9d   : > { %v387_v18 = vsel %vm361_vm0, %v386_v17, -inf }
  0x9e   : > { %388 = vmax.xlane.f32.xlu0 %v387_v18 }
  0xa3   : > { %v379_v19 = vpop.f32.mrf.mxu0 }
  0xb2   : > { %432 = vrot.lane.b32.xlu0 %v1023_v7, %s948_s26 }
  0xba   : > { %558 = vrot.lane.b32.xlu0 %v429_v13, %s946_s18 }
 0x111   : > { %v389_v22 = vpop.xlane.xlu0 %388 }
 0x112   : > { %v390_v23 = vsub.f32 %v386_v17, %v389_v22 }
 0x114   : > { %v391_v24 = vmul.f32 1.442695, %v390_v23 }
 0x116   : > { %867 = vpow2.f32 %v391_v24 }
 0x11c   : > { %v868_v27 = vpop.eup %867 }
 0x11d   : > { %v393_v28 = vsel %vm361_vm0, %v868_v27, 0.0 }
 0x11e   : > { %394 = vadd.xlane.f32.xlu1 %v393_v28 }
 0x124   : > { %v433_v29 = vpop.permute.xlu0 %432 }
 0x125   : > { %v438_v33 = vsel %vm361_vm0, %v433_v29, 0 }
 0x126   : > { %447 = vmatpush.bf16.xpose.msra.mxu2 %v438_v33  ;;  %v817_v33 = vld [vmem:[#allocation3 + $0x8] sm:$0xff] }
 0x12c   : > { %v559_v30 = vpop.permute.xlu0 %558 }
 0x12d   : > { %803 = vmatmul.msk.bf16.vlgmr.msrb.gmra.mxu0 %vm361_vm0, %v559_v30 }
 0x137   : > { %430 = vrot.lane.b32.xlu1 %v429_v13, %s948_s26 }
 0x191   : > { %v395_v34 = vpop.xlane.xlu1 %394 }
 0x192   : > { %869 = vrcp.f32 %v395_v34  ;;  %v816_v34 = vld [vmem:[#allocation3] sm:$0xff] }
 0x198   : > { %v870_v35 = vpop.eup %869 }
 0x199   : > { %v397_v36 = vmul.f32 %v870_v35, %v868_v27 }
 0x19b   : > { %v398_v37 = vpack.c.bf16 %v397_v36, %v397_v36 }
 0x19d   : > { %798 = vmatmul.msk.bf16.vlgmr.msra.gmra.mxu1 %vm361_vm0, %v398_v37 }
 0x19e   : > { %653 = vmatpush.bf16.msra.mxu1 %v817_v33 }
 0x1a2   : > { %654 = vmatpush.bf16.msra.mxu1 %v816_v34 }
 0x1a9   : > { %v431_v38 = vpop.permute.xlu1 %430 }
 0x1aa   : > { %799 = vmatmul.msk.bf16.vlgmr.msra.gmra.mxu2 %vm361_vm0, %v431_v38  ;;  %v577_v40 = vpop.f32.mrf.mxu0 }
 0x1ab   : > { %v581_v41 = vsel %vm1032_vm2, %v577_v40, -1e+09 }
 0x1ac   : > { %v582_v42 = vsel %vm361_vm0, %v581_v41, -inf }
 0x1ad   : > { %801 = vmatmul.msk.bf16.vlgmr.msrb.gmra.mxu1 %vm361_vm0, %v495_v39  ;;  %583 = vmax.xlane.f32.xlu0 %v582_v42  ;;  %v866_v39 = vld [vmem:[%s1093_s4] ss:$0 sm:$0xff] }
 0x1b2   : > { %v579_v43 = vpop.f32.mrf.mxu0 }
 0x21a   : > { %v420_v44 = vpop.f32.mrf.mxu1 }
 0x21b   : > { %v424_v45 = vpack.c.bf16 %v420_v44, %v420_v44 }
 0x21d   : > { %426 = vst.msk [vmem:[#allocation2] sm:$0xf] %vm425_vm4, %v424_v45 }
 0x220   : > { %v584_v57 = vpop.xlane.xlu0 %583 }
 0x221   : > { %v585_v61 = vsub.f32 %v581_v41, %v584_v57  ;;  %v660_v41 = vld [vmem:[%s346_s12] sm:$0xff] }
 0x222   : > { %v422_v46 = vpop.f32.mrf.mxu1 }
 0x223   : > { %v586_v63 = vmul.f32 1.442695, %v585_v61 }
 0x22a   : > { %v513_v47 = vpop.f32.mrf.mxu1 }
 0x22b   : > { %v517_v48 = vsel %vm1032_vm2, %v513_v47, -1e+09 }
 0x22c   : > { %v518_v49 = vsel %vm361_vm0, %v517_v48, -inf }
 0x22d   : > { %519 = vmax.xlane.f32.xlu1 %v518_v49  ;;  %v449_v50 = vpop.f32.mrf.mxu2 }
 0x22e   : > { %v453_v51 = vsel %vm1032_vm2, %v449_v50, -1e+09 }
 0x22f   : > { %v454_v52 = vsel %vm361_vm0, %v453_v51, -inf }
 0x230   : > { %455 = vmax.xlane.f32.xlu2 %v454_v52 }
 0x232   : > { %v515_v53 = vpop.f32.mrf.mxu1 }
 0x235   : > { %v451_v54 = vpop.f32.mrf.mxu2 }
 0x246   : > { %466 = vrot.lane.b32.xlu1 %v1023_v7, %s949_s27 }
 0x2a0   : > { %v520_v55 = vpop.xlane.xlu1 %519 }
 0x2a1   : > { %v521_v56 = vsub.f32 %v517_v48, %v520_v55 }
 0x2a3   : > { %v522_v58 = vmul.f32 1.442695, %v521_v56  ;;  %v456_v59 = vpop.xlane.xlu2 %455 }
 0x2a4   : > { %v457_v60 = vsub.f32 %v453_v51, %v456_v59 }
 0x2a5   : > { %871 = vpow2.f32 %v522_v58 }
 0x2a6   : > { %v458_v62 = vmul.f32 1.442695, %v457_v60 }
 0x2a8   : > { %873 = vpow2.f32 %v458_v62 }
 0x2a9   : > { %875 = vpow2.f32 %v586_v63 }
 0x2ab   : > { %v872_v0 = vpop.eup %871 }
 0x2ac   : > { %v524_v1 = vsel %vm361_vm0, %v872_v0, 0.0 }
 0x2ad   : > { %525 = vadd.xlane.f32.xlu0 %v524_v1 }
 0x2ae   : > { %v874_v2 = vpop.eup %873 }
 0x2af   : > { %v460_v3 = vsel %vm361_vm0, %v874_v2, 0.0  ;;  %v876_v4 = vpop.eup %875 }
 0x2b0   : > { %461 = vadd.xlane.f32.xlu2 %v460_v3  ;;  %v588_v5 = vsel %vm361_vm0, %v876_v4, 0.0 }
 0x2b8   : > { %589 = vadd.xlane.f32.xlu2 %v588_v5  ;;  %v467_v6 = vpop.permute.xlu1 %466 }
 0x2b9   : > { %v472_v8 = vsel %vm407_vm3, %v467_v6, 0 }
 0x2ba   : > { %481 = vmatpush.bf16.msra.mxu3 %v472_v8 }
 0x2c1   : > { %530 = vrot.lane.b32.xlu0 %v1023_v7, %s950_s28 }
 0x2d0   : > { %594 = vrot.lane.b32.xlu2 %v1023_v7, %s951_s29 }
 0x320   : > { %v526_v11 = vpop.xlane.xlu0 %525 }
 0x323   : > { %v462_v9 = vpop.xlane.xlu2 %461 }
 0x324   : > { %877 = vrcp.f32 %v462_v9 }
 0x32a   : > { %v878_v10 = vpop.eup %877 }
 0x32b   : > { %v590_v12 = vpop.xlane.xlu2 %589  ;;  %v464_v13 = vmul.f32 %v878_v10, %v874_v2 }
 0x32c   : > { %879 = vrcp.f32 %v590_v12 }
 0x32d   : > { %v465_v14 = vpack.c.bf16 %v464_v13, %v464_v13  ;;  %881 = vrcp.f32 %v526_v11 }
 0x32f   : > { %800 = vmatmul.msk.bf16.vlgmr.msra.gmra.mxu3 %vm361_vm0, %v465_v14 }
 0x332   : > { %v880_v15 = vpop.eup %879 }
 0x333   : > { %v592_v16 = vmul.f32 %v880_v15, %v876_v4  ;;  %v595_v17 = vpop.permute.xlu2 %594  ;;  %v531_v18 = vpop.permute.xlu0 %530 }
 0x334   : > { %v536_v7 = vsel %vm407_vm3, %v531_v18, 0  ;;  %v600_v19 = vsel %vm407_vm3, %v595_v17, 0  ;;  %v882_v21 = vpop.eup %881 }
 0x335   : > { %545 = vmatpush.bf16.msrb.mxu3 %v536_v7  ;;  %609 = vmatpush.bf16.msrb.mxu2 %v600_v19  ;;  %v593_v20 = vpack.c.bf16 %v592_v16, %v592_v16  ;;  %v528_v22 = vmul.f32 %v882_v21, %v872_v0 }
 0x337   : > { %v529_v23 = vpack.c.bf16 %v528_v22, %v528_v22 }
 0x338   : > { %804 = vmatmul.msk.bf16.vlgmr.msrb.gmra.mxu2 %vm361_vm0, %v593_v20 }
 0x33f   : > { %802 = vmatmul.msk.bf16.vlgmr.msrb.gmra.mxu3 %vm361_vm0, %v529_v23 }
 0x3b2   : > { %v483_v24 = vpop.f32.mrf.mxu3 }
 0x3b3   : > { %v487_v25 = vpack.c.bf16 %v483_v24, %v483_v24 }
 0x3b5   : > { %489 = vrot.lane.b32.xlu1 %v487_v25, %s952_s30 }
 0x3ba   : > { %v485_v26 = vpop.f32.mrf.mxu3 }
 0x3bb   : > { %v611_v27 = vpop.f32.mrf.mxu2 }
 0x3bc   : > { %v615_v28 = vpack.c.bf16 %v611_v27, %v611_v27 }
 0x3be   : > { %617 = vrot.lane.b32.xlu1 %v615_v28, %s953_s7 }
 0x3c2   : > { %v547_v29 = vpop.f32.mrf.mxu3 }
 0x3c3   : > { %v551_v30 = vpack.c.bf16 %v547_v29, %v547_v29  ;;  %v613_v31 = vpop.f32.mrf.mxu2 }
 0x3c5   : > { %553 = vrot.lane.b32.xlu0 %v551_v30, %s954_s8 }
 0x3ca   : > { %v549_v32 = vpop.f32.mrf.mxu3 }
 0x427   : > { %v490_v35 = vpop.permute.xlu1 %489 }
 0x428   : > { %493 = vst.msk [vmem:[#allocation2] sm:$0xf] %vm492_vm5, %v490_v35 }
 0x430   : > { %v618_v37 = vpop.permute.xlu1 %617 }
 0x437   : > { %v554_v36 = vpop.permute.xlu0 %553 }
 0x438   : > { %557 = vst.msk [vmem:[#allocation2] sm:$0xf] %vm556_vm6, %v554_v36 }
 0x439   : > { %621 = vst.msk [vmem:[#allocation2] sm:$0xf] %vm620_vm7, %v618_v37 }
 0x440   : > { %v622_v38 = vld [vmem:[#allocation2] sm:$0xf] }
 0x441   : > { %813 = vmatmul.msk.bf16.vlgmr.msra.gmra.mxu1 %vm643_vm8, %v622_v38 }
 0x4be   : > { %v656_v40 = vpop.f32.mrf.mxu1 }
 0x4bf   : > { %v657_v42 = vadd.f32 %v866_v39, %v656_v40 }
 0x4c1   : > { %v661_v43 = vadd.f32 %v660_v41, %v657_v42 }
 0x4c3   : > { %662 = vst.msk [vmem:[%s353_s17] sm:$0xff] %vm643_vm8, %v661_v43 }
 0x4c6   : > { %v658_v44 = vpop.f32.mrf.mxu1 }
 0x4c7 PF: > { %s17_s23 = sadd.s32 1, %s939_s23   ;;  %s1098_s21 = smov %s935_s22 }
 0x4c8   : > { %p14_p8 = scmp.ge.s32.totalorder %s17_s23, 4   ;;  %s1099_s22 = smov %s1101_s25 }
 0x4ca   :  { %16 = sbr.rel (!%p14_p8) target bundleno = 2 (0x2), region = 88 }
 0x4cf   :  { %688 = vsyncpa [#allocation4], 1 }
 0x4d0   :  { %690 = vsyncpa [#allocation4 + $0x1], 1 }

// kernel: decoder_forward.19
= control target key start
LH: loop header
LB: loop body
LE: loop exit
PB: predicated region body
PF: predicated region fallthrough
CT: control target
= control target key end

     0   :  { %12 = vsyncpa [#allocation3], 0  ;;  %s215_s24 = smov [#allocation2]   ;;  %s291_s0 = inlined_call_operand.vmem [shape: f32[16,32], index: 0, kind: input, shape index: {}]   ;;  %s292_s1 = inlined_call_operand.vmem [shape: f32[1,32], index: 1, kind: input, shape index: {}]   ;;  %s293_s2 = inlined_call_operand.vmem [shape: f32[1,32], index: 2, kind: input, shape index: {}]   ;;  %s294_s3 = inlined_call_operand.vmem [shape: bf16[32,96], index: 3, kind: input, shape index: {}]   ;;  %s295_s4 = inlined_call_operand.hbm [shape: f32[1,96], index: 4, kind: input, shape index: {}]   ;;  %s296_s5 = inlined_call_operand.vmem [shape: bf16[16,32], index: 5, kind: output, shape index: {0}]   ;;  %s297_s6 = inlined_call_operand.vmem [shape: bf16[16,64], index: 6, kind: output, shape index: {1}]  }
   0x1   :  { %s26_s23 = sshll.u32 %s295_s4, 4  ;;  %s28_s25 = sshll.u32 %s215_s24, 4  ;;  %s27_s23 = int_to_ptr.hbm [resolvable:$true] %s26_s23  ;;  %s29_s25 = int_to_ptr.vmem [resolvable:$true] %s28_s25 }
   0x2   :  { %31 = dma.hbm_to_vmem [thread:$0]  %s27_s23, 16, %s29_s25, [#allocation3]  }
   0x3   :  { %213 = dma.done.wait [#allocation3], 16  }
   0x4   :  { %214 = vsyncadd [#allocation3], 4294967280  ;;  %vm39_vm0 = vcmask 261120   ;;  %v37_v0 = vld [vmem:[%s291_s0] sm:$0xff]  ;;  %v38_v2 = vld [vmem:[%s291_s0 + $0x8] sm:$0xff]  ;;  %v216_v4 = vmov 32.0  }
   0x5   :  { %v40_v1 = vsel %vm39_vm0, %v37_v0, 0.0  ;;  %v43_v3 = vsel %vm39_vm0, %v38_v2, 0.0  ;;  %183 = vrcp.f32 %v216_v4  ;;  %v176_v21 = vld [vmem:[%s294_s3 + $0x8] sm:$0xff]  ;;  %v175_v23 = vld [vmem:[%s294_s3] sm:$0xff]  ;;  %vm143_vm8 = vcmask 257024   ;;  %s217_s12 = smov 96  }
   0x6   :  { %41 = vadd.xlane.f32.xlu0 %v40_v1  ;;  %133 = vmatpush.bf16.msra.mxu0 %v176_v21  ;;  %v180_v42 = vld [vmem:[%s292_s1] ss:$0 sm:$0xff]  ;;  %vm154_vm9 = vcmask 519168  }
   0x7   :  { %v181_v47 = vld [vmem:[%s293_s2] ss:$0 sm:$0xff] }
   0x8   :  { %v182_v52 = vld [vmem:[#allocation2] ss:$0 sm:$0xff] }
   0xa   :  { %134 = vmatpush.bf16.msra.mxu0 %v175_v23 }
   0xb   :  { %v184_v5 = vpop.eup %183 }
   0xc   :  { %v47_v6 = vmul.f32 32.0, %v184_v5  ;;  %vm51_vm1 = vweird.f32 %v184_v5 }
   0xe   :  { %44 = vadd.xlane.f32.xlu0 %v43_v3  ;;  %v48_v7 = vsub.f32 1.0, %v47_v6 }
  0x10   :  { %v49_v8 = vmul.f32 %v184_v5, %v48_v7 }
  0x12   :  { %v50_v9 = vadd.f32 %v184_v5, %v49_v8 }
  0x14   :  { %v52_v10 = vsel %vm51_vm1, %v184_v5, %v50_v9 }
  0x79   :  { %v42_v11 = vpop.xlane.xlu0 %41 }
  0x7a   :  { %v53_v12 = vmul.f32 %v52_v10, %v42_v11 }
  0x7c   :  { %v55_v13 = vsub.f32 %v37_v0, %v53_v12 }
  0x7e   :  { %v57_v14 = vmul.f32 %v55_v13, %v55_v13 }
  0x80   :  { %v59_v15 = vsel %vm39_vm0, %v57_v14, 0.0 }
  0x81   :  { %60 = vadd.xlane.f32.xlu1 %v59_v15  ;;  %v45_v16 = vpop.xlane.xlu0 %44 }
  0x82   :  { %v54_v17 = vmul.f32 %v52_v10, %v45_v16 }
  0x84   :  { %v56_v18 = vsub.f32 %v38_v2, %v54_v17 }
  0x86   :  { %v58_v19 = vmul.f32 %v56_v18, %v56_v18 }
  0x88   :  { %v62_v20 = vsel %vm39_vm0, %v58_v19, 0.0 }
  0x89   :  { %63 = vadd.xlane.f32.xlu1 %v62_v20 }
  0xf4   :  { %v61_v22 = vpop.xlane.xlu1 %60 }
  0xf5   :  { %v65_v24 = vmul.f32 %v61_v22, %v52_v10 }
  0xf7   :  { %v67_v25 = vadd.f32 1e-05, %v65_v24 }
  0xf9   :  { %185 = vrsqrt.f32 %v67_v25  ;;  %vm75_vm3 = vweird.f32 %v67_v25 }
  0xfc   :  { %v64_v26 = vpop.xlane.xlu1 %63 }
  0xfd   :  { %v66_v27 = vmul.f32 %v64_v26, %v52_v10 }
  0xff   :  { %v186_v28 = vpop.eup %185  ;;  %v68_v29 = vadd.f32 1e-05, %v66_v27 }
 0x100   :  { %v70_v30 = vmul.f32 %v186_v28, %v67_v25  ;;  %vm76_vm2 = vweird.f32 %v186_v28 }
 0x101   :  { %187 = vrsqrt.f32 %v68_v29  ;;  %vm77_vm4 = vmor %vm75_vm3, %vm76_vm2  ;;  %vm85_vm6 = vweird.f32 %v68_v29 }
 0x102   :  { %v71_v31 = vmul.f32 %v186_v28, %v70_v30 }
 0x104   :  { %v72_v32 = vmul.f32 0.5, %v71_v31 }
 0x106   :  { %v73_v33 = vsub.f32 1.5, %v72_v32 }
 0x107   :  { %v188_v34 = vpop.eup %187 }
 0x108   :  { %v74_v35 = vmul.f32 %v186_v28, %v73_v33  ;;  %v80_v36 = vmul.f32 %v188_v34, %v68_v29  ;;  %vm86_vm5 = vweird.f32 %v188_v34 }
 0x109   :  { %vm87_vm7 = vmor %vm85_vm6, %vm86_vm5 }
 0x10a   :  { %v81_v37 = vmul.f32 %v188_v34, %v80_v36  ;;  %v78_v38 = vsel %vm77_vm4, %v186_v28, %v74_v35 }
 0x10b   :  { %v89_v41 = vmul.f32 %v78_v38, %v55_v13 }
 0x10c   :  { %v82_v39 = vmul.f32 0.5, %v81_v37 }
 0x10d   :  { %v95_v46 = vmul.f32 %v180_v42, %v89_v41 }
 0x10e   :  { %v83_v40 = vsub.f32 1.5, %v82_v39 }
 0x10f   :  { %v101_v49 = vadd.f32 %v181_v47, %v95_v46 }
 0x110   :  { %v84_v43 = vmul.f32 %v188_v34, %v83_v40 }
 0x112   :  { %v88_v44 = vsel %vm87_vm7, %v188_v34, %v84_v43 }
 0x113   :  { %v90_v45 = vmul.f32 %v88_v44, %v56_v18 }
 0x115   :  { %v96_v48 = vmul.f32 %v180_v42, %v90_v45 }
 0x117   :  { %v102_v50 = vadd.f32 %v181_v47, %v96_v48 }
 0x119   :  { %v103_v51 = vpack.c.bf16 %v102_v50, %v101_v49 }
 0x11b   :  { %174 = vmatmul.msk.bf16.vlgmr.msra.gmra.mxu0 %vm39_vm0, %v103_v51 }
 0x198   :  { %v136_v53 = vpop.f32.mrf.mxu0 }
 0x199   :  { %v137_v54 = vadd.f32 %v182_v52, %v136_v53 }
 0x19b   :  { %v141_v55 = vpack.c.bf16 %v137_v54, %v137_v54 }
 0x19d   :  { %144 = vst.msk [vmem:[%s296_s5] sm:$0xf] %vm143_vm8, %v141_v55  ;;  %148 = vrot.lane.b32.xlu2 %v141_v55, %s217_s12 }
 0x1a0   :  { %v138_v56 = vpop.f32.mrf.mxu0 }
 0x1a1   :  { %v139_v57 = vadd.f32 %v182_v52, %v138_v56 }
 0x1a3   :  { %v142_v58 = vpack.c.bf16 %v139_v57, %v139_v57 }
 0x1a5   :  { %145 = vst.msk [vmem:[%s296_s5 + $0x4] sm:$0xf] %vm143_vm8, %v142_v58  ;;  %150 = vrot.lane.b32.xlu2 %v142_v58, %s217_s12 }
 0x1f7   :  { %v149_v59 = vpop.permute.xlu2 %148 }
 0x1f8   :  { %155 = vst.msk [vmem:[%s297_s6] sm:$0xf] %vm154_vm9, %v149_v59 }
 0x1ff   :  { %v151_v60 = vpop.permute.xlu2 %150 }
 0x200   :  { %156 = vst.msk [vmem:[%s297_s6 + $0x4] sm:$0xf] %vm154_vm9, %v151_v60 }
 0x201   :  { %165 = vsyncpa [#allocation3], 1 }

// kernel: decoder_forward.20
= control target key start
LH: loop header
LB: loop body
LE: loop exit
PB: predicated region body
PF: predicated region fallthrough
CT: control target
= control target key end

     0   :  { %11 = vsyncpa [#allocation4], 0  ;;  %s995_s21 = smov 0   ;;  %s997_s22 = smov 0   ;;  %s1093_s0 = inlined_call_operand.vmem [shape: bf16[2,8,32], index: 0, kind: input, shape index: {}]   ;;  %s1094_s1 = inlined_call_operand.vmem [shape: bf16[2,8,64], index: 1, kind: input, shape index: {}]   ;;  %s1095_s2 = inlined_call_operand.vmem [shape: bf16[1,8,8], index: 2, kind: input, shape index: {}]   ;;  %s1096_s3 = inlined_call_operand.hbm [shape: bf16[32,32], index: 3, kind: input, shape index: {}]   ;;  %s1097_s4 = inlined_call_operand.vmem [shape: f32[1,32], index: 4, kind: input, shape index: {}]   ;;  %s1098_s5 = inlined_call_operand.vmem [shape: f32[2,8,32], index: 5, kind: input, shape index: {}]   ;;  %s1099_s6 = inlined_call_operand.vmem [shape: f32[2,8,32], index: 6, kind: output, shape index: {}]  }
   0x1   :  { %s999_s23 = smov 0  }
   0x2 LB: > { %s792_s24 = sadd.s32 4294967295, %s945_s23   ;;  %s29_s25 = sadd.s32 1, %s941_s22  ;;  %s945_s23 = sphi %s999_s23, %s17_s23   ;;  %s941_s22 = sphi %s997_s22, %s1103_s22   ;;  %s937_s21 = sphi %s995_s21, %s1102_s21  }
   0x3   : > { %p31_p0 = scmp.ge.s32.totalorder %s29_s25, 2  ;;  %p794_p1 = scmp.ge.s32.totalorder %s945_s23, 1 }
   0x4   : > { %p212_p2 = scmp.lt.s32.totalorder %s945_s23, 3  ;;  %p833_p4 = scmp.eq.s32.totalorder %s792_s24, 0 }
   0x5   : > { %s1105_s25 = smov (%p31_p0, %s29_s25), 0  ;;  %s230_s28 = sshll.u32 %s1096_s3, 4  ;;  %s231_s28 = int_to_ptr.hbm [resolvable:$true] %s230_s28 }
   0x6   : > { %p213_p3 = pnand %p794_p1, %p212_p2  ;;  %s947_s29 = smov [#allocation3]  }
   0x7   : > { %s232_s30 = sshll.u32 %s947_s29, 4  ;;  %s948_s7 = smov 64   ;;  %s233_s30 = int_to_ptr.vmem [resolvable:$true] %s232_s30 }
   0x8   : > { %p829_p5 = pneg %p213_p3  ;;  %s949_s8 = smov 4  }
   0x9   : > { %278 = sbr.rel (%p213_p3) target bundleno = 1223 (0x4c7), region = 44 }
   0xa   : > { %p830_p6 = pnand %p833_p4, %p829_p5 }
   0xc   : > { %832 = dma.hbm_to_vmem [thread:$0]  (!%p830_p6), %s231_s28, 256, %s233_s30, [#allocation4], %s948_s7, %s948_s7, %s949_s8  }
   0xe   : > { %932 = dma.done.wait (%p833_p4), [#allocation4], 256  }
   0xf   : > { %934 = vsyncadd (%p833_p4), [#allocation4], 4294967040  ;;  %p328_p7 = scmp.lt.s32.totalorder %s937_s21, 1  ;;  %vm364_vm0 = vcmask 64512   ;;  %s950_s16 = smov 96   ;;  %vm407_vm2 = vcmask 1043456  }
  0x10   : > { %s951_s17 = smov 112   ;;  %s952_s18 = smov 104   ;;  %v363_v8 = vld [vmem:[%s1095_s2] sm:$0xf]  ;;  %vm425_vm3 = vcmask 60416   ;;  %vm492_vm4 = vcmask 126016  }
  0x11   : > { %s1107_s21 = smov (!%p328_p7, %s937_s21), 1  ;;  %v384_v11 = vunpack.c.l.bf16 %v363_v8  ;;  %s953_s24 = smov 120   ;;  %vm556_vm5 = vcmask 191616   ;;  %vm620_vm6 = vcmask 257216   ;;  %vm643_vm7 = vcmask 261120  }
  0x12   : > { %s800_s9 = sshll.u32 %s1107_s21, 2  ;;  %s954_s26 = smov 88  }
  0x13   : > { %s334_s12 = scalar_lea.vmem %s1093_s0, %s800_s9  ;;  %s338_s15 = scalar_lea.vmem %s1094_s1, %s800_s9  ;;  %vm1036_vm1 = vcmp.gt.f32.partialorder %v384_v11, 0.0 }
  0x14   : > { %v358_v0 = vld [vmem:[%s334_s12] sm:$0xf]  ;;  %s955_s27 = smov 80   ;;  %s956_s28 = smov 72  }
  0x15   : > { %v362_v1 = vld [vmem:[%s338_s15] sm:$0xf]  ;;  %v359_v3 = vunpack.c.l.bf16 %v358_v0  ;;  %s957_s29 = smov 8   ;;  %s958_s30 = smov 24  }
  0x16   : > { %v369_v2 = vsel %vm364_vm0, %v362_v1, 0  ;;  %v400_v6 = vunpack.c.l.b16 %v362_v1  ;;  %s959_s7 = smov 16   ;;  %s802_s8 = sshll.u32 %s1107_s21, 3 }
  0x17   : > { %378 = vmatpush.bf16.xpose.msra.mxu0 %v369_v2  ;;  %v360_v4 = vmul.f32 0.35355338, %v359_v3  ;;  %s349_s11 = scalar_lea.vmem %s1098_s5, %s802_s8 }
  0x18   : > { %v1028_v7 = vpack.c.b16 %v400_v6, %v400_v6 }
  0x19   : > { %v361_v5 = vpack.c.bf16 %v360_v4, %v360_v4 }
  0x1a   : > { %402 = vrot.lane.b32.xlu2 %v1028_v7, %s950_s16  ;;  %s356_s16 = scalar_lea.vmem %s1099_s6, %s802_s8 }
  0x1b   : > { %v428_v9 = vunpack.c.l.b16 %v361_v5 }
  0x1d   : > { %v429_v10 = vpack.c.b16 %v428_v9, %v428_v9 }
  0x1e   : > { %804 = vmatmul.msk.bf16.vlgmr.msra.gmra.mxu0 %vm364_vm0, %v361_v5 }
  0x22   : > { %496 = vrot.lane.b32.xlu2 %v1028_v7, %s951_s17 }
  0x2a   : > { %560 = vrot.lane.b32.xlu2 %v1028_v7, %s952_s18 }
  0x32   : > { %494 = vrot.lane.b32.xlu2 %v429_v10, %s951_s17 }
  0x74   : > { %v403_v17 = vpop.permute.xlu2 %402 }
  0x75   : > { %v409_v28 = vsel %vm407_vm2, %v403_v17, 0 }
  0x76   : > { %418 = vmatpush.bf16.msra.mxu1 %v409_v28 }
  0x7c   : > { %v497_v18 = vpop.permute.xlu2 %496 }
  0x7d   : > { %v502_v29 = vsel %vm364_vm0, %v497_v18, 0 }
  0x7e   : > { %511 = vmatpush.bf16.xpose.msrb.mxu1 %v502_v29 }
  0x84   : > { %v561_v22 = vpop.permute.xlu2 %560 }
  0x85   : > { %v566_v23 = vsel %vm364_vm0, %v561_v22, 0 }
  0x86   : > { %575 = vmatpush.bf16.xpose.msrb.mxu0 %v566_v23 }
  0x8c   : > { %v495_v36 = vpop.permute.xlu2 %494 }
  0x9b   : > { %v380_v13 = vpop.f32.mrf.mxu0 }
  0x9c   : > { %v386_v14 = vsel %vm1036_vm1, %v380_v13, -1e+09 }
  0x9d   : > { %v387_v15 = vsel %vm364_vm0, %v386_v14, -inf }
  0x9e   : > { %388 = vmax.xlane.f32.xlu0 %v387_v15 }
  0xa3   : > { %v382_v16 = vpop.f32.mrf.mxu0 }
  0xb2   : > { %432 = vrot.lane.b32.xlu0 %v1028_v7, %s953_s24 }
  0xba   : > { %558 = vrot.lane.b32.xlu0 %v429_v10, %s952_s18 }
 0x111   : > { %v389_v19 = vpop.xlane.xlu0 %388 }
 0x112   : > { %v390_v20 = vsub.f32 %v386_v14, %v389_v19 }
 0x114   : > { %v391_v21 = vmul.f32 1.442695, %v390_v20 }
 0x116   : > { %873 = vpow2.f32 %v391_v21 }
 0x11c   : > { %v874_v24 = vpop.eup %873 }
 0x11d   : > { %v393_v25 = vsel %vm364_vm0, %v874_v24, 0.0 }
 0x11e   : > { %394 = vadd.xlane.f32.xlu1 %v393_v25 }
 0x124   : > { %v433_v26 = vpop.permute.xlu0 %432 }
 0x125   : > { %v438_v30 = vsel %vm364_vm0, %v433_v26, 0 }
 0x126   : > { %447 = vmatpush.bf16.xpose.msra.mxu2 %v438_v30  ;;  %v824_v30 = vld [vmem:[#allocation3 + $0x8] sm:$0xff] }
 0x12c   : > { %v559_v27 = vpop.permute.xlu0 %558 }
 0x12d   : > { %810 = vmatmul.msk.bf16.vlgmr.msrb.gmra.mxu0 %vm364_vm0, %v559_v27 }
 0x137   : > { %430 = vrot.lane.b32.xlu1 %v429_v10, %s953_s24 }
 0x191   : > { %v395_v31 = vpop.xlane.xlu1 %394 }
 0x192   : > { %875 = vrcp.f32 %v395_v31  ;;  %v823_v31 = vld [vmem:[#allocation3] sm:$0xff] }
 0x198   : > { %v876_v32 = vpop.eup %875 }
 0x199   : > { %v397_v33 = vmul.f32 %v876_v32, %v874_v24 }
 0x19b   : > { %v398_v34 = vpack.c.bf16 %v397_v33, %v397_v33 }
 0x19d   : > { %805 = vmatmul.msk.bf16.vlgmr.msra.gmra.mxu1 %vm364_vm0, %v398_v34 }
 0x19e   : > { %653 = vmatpush.bf16.msra.mxu1 %v824_v30 }
 0x1a2   : > { %654 = vmatpush.bf16.msra.mxu1 %v823_v31 }
 0x1a9   : > { %v431_v35 = vpop.permute.xlu1 %430 }
 0x1aa   : > { %806 = vmatmul.msk.bf16.vlgmr.msra.gmra.mxu2 %vm364_vm0, %v431_v35  ;;  %v577_v37 = vpop.f32.mrf.mxu0 }
 0x1ab   : > { %v581_v38 = vsel %vm1036_vm1, %v577_v37, -1e+09 }
 0x1ac   : > { %v582_v39 = vsel %vm364_vm0, %v581_v38, -inf }
 0x1ad   : > { %808 = vmatmul.msk.bf16.vlgmr.msrb.gmra.mxu1 %vm364_vm0, %v495_v36  ;;  %583 = vmax.xlane.f32.xlu0 %v582_v39  ;;  %v872_v36 = vld [vmem:[%s1097_s4] ss:$0 sm:$0xff] }
 0x1b2   : > { %v579_v40 = vpop.f32.mrf.mxu0 }
 0x21a   : > { %v420_v41 = vpop.f32.mrf.mxu1 }
 0x21b   : > { %v424_v42 = vpack.c.bf16 %v420_v41, %v420_v41 }
 0x21d   : > { %426 = vst.msk [vmem:[#allocation2] sm:$0xf] %vm425_vm3, %v424_v42 }
 0x220   : > { %v584_v54 = vpop.xlane.xlu0 %583 }
 0x221   : > { %v585_v58 = vsub.f32 %v581_v38, %v584_v54  ;;  %v660_v38 = vld [vmem:[%s349_s11] sm:$0xff] }
 0x222   : > { %v422_v43 = vpop.f32.mrf.mxu1 }
 0x223   : > { %v586_v60 = vmul.f32 1.442695, %v585_v58 }
 0x22a   : > { %v513_v44 = vpop.f32.mrf.mxu1 }
 0x22b   : > { %v517_v45 = vsel %vm1036_vm1, %v513_v44, -1e+09 }
 0x22c   : > { %v518_v46 = vsel %vm364_vm0, %v517_v45, -inf }
 0x22d   : > { %519 = vmax.xlane.f32.xlu1 %v518_v46  ;;  %v449_v47 = vpop.f32.mrf.mxu2 }
 0x22e   : > { %v453_v48 = vsel %vm1036_vm1, %v449_v47, -1e+09 }
 0x22f   : > { %v454_v49 = vsel %vm364_vm0, %v453_v48, -inf }
 0x230   : > { %455 = vmax.xlane.f32.xlu2 %v454_v49 }
 0x232   : > { %v515_v50 = vpop.f32.mrf.mxu1 }
 0x235   : > { %v451_v51 = vpop.f32.mrf.mxu2 }
 0x246   : > { %466 = vrot.lane.b32.xlu1 %v1028_v7, %s954_s26 }
 0x2a0   : > { %v520_v52 = vpop.xlane.xlu1 %519 }
 0x2a1   : > { %v521_v53 = vsub.f32 %v517_v45, %v520_v52 }
 0x2a3   : > { %v522_v55 = vmul.f32 1.442695, %v521_v53  ;;  %v456_v56 = vpop.xlane.xlu2 %455 }
 0x2a4   : > { %v457_v57 = vsub.f32 %v453_v48, %v456_v56 }
 0x2a5   : > { %877 = vpow2.f32 %v522_v55 }
 0x2a6   : > { %v458_v59 = vmul.f32 1.442695, %v457_v57 }
 0x2a8   : > { %879 = vpow2.f32 %v458_v59 }
 0x2a9   : > { %881 = vpow2.f32 %v586_v60 }
 0x2ab   : > { %v878_v61 = vpop.eup %877 }
 0x2ac   : > { %v524_v62 = vsel %vm364_vm0, %v878_v61, 0.0 }
 0x2ad   : > { %525 = vadd.xlane.f32.xlu0 %v524_v62 }
 0x2ae   : > { %v880_v63 = vpop.eup %879 }
 0x2af   : > { %v460_v0 = vsel %vm364_vm0, %v880_v63, 0.0  ;;  %v882_v1 = vpop.eup %881 }
 0x2b0   : > { %461 = vadd.xlane.f32.xlu2 %v460_v0  ;;  %v588_v2 = vsel %vm364_vm0, %v882_v1, 0.0 }
 0x2b8   : > { %589 = vadd.xlane.f32.xlu2 %v588_v2  ;;  %v467_v3 = vpop.permute.xlu1 %466 }
 0x2b9   : > { %v472_v4 = vsel %vm407_vm2, %v467_v3, 0 }
 0x2ba   : > { %481 = vmatpush.bf16.msra.mxu3 %v472_v4 }
 0x2c1   : > { %530 = vrot.lane.b32.xlu0 %v1028_v7, %s955_s27 }
 0x2d0   : > { %594 = vrot.lane.b32.xlu2 %v1028_v7, %s956_s28 }
 0x320   : > { %v526_v8 = vpop.xlane.xlu0 %525 }
 0x323   : > { %v462_v5 = vpop.xlane.xlu2 %461 }
 0x324   : > { %883 = vrcp.f32 %v462_v5 }
 0x32a   : > { %v884_v6 = vpop.eup %883 }
 0x32b   : > { %v590_v9 = vpop.xlane.xlu2 %589  ;;  %v464_v10 = vmul.f32 %v884_v6, %v880_v63 }
 0x32c   : > { %885 = vrcp.f32 %v590_v9 }
 0x32d   : > { %v465_v11 = vpack.c.bf16 %v464_v10, %v464_v10  ;;  %887 = vrcp.f32 %v526_v8 }
 0x32f   : > { %807 = vmatmul.msk.bf16.vlgmr.msra.gmra.mxu3 %vm364_vm0, %v465_v11 }
 0x332   : > { %v886_v12 = vpop.eup %885 }
 0x333   : > { %v592_v13 = vmul.f32 %v886_v12, %v882_v1  ;;  %v595_v14 = vpop.permute.xlu2 %594  ;;  %v531_v15 = vpop.permute.xlu0 %530 }
 0x334   : > { %v536_v7 = vsel %vm407_vm2, %v531_v15, 0  ;;  %v600_v16 = vsel %vm407_vm2, %v595_v14, 0  ;;  %v888_v18 = vpop.eup %887 }
 0x335   : > { %545 = vmatpush.bf16.msrb.mxu3 %v536_v7  ;;  %609 = vmatpush.bf16.msrb.mxu2 %v600_v16  ;;  %v593_v17 = vpack.c.bf16 %v592_v13, %v592_v13  ;;  %v528_v19 = vmul.f32 %v888_v18, %v878_v61 }
 0x337   : > { %v529_v20 = vpack.c.bf16 %v528_v19, %v528_v19 }
 0x338   : > { %811 = vmatmul.msk.bf16.vlgmr.msrb.gmra.mxu2 %vm364_vm0, %v593_v17 }
 0x33f   : > { %809 = vmatmul.msk.bf16.vlgmr.msrb.gmra.mxu3 %vm364_vm0, %v529_v20 }
 0x3b2   : > { %v483_v21 = vpop.f32.mrf.mxu3 }
 0x3b3   : > { %v487_v22 = vpack.c.bf16 %v483_v21, %v483_v21 }
 0x3b5   : > { %489 = vrot.lane.b32.xlu1 %v487_v22, %s957_s29 }
 0x3ba   : > { %v485_v23 = vpop.f32.mrf.mxu3 }
 0x3bb   : > { %v611_v24 = vpop.f32.mrf.mxu2 }
 0x3bc   : > { %v615_v25 = vpack.c.bf16 %v611_v24, %v611_v24 }
 0x3be   : > { %617 = vrot.lane.b32.xlu1 %v615_v25, %s958_s30 }
 0x3c2   : > { %v547_v26 = vpop.f32.mrf.mxu3 }
 0x3c3   : > { %v551_v27 = vpack.c.bf16 %v547_v26, %v547_v26  ;;  %v613_v28 = vpop.f32.mrf.mxu2 }
 0x3c5   : > { %553 = vrot.lane.b32.xlu0 %v551_v27, %s959_s7 }
 0x3ca   : > { %v549_v29 = vpop.f32.mrf.mxu3 }
 0x427   : > { %v490_v32 = vpop.permute.xlu1 %489 }
 0x428   : > { %493 = vst.msk [vmem:[#allocation2] sm:$0xf] %vm492_vm4, %v490_v32 }
 0x430   : > { %v618_v34 = vpop.permute.xlu1 %617 }
 0x437   : > { %v554_v33 = vpop.permute.xlu0 %553 }
 0x438   : > { %557 = vst.msk [vmem:[#allocation2] sm:$0xf] %vm556_vm5, %v554_v33 }
 0x439   : > { %621 = vst.msk [vmem:[#allocation2] sm:$0xf] %vm620_vm6, %v618_v34 }
 0x440   : > { %v622_v35 = vld [vmem:[#allocation2] sm:$0xf] }
 0x441   : > { %820 = vmatmul.msk.bf16.vlgmr.msra.gmra.mxu1 %vm643_vm7, %v622_v35 }
 0x4be   : > { %v656_v37 = vpop.f32.mrf.mxu1 }
 0x4bf   : > { %v657_v39 = vadd.f32 %v872_v36, %v656_v37 }
 0x4c1   : > { %v661_v40 = vadd.f32 %v660_v38, %v657_v39 }
 0x4c3   : > { %662 = vst.msk [vmem:[%s356_s16] sm:$0xff] %vm643_vm7, %v661_v40 }
 0x4c6   : > { %v658_v41 = vpop.f32.mrf.mxu1 }
 0x4c7 PF: > { %s17_s23 = sadd.s32 1, %s945_s23   ;;  %s1102_s21 = smov %s941_s22 }
 0x4c8   : > { %p14_p8 = scmp.ge.s32.totalorder %s17_s23, 4   ;;  %s1103_s22 = smov %s1105_s25 }
 0x4ca   :  { %16 = sbr.rel (!%p14_p8) target bundleno = 2 (0x2), region = 88 }
 0x4cf   :  { %688 = vsyncpa [#allocation4], 1 }
 0x4d0   :  { %690 = vsyncpa [#allocation4 + $0x1], 1 }

// kernel: decoder_forward.21
= control target key start
LH: loop header
LB: loop body
LE: loop exit
PB: predicated region body
PF: predicated region fallthrough
CT: control target
= control target key end

     0   :  { %10 = vsyncpa [#allocation3], 0  ;;  %s201_s21 = smov [#allocation2]   ;;  %s202_s23 = smov 64   ;;  %s264_s0 = inlined_call_operand.vmem [shape: f32[16,32], index: 0, kind: input, shape index: {}]   ;;  %s265_s1 = inlined_call_operand.vmem [shape: f32[1,32], index: 1, kind: input, shape index: {}]   ;;  %s266_s2 = inlined_call_operand.vmem [shape: f32[1,32], index: 2, kind: input, shape index: {}]   ;;  %s267_s3 = inlined_call_operand.hbm [shape: bf16[32,32], index: 3, kind: input, shape index: {}]   ;;  %s268_s4 = inlined_call_operand.vmem [shape: f32[1,32], index: 4, kind: input, shape index: {}]   ;;  %s269_s5 = inlined_call_operand.vmem [shape: bf16[16,32], index: 5, kind: output, shape index: {}]  }
   0x1   :  { %s21_s20 = sshll.u32 %s267_s3, 4  ;;  %s23_s22 = sshll.u32 %s201_s21, 4  ;;  %s22_s20 = int_to_ptr.hbm [resolvable:$true] %s21_s20  ;;  %s24_s22 = int_to_ptr.vmem [resolvable:$true] %s23_s22 }
   0x2   :  { %s203_s24 = smov 4  }
   0x3   :  { %29 = dma.hbm_to_vmem [thread:$0]  %s22_s20, 256, %s24_s22, [#allocation3], %s202_s23, %s202_s23, %s203_s24  }
   0x4   :  { %199 = dma.done.wait [#allocation3], 256  }
   0x5   :  { %200 = vsyncadd [#allocation3], 4294967040  ;;  %vm39_vm0 = vcmask 261120   ;;  %v37_v0 = vld [vmem:[%s264_s0] sm:$0xff]  ;;  %v38_v2 = vld [vmem:[%s264_s0 + $0x8] sm:$0xff]  ;;  %v204_v4 = vmov 32.0  }
   0x6   :  { %v40_v1 = vsel %vm39_vm0, %v37_v0, 0.0  ;;  %v43_v3 = vsel %vm39_vm0, %v38_v2, 0.0  ;;  %169 = vrcp.f32 %v204_v4  ;;  %v161_v21 = vld [vmem:[#allocation2 + $0x8] sm:$0xff]  ;;  %v160_v23 = vld [vmem:[#allocation2] sm:$0xff]  ;;  %vm143_vm8 = vcmask 257024  }
   0x7   :  { %41 = vadd.xlane.f32.xlu0 %v40_v1  ;;  %133 = vmatpush.bf16.msra.mxu0 %v161_v21  ;;  %v166_v42 = vld [vmem:[%s265_s1] ss:$0 sm:$0xff] }
   0x8   :  { %v167_v47 = vld [vmem:[%s266_s2] ss:$0 sm:$0xff] }
   0x9   :  { %v168_v52 = vld [vmem:[%s268_s4] ss:$0 sm:$0xff] }
   0xb   :  { %134 = vmatpush.bf16.msra.mxu0 %v160_v23 }
   0xc   :  { %v170_v5 = vpop.eup %169 }
   0xd   :  { %v47_v6 = vmul.f32 32.0, %v170_v5  ;;  %vm51_vm1 = vweird.f32 %v170_v5 }
   0xf   :  { %44 = vadd.xlane.f32.xlu0 %v43_v3  ;;  %v48_v7 = vsub.f32 1.0, %v47_v6 }
  0x11   :  { %v49_v8 = vmul.f32 %v170_v5, %v48_v7 }
  0x13   :  { %v50_v9 = vadd.f32 %v170_v5, %v49_v8 }
  0x15   :  { %v52_v10 = vsel %vm51_vm1, %v170_v5, %v50_v9 }
  0x7a   :  { %v42_v11 = vpop.xlane.xlu0 %41 }
  0x7b   :  { %v53_v12 = vmul.f32 %v52_v10, %v42_v11 }
  0x7d   :  { %v55_v13 = vsub.f32 %v37_v0, %v53_v12 }
  0x7f   :  { %v57_v14 = vmul.f32 %v55_v13, %v55_v13 }
  0x81   :  { %v59_v15 = vsel %vm39_vm0, %v57_v14, 0.0 }
  0x82   :  { %60 = vadd.xlane.f32.xlu1 %v59_v15  ;;  %v45_v16 = vpop.xlane.xlu0 %44 }
  0x83   :  { %v54_v17 = vmul.f32 %v52_v10, %v45_v16 }
  0x85   :  { %v56_v18 = vsub.f32 %v38_v2, %v54_v17 }
  0x87   :  { %v58_v19 = vmul.f32 %v56_v18, %v56_v18 }
  0x89   :  { %v62_v20 = vsel %vm39_vm0, %v58_v19, 0.0 }
  0x8a   :  { %63 = vadd.xlane.f32.xlu1 %v62_v20 }
  0xf5   :  { %v61_v22 = vpop.xlane.xlu1 %60 }
  0xf6   :  { %v65_v24 = vmul.f32 %v61_v22, %v52_v10 }
  0xf8   :  { %v67_v25 = vadd.f32 1e-05, %v65_v24 }
  0xfa   :  { %171 = vrsqrt.f32 %v67_v25  ;;  %vm75_vm3 = vweird.f32 %v67_v25 }
  0xfd   :  { %v64_v26 = vpop.xlane.xlu1 %63 }
  0xfe   :  { %v66_v27 = vmul.f32 %v64_v26, %v52_v10 }
 0x100   :  { %v172_v28 = vpop.eup %171  ;;  %v68_v29 = vadd.f32 1e-05, %v66_v27 }
 0x101   :  { %v70_v30 = vmul.f32 %v172_v28, %v67_v25  ;;  %vm76_vm2 = vweird.f32 %v172_v28 }
 0x102   :  { %173 = vrsqrt.f32 %v68_v29  ;;  %vm77_vm4 = vmor %vm75_vm3, %vm76_vm2  ;;  %vm85_vm6 = vweird.f32 %v68_v29 }
 0x103   :  { %v71_v31 = vmul.f32 %v172_v28, %v70_v30 }
 0x105   :  { %v72_v32 = vmul.f32 0.5, %v71_v31 }
 0x107   :  { %v73_v33 = vsub.f32 1.5, %v72_v32 }
 0x108   :  { %v174_v34 = vpop.eup %173 }
 0x109   :  { %v74_v35 = vmul.f32 %v172_v28, %v73_v33  ;;  %v80_v36 = vmul.f32 %v174_v34, %v68_v29  ;;  %vm86_vm5 = vweird.f32 %v174_v34 }
 0x10a   :  { %vm87_vm7 = vmor %vm85_vm6, %vm86_vm5 }
 0x10b   :  { %v81_v37 = vmul.f32 %v174_v34, %v80_v36  ;;  %v78_v38 = vsel %vm77_vm4, %v172_v28, %v74_v35 }
 0x10c   :  { %v89_v41 = vmul.f32 %v78_v38, %v55_v13 }
 0x10d   :  { %v82_v39 = vmul.f32 0.5, %v81_v37 }
 0x10e   :  { %v95_v46 = vmul.f32 %v166_v42, %v89_v41 }
 0x10f   :  { %v83_v40 = vsub.f32 1.5, %v82_v39 }
 0x110   :  { %v101_v49 = vadd.f32 %v167_v47, %v95_v46 }
 0x111   :  { %v84_v43 = vmul.f32 %v174_v34, %v83_v40 }
 0x113   :  { %v88_v44 = vsel %vm87_vm7, %v174_v34, %v84_v43 }
 0x114   :  { %v90_v45 = vmul.f32 %v88_v44, %v56_v18 }
 0x116   :  { %v96_v48 = vmul.f32 %v166_v42, %v90_v45 }
 0x118   :  { %v102_v50 = vadd.f32 %v167_v47, %v96_v48 }
 0x11a   :  { %v103_v51 = vpack.c.bf16 %v102_v50, %v101_v49 }
 0x11c   :  { %159 = vmatmul.msk.bf16.vlgmr.msra.gmra.mxu0 %vm39_vm0, %v103_v51 }
 0x199   :  { %v136_v53 = vpop.f32.mrf.mxu0 }
 0x19a   :  { %v137_v54 = vadd.f32 %v168_v52, %v136_v53 }
 0x19c   :  { %v141_v55 = vpack.c.bf16 %v137_v54, %v137_v54 }
 0x19e   :  { %144 = vst.msk [vmem:[%s269_s5] sm:$0xf] %vm143_vm8, %v141_v55 }
 0x1a1   :  { %v138_v56 = vpop.f32.mrf.mxu0 }
 0x1a2   :  { %v139_v57 = vadd.f32 %v168_v52, %v138_v56 }
 0x1a4   :  { %v142_v58 = vpack.c.bf16 %v139_v57, %v139_v57 }
 0x1a6   :  { %145 = vst.msk [vmem:[%s269_s5 + $0x4] sm:$0xf] %vm143_vm8, %v142_v58 }
 0x1a7   :  { %150 = vsyncpa [#allocation3], 1 }

// kernel: decoder_forward.25
= control target key start
LH: loop header
LB: loop body
LE: loop exit
PB: predicated region body
PF: predicated region fallthrough
CT: control target
= control target key end

     0   :  { %vm17_vm0 = vcmask 261120   ;;  %s184_s0 = inlined_call_operand.vmem [shape: f32[16,32], index: 0, kind: input, shape index: {}]   ;;  %s185_s1 = inlined_call_operand.vmem [shape: f32[1,32], index: 1, kind: input, shape index: {}]   ;;  %s186_s2 = inlined_call_operand.vmem [shape: f32[1,32], index: 2, kind: input, shape index: {}]   ;;  %s187_s3 = inlined_call_operand.hbm [shape: f32[16,32], index: 3, kind: output, shape index: {}]  }
   0x1   :  { %v15_v0 = vld [vmem:[%s184_s0] sm:$0xff] }
   0x2   :  { %v18_v1 = vsel %vm17_vm0, %v15_v0, 0.0 }
   0x3   :  { %8 = vsyncpa [#allocation3], 0  ;;  %19 = vadd.xlane.f32.xlu0 %v18_v1  ;;  %v16_v2 = vld [vmem:[%s184_s0 + $0x8] sm:$0xff]  ;;  %v139_v4 = vmov 32.0   ;;  %v105_v35 = vld [vmem:[%s185_s1] ss:$0 sm:$0xff] }
   0x4   :  { %v21_v3 = vsel %vm17_vm0, %v16_v2, 0.0  ;;  %107 = vrcp.f32 %v139_v4  ;;  %v106_v39 = vld [vmem:[%s186_s2] ss:$0 sm:$0xff]  ;;  %s140_s1 = smov [#allocation2]   ;;  %s89_s22 = sshll.u32 %s187_s3, 4  ;;  %s90_s22 = int_to_ptr.hbm [resolvable:$true] %s89_s22 }
   0x5   :  { %s87_s19 = sshll.u32 %s140_s1, 4  ;;  %s141_s2 = smov 128   ;;  %s88_s19 = int_to_ptr.vmem [resolvable:$true] %s87_s19 }
   0x6   :  { %s142_s23 = smov 8  }
   0xa   :  { %v108_v5 = vpop.eup %107 }
   0xb   :  { %22 = vadd.xlane.f32.xlu0 %v21_v3  ;;  %v25_v6 = vmul.f32 32.0, %v108_v5  ;;  %vm29_vm1 = vweird.f32 %v108_v5 }
   0xd   :  { %v26_v7 = vsub.f32 1.0, %v25_v6 }
   0xf   :  { %v27_v8 = vmul.f32 %v108_v5, %v26_v7 }
  0x11   :  { %v28_v9 = vadd.f32 %v108_v5, %v27_v8 }
  0x13   :  { %v30_v10 = vsel %vm29_vm1, %v108_v5, %v28_v9 }
  0x76   :  { %v20_v11 = vpop.xlane.xlu0 %19 }
  0x77   :  { %v31_v12 = vmul.f32 %v30_v10, %v20_v11 }
  0x79   :  { %v33_v13 = vsub.f32 %v15_v0, %v31_v12 }
  0x7b   :  { %v35_v14 = vmul.f32 %v33_v13, %v33_v13 }
  0x7d   :  { %v37_v15 = vsel %vm17_vm0, %v35_v14, 0.0 }
  0x7e   :  { %38 = vadd.xlane.f32.xlu1 %v37_v15  ;;  %v23_v16 = vpop.xlane.xlu0 %22 }
  0x7f   :  { %v32_v17 = vmul.f32 %v30_v10, %v23_v16 }
  0x81   :  { %v34_v18 = vsub.f32 %v16_v2, %v32_v17 }
  0x83   :  { %v36_v19 = vmul.f32 %v34_v18, %v34_v18 }
  0x85   :  { %v40_v20 = vsel %vm17_vm0, %v36_v19, 0.0 }
  0x86   :  { %41 = vadd.xlane.f32.xlu1 %v40_v20 }
  0xf1   :  { %v39_v21 = vpop.xlane.xlu1 %38 }
  0xf2   :  { %v43_v22 = vmul.f32 %v39_v21, %v30_v10 }
  0xf4   :  { %v45_v23 = vadd.f32 1e-05, %v43_v22 }
  0xf6   :  { %109 = vrsqrt.f32 %v45_v23  ;;  %vm53_vm3 = vweird.f32 %v45_v23 }
  0xf9   :  { %v42_v24 = vpop.xlane.xlu1 %41 }
  0xfa   :  { %v44_v25 = vmul.f32 %v42_v24, %v30_v10 }
  0xfc   :  { %v110_v26 = vpop.eup %109  ;;  %v46_v27 = vadd.f32 1e-05, %v44_v25 }
  0xfd   :  { %v48_v28 = vmul.f32 %v110_v26, %v45_v23  ;;  %vm54_vm2 = vweird.f32 %v110_v26 }
  0xfe   :  { %111 = vrsqrt.f32 %v46_v27  ;;  %vm55_vm4 = vmor %vm53_vm3, %vm54_vm2  ;;  %vm63_vm6 = vweird.f32 %v46_v27 }
  0xff   :  { %v49_v29 = vmul.f32 %v110_v26, %v48_v28 }
 0x101   :  { %v50_v30 = vmul.f32 0.5, %v49_v29 }
 0x103   :  { %v51_v31 = vsub.f32 1.5, %v50_v30 }
 0x104   :  { %v112_v32 = vpop.eup %111 }
 0x105   :  { %v52_v33 = vmul.f32 %v110_v26, %v51_v31  ;;  %v58_v34 = vmul.f32 %v112_v32, %v46_v27  ;;  %vm64_vm5 = vweird.f32 %v112_v32 }
 0x106   :  { %vm65_vm7 = vmor %vm63_vm6, %vm64_vm5 }
 0x107   :  { %v56_v36 = vsel %vm55_vm4, %v110_v26, %v52_v33  ;;  %v59_v37 = vmul.f32 %v112_v32, %v58_v34 }
 0x108   :  { %v67_v38 = vmul.f32 %v56_v36, %v33_v13 }
 0x109   :  { %v60_v40 = vmul.f32 0.5, %v59_v37 }
 0x10a   :  { %v73_v41 = vmul.f32 %v105_v35, %v67_v38 }
 0x10b   :  { %v61_v42 = vsub.f32 1.5, %v60_v40 }
 0x10c   :  { %v79_v43 = vadd.f32 %v106_v39, %v73_v41 }
 0x10d   :  { %v62_v44 = vmul.f32 %v112_v32, %v61_v42 }
 0x10e   :  { %81 = vst.msk [vmem:[#allocation2] sm:$0xff] %vm17_vm0, %v79_v43 }
 0x10f   :  { %v66_v45 = vsel %vm65_vm7, %v112_v32, %v62_v44 }
 0x110   :  { %v68_v46 = vmul.f32 %v66_v45, %v34_v18 }
 0x112   :  { %v74_v47 = vmul.f32 %v105_v35, %v68_v46 }
 0x114   :  { %v80_v48 = vadd.f32 %v106_v39, %v74_v47 }
 0x116   :  { %82 = vst.msk [vmem:[#allocation2 + $0x8] sm:$0xff] %vm17_vm0, %v80_v48 }
 0x117   :  { %95 = dma.vmem_to_hbm [thread:$0]  %s88_s19, 256, %s90_s22, [#allocation3], %s141_s2, %s141_s2, %s142_s23  }
 0x118   :  { %137 = dma.done.wait [#allocation3], 256  }
 0x119   :  { %138 = vsyncadd [#allocation3], 4294967040 }
 0x11a   :  { %100 = vsyncpa [#allocation3], 1 }

// kernel: decoder_forward.22
= control target key start
LH: loop header
LB: loop body
LE: loop exit
PB: predicated region body
PF: predicated region fallthrough
CT: control target
= control target key end

     0   :  { %8 = vsyncpa [#allocation3], 0  ;;  %s210_s0 = inlined_call_operand.hbm [shape: f32[16,32], index: 0, kind: input, shape index: {}]   ;;  %s211_s1 = inlined_call_operand.hbm [shape: bf16[32,64], index: 1, kind: input, shape index: {}]   ;;  %s212_s2 = inlined_call_operand.vmem [shape: f32[1,64], index: 2, kind: input, shape index: {}]   ;;  %s213_s3 = inlined_call_operand.vmem [shape: bf16[16,64], index: 3, kind: output, shape index: {}]  }
   0x1   :  { %s14_s14 = sshll.u32 %s210_s0, 4  ;;  %s15_s14 = int_to_ptr.hbm [resolvable:$true] %s14_s14 }
   0x2   :  { %9 = vsyncpa [#allocation5], 0  ;;  %s169_s15 = smov [#allocation2]   ;;  %s27_s19 = sshll.u32 %s211_s1, 4  ;;  %s28_s19 = int_to_ptr.hbm [resolvable:$true] %s27_s19 }
   0x3   :  { %s16_s16 = sshll.u32 %s169_s15, 4  ;;  %s170_s20 = smov 128   ;;  %s17_s16 = int_to_ptr.vmem [resolvable:$true] %s16_s16 }
   0x4   :  { %s171_s21 = smov 8   ;;  %s172_s22 = smov [#allocation4]  }
   0x5   :  { %22 = dma.hbm_to_vmem [thread:$0]  %s15_s14, 256, %s17_s16, [#allocation3], %s170_s20, %s170_s20, %s171_s21  }
   0x6   :  { %s29_s23 = sshll.u32 %s172_s22, 4  ;;  %s173_s24 = smov 64   ;;  %s30_s23 = int_to_ptr.vmem [resolvable:$true] %s29_s23 }
   0x7   :  { %s174_s25 = smov 4  }
   0x8   :  { %35 = dma.hbm_to_vmem [thread:$0]  %s28_s19, 256, %s30_s23, [#allocation5], %s173_s24, %s173_s24, %s174_s25  }
   0x9   :  { %165 = dma.done.wait [#allocation3], 256  }
   0xa   :  { %166 = vsyncadd [#allocation3], 4294967040 }
   0xb   :  { %167 = dma.done.wait [#allocation5], 256  }
   0xc   :  { %168 = vsyncadd [#allocation5], 4294967040  ;;  %v109_v0 = vld [vmem:[#allocation4 + $0x8] sm:$0xff]  ;;  %v108_v1 = vld [vmem:[#allocation4] sm:$0xff]  ;;  %vm70_vm0 = vcmask 261120   ;;  %vm90_vm1 = vcmask 519168  }
   0xd   :  { %80 = vmatpush.bf16.msra.mxu0 %v109_v0  ;;  %v47_v2 = vld [vmem:[#allocation2] sm:$0xff]  ;;  %v48_v3 = vld [vmem:[#allocation2 + $0x8] sm:$0xff] }
   0xe   :  { %v49_v4 = vpack.c.bf16 %v48_v3, %v47_v2  ;;  %v116_v5 = vld [vmem:[%s212_s2] ss:$0 sm:$0xff] }
  0x11   :  { %81 = vmatpush.bf16.msra.mxu0 %v108_v1 }
  0x14   :  { %107 = vmatmul.msk.bf16.vlgmr.msra.gmra.mxu0 %vm70_vm0, %v49_v4 }
  0x91   :  { %v83_v6 = vpop.f32.mrf.mxu0 }
  0x92   :  { %v84_v7 = vadd.f32 %v116_v5, %v83_v6 }
  0x94   :  { %v88_v8 = vpack.c.bf16 %v84_v7, %v84_v7 }
  0x96   :  { %91 = vst.msk [vmem:[%s213_s3] sm:$0xf] %vm90_vm1, %v88_v8 }
  0x99   :  { %v85_v9 = vpop.f32.mrf.mxu0 }
  0x9a   :  { %v86_v10 = vadd.f32 %v116_v5, %v85_v9 }
  0x9c   :  { %v89_v11 = vpack.c.bf16 %v86_v10, %v86_v10 }
  0x9e   :  { %92 = vst.msk [vmem:[%s213_s3 + $0x4] sm:$0xf] %vm90_vm1, %v89_v11 }
  0x9f   :  { %97 = vsyncpa [#allocation3], 1 }
  0xa0   :  { %98 = vsyncpa [#allocation5], 1 }

</bundles_post_ra>
